<compile_context>
chip_gen: v6e
topology: v6e:2x2x1
jax: 0.10.0
libtpu: 0.0.40
codegen_flags: <defaults>
</compile_context>

<pallas_src>
import math

import jax
import jax.numpy as jnp
from jax.experimental import pallas as pl
from jax.experimental.pallas import tpu as pltpu


# ---------------------------------------------------------------------------
# Single fused kernel: 3 projections -> image*audio -> tensor fusion -> MLP.
# Weights pre-transposed to (in_features, out_features); matmul weights bf16,
# biases f32.  rexp/texp are the 0/1 repeat/tile expansion matrices (bf16).
# ---------------------------------------------------------------------------
def _tensor_fusion_kernel(img_ref, aud_ref, txt_ref,
                          wi_ref, bi_ref, wa_ref, ba_ref, wt_ref, bt_ref,
                          rexp_ref, texp_ref,
                          w1_ref, b1_ref, w2_ref, b2_ref,
                          out_ref):
    bf16 = jnp.bfloat16
    f32 = jnp.float32

    # --- three linear projections (bf16 MXU operands, f32 accumulate) -------
    img_p = jnp.dot(img_ref[...].astype(bf16), wi_ref[...],
                    preferred_element_type=f32) + bi_ref[...]
    aud_p = jnp.dot(aud_ref[...].astype(bf16), wa_ref[...],
                    preferred_element_type=f32) + ba_ref[...]
    txt_p = jnp.dot(txt_ref[...].astype(bf16), wt_ref[...],
                    preferred_element_type=f32) + bt_ref[...]
    ia = img_p * aud_p                                     # (B, D) f32, VPU

    # --- lane-dense tensor-fusion operand: fused[b, i*D+j] = ia[b,i]*txt[b,j]
    # Built via constant 0/1 Kronecker matmuls; never materializes (B, D, D)
    # and never reshapes, so the value stays lane-dense end to end.
    ia_rep = jnp.dot(ia.astype(bf16), rexp_ref[...],       # "repeat" along lanes
                     preferred_element_type=f32)           # (B, D*D)
    txt_tile = jnp.dot(txt_p.astype(bf16), texp_ref[...],  # "tile" along lanes
                       preferred_element_type=f32)         # (B, D*D)
    fused = (ia_rep * txt_tile).astype(bf16)               # (B, D*D)

    # --- single K = D*D matmul + bias + ReLU + second MLP layer -------------
    hidden = jnp.maximum(
        jnp.dot(fused, w1_ref[...], preferred_element_type=f32) + b1_ref[...],
        0.0)                                               # (B, 1024) f32
    # NOTE: Do=32 output triggers masked vst.msk partial stores -- harmless at
    # this size; keep the last output dim a multiple of 128 if Do ever grows.
    out_ref[...] = (jnp.dot(hidden.astype(bf16), w2_ref[...],
                            preferred_element_type=f32)
                    + b2_ref[...]).astype(out_ref.dtype)


# ---------------------------------------------------------------------------
# Wrapper: squeeze(1) on the inputs, one pallas_call, untiled VMEM blocks.
# ---------------------------------------------------------------------------
def tensor_fusion_forward(image_emb, audio_emb, text_emb, params):
    img = image_emb[:, 0, :]          # squeeze(1), as in the PyTorch module
    aud = audio_emb[:, 0, :]
    txt = text_emb[:, 0, :]

    B = img.shape[0]
    Do = params["w2"].shape[1]        # final output dim (== output_dim)

    vmem = pl.BlockSpec(memory_space=pltpu.MemorySpace.VMEM)
    out = pl.pallas_call(
        _tensor_fusion_kernel,
        out_shape=jax.ShapeDtypeStruct((B, Do), jnp.float32),
        in_specs=[vmem] * 15,
        out_specs=vmem,
    )(img, aud, txt,
      params["wi"], params["bi"],
      params["wa"], params["ba"],
      params["wt"], params["bt"],
      params["rexp"], params["texp"],
      params["w1"], params["b1"],
      params["w2"], params["b2"])
    return out


# ---------------------------------------------------------------------------
# Deterministic parameter init (PyTorch nn.Linear-style uniform bounds).
# Returns (f32 params for the reference, bf16-weight params for the kernel).
# ---------------------------------------------------------------------------
def init_params(key, image_dim, audio_dim, text_dim, output_dim, hidden=1024):
    ks = jax.random.split(key, 10)

    def lin(kw, kb, fan_in, fan_out):
        bound = 1.0 / math.sqrt(fan_in)
        w = jax.random.uniform(kw, (fan_in, fan_out), jnp.float32, -bound, bound)
        b = jax.random.uniform(kb, (1, fan_out), jnp.float32, -bound, bound)
        return w, b

    wi, bi = lin(ks[0], ks[1], image_dim, output_dim)
    wa, ba = lin(ks[2], ks[3], audio_dim, output_dim)
    wt, bt = lin(ks[4], ks[5], text_dim, output_dim)
    w1, b1 = lin(ks[6], ks[7], output_dim * output_dim, hidden)
    w2, b2 = lin(ks[8], ks[9], hidden, output_dim)
    ref_params = dict(wi=wi, bi=bi, wa=wa, ba=ba, wt=wt, bt=bt,
                      w1=w1, b1=b1, w2=w2, b2=b2)

    # Constant 0/1 expansion matrices (exact in bf16):
    #   rexp: (ia  @ rexp)[b, i*D+j] = ia[b, i]   (repeat along lanes)
    #   texp: (txt @ texp)[b, i*D+j] = txt[b, j]  (tile   along lanes)
    d = output_dim
    rexp = jnp.kron(jnp.eye(d, dtype=jnp.float32), jnp.ones((1, d), jnp.float32))
    texp = jnp.kron(jnp.ones((1, d), jnp.float32), jnp.eye(d, dtype=jnp.float32))

    bf = jnp.bfloat16
    kernel_params = dict(
        wi=wi.astype(bf), bi=bi, wa=wa.astype(bf), ba=ba,
        wt=wt.astype(bf), bt=bt,
        rexp=rexp.astype(bf), texp=texp.astype(bf),
        w1=w1.astype(bf), b1=b1, w2=w2.astype(bf), b2=b2)
    return ref_params, kernel_params


# Pure-JAX f32 reference mirroring the PyTorch forward exactly.
def reference(image_emb, audio_emb, text_emb, p):
    img = image_emb[:, 0, :] @ p["wi"] + p["bi"]
    aud = audio_emb[:, 0, :] @ p["wa"] + p["ba"]
    txt = text_emb[:, 0, :] @ p["wt"] + p["bt"]
    ia = img * aud
    outer = ia[:, :, None] * txt[:, None, :]
    fused = outer.reshape(outer.shape[0], -1)
    hidden = jnp.maximum(fused @ p["w1"] + p["b1"], 0.0)
    return hidden @ p["w2"] + p["b2"]


if __name__ == "__main__":
    # Small shapes consistent with the module's forward (inputs are (B, 1, dim)).
    B, image_dim, audio_dim, text_dim, output_dim = 2, 32, 64, 32, 32

    key = jax.random.PRNGKey(0)
    k1, k2, k3, kp = jax.random.split(key, 4)
    image_emb = jax.random.normal(k1, (B, 1, image_dim), jnp.float32)
    audio_emb = jax.random.normal(k2, (B, 1, audio_dim), jnp.float32)
    text_emb = jax.random.normal(k3, (B, 1, text_dim), jnp.float32)
    ref_params, kernel_params = init_params(
        kp, image_dim, audio_dim, text_dim, output_dim)

    out = tensor_fusion_forward(image_emb, audio_emb, text_emb, kernel_params)
    out = jax.block_until_ready(out)

    ref = reference(image_emb, audio_emb, text_emb, ref_params)
    assert out.shape == (B, output_dim)
    # Tolerance reflects bf16 matmul operands (f32 accumulation) vs. an
    # all-f32 reference; an all-f32 kernel would pass at ~1e-5.
    err = float(jnp.max(jnp.abs(out - ref)))
    assert jnp.allclose(out, ref, rtol=2e-2, atol=2e-2), err
    print("KERNEL_OK")
</pallas_src>

<mosaic_0001>
module attributes {stable_mosaic.version = 11 : i64} {
  func.func @_tensor_fusion_kernel(%arg0: memref<2x32xf32, #tpu.memory_space<vmem>>, %arg1: memref<2x64xf32, #tpu.memory_space<vmem>>, %arg2: memref<2x32xf32, #tpu.memory_space<vmem>>, %arg3: memref<32x32xbf16, #tpu.memory_space<vmem>>, %arg4: memref<1x32xf32, #tpu.memory_space<vmem>>, %arg5: memref<64x32xbf16, #tpu.memory_space<vmem>>, %arg6: memref<1x32xf32, #tpu.memory_space<vmem>>, %arg7: memref<32x32xbf16, #tpu.memory_space<vmem>>, %arg8: memref<1x32xf32, #tpu.memory_space<vmem>>, %arg9: memref<32x1024xbf16, #tpu.memory_space<vmem>>, %arg10: memref<32x1024xbf16, #tpu.memory_space<vmem>>, %arg11: memref<1024x1024xbf16, #tpu.memory_space<vmem>>, %arg12: memref<1x1024xf32, #tpu.memory_space<vmem>>, %arg13: memref<1024x32xbf16, #tpu.memory_space<vmem>>, %arg14: memref<1x32xf32, #tpu.memory_space<vmem>>, %arg15: memref<2x32xf32, #tpu.memory_space<vmem>>) attributes {dimension_semantics = [], scalar_prefetch = 0 : i64, scratch_operands = 0 : i64, tpu.core_type = #tpu.core_type<tc>} {
    %c0 = arith.constant 0 : index
    %c0_0 = arith.constant 0 : index
    %0 = vector.load %arg0[%c0, %c0_0] : memref<2x32xf32, #tpu.memory_space<vmem>>, vector<2x32xf32>
    %1 = arith.truncf %0 : vector<2x32xf32> to vector<2x32xbf16>
    %c0_1 = arith.constant 0 : index
    %c0_2 = arith.constant 0 : index
    %2 = vector.load %arg3[%c0_1, %c0_2] : memref<32x32xbf16, #tpu.memory_space<vmem>>, vector<32x32xbf16>
    %cst = arith.constant dense<0.000000e+00> : vector<2x32xf32>
    %3 = tpu.matmul %1, %2, %cst {dimension_numbers = #tpu.dot_dimension_numbers<[1], [0], [0], [1], [0, 0, 1, 1], [], []>} : vector<2x32xbf16>, vector<32x32xbf16>, vector<2x32xf32> -> vector<2x32xf32>
    %c0_3 = arith.constant 0 : index
    %c0_4 = arith.constant 0 : index
    %4 = vector.load %arg4[%c0_3, %c0_4] : memref<1x32xf32, #tpu.memory_space<vmem>>, vector<1x32xf32>
    %5 = vector.broadcast %4 : vector<1x32xf32> to vector<2x32xf32>
    %6 = arith.addf %3, %5 : vector<2x32xf32>
    %c0_5 = arith.constant 0 : index
    %c0_6 = arith.constant 0 : index
    %7 = vector.load %arg1[%c0_5, %c0_6] : memref<2x64xf32, #tpu.memory_space<vmem>>, vector<2x64xf32>
    %8 = arith.truncf %7 : vector<2x64xf32> to vector<2x64xbf16>
    %c0_7 = arith.constant 0 : index
    %c0_8 = arith.constant 0 : index
    %9 = vector.load %arg5[%c0_7, %c0_8] : memref<64x32xbf16, #tpu.memory_space<vmem>>, vector<64x32xbf16>
    %cst_9 = arith.constant dense<0.000000e+00> : vector<2x32xf32>
    %10 = tpu.matmul %8, %9, %cst_9 {dimension_numbers = #tpu.dot_dimension_numbers<[1], [0], [0], [1], [0, 0, 1, 1], [], []>} : vector<2x64xbf16>, vector<64x32xbf16>, vector<2x32xf32> -> vector<2x32xf32>
    %c0_10 = arith.constant 0 : index
    %c0_11 = arith.constant 0 : index
    %11 = vector.load %arg6[%c0_10, %c0_11] : memref<1x32xf32, #tpu.memory_space<vmem>>, vector<1x32xf32>
    %12 = vector.broadcast %11 : vector<1x32xf32> to vector<2x32xf32>
    %13 = arith.addf %10, %12 : vector<2x32xf32>
    %c0_12 = arith.constant 0 : index
    %c0_13 = arith.constant 0 : index
    %14 = vector.load %arg2[%c0_12, %c0_13] : memref<2x32xf32, #tpu.memory_space<vmem>>, vector<2x32xf32>
    %15 = arith.truncf %14 : vector<2x32xf32> to vector<2x32xbf16>
    %c0_14 = arith.constant 0 : index
    %c0_15 = arith.constant 0 : index
    %16 = vector.load %arg7[%c0_14, %c0_15] : memref<32x32xbf16, #tpu.memory_space<vmem>>, vector<32x32xbf16>
    %cst_16 = arith.constant dense<0.000000e+00> : vector<2x32xf32>
    %17 = tpu.matmul %15, %16, %cst_16 {dimension_numbers = #tpu.dot_dimension_numbers<[1], [0], [0], [1], [0, 0, 1, 1], [], []>} : vector<2x32xbf16>, vector<32x32xbf16>, vector<2x32xf32> -> vector<2x32xf32>
    %c0_17 = arith.constant 0 : index
    %c0_18 = arith.constant 0 : index
    %18 = vector.load %arg8[%c0_17, %c0_18] : memref<1x32xf32, #tpu.memory_space<vmem>>, vector<1x32xf32>
    %19 = vector.broadcast %18 : vector<1x32xf32> to vector<2x32xf32>
    %20 = arith.addf %17, %19 : vector<2x32xf32>
    %21 = arith.mulf %6, %13 : vector<2x32xf32>
    %22 = arith.truncf %21 : vector<2x32xf32> to vector<2x32xbf16>
    %c0_19 = arith.constant 0 : index
    %c0_20 = arith.constant 0 : index
    %23 = vector.load %arg9[%c0_19, %c0_20] : memref<32x1024xbf16, #tpu.memory_space<vmem>>, vector<32x1024xbf16>
    %cst_21 = arith.constant dense<0.000000e+00> : vector<2x1024xf32>
    %24 = tpu.matmul %22, %23, %cst_21 {dimension_numbers = #tpu.dot_dimension_numbers<[1], [0], [0], [1], [0, 0, 1, 1], [], []>} : vector<2x32xbf16>, vector<32x1024xbf16>, vector<2x1024xf32> -> vector<2x1024xf32>
    %25 = arith.truncf %20 : vector<2x32xf32> to vector<2x32xbf16>
    %c0_22 = arith.constant 0 : index
    %c0_23 = arith.constant 0 : index
    %26 = vector.load %arg10[%c0_22, %c0_23] : memref<32x1024xbf16, #tpu.memory_space<vmem>>, vector<32x1024xbf16>
    %cst_24 = arith.constant dense<0.000000e+00> : vector<2x1024xf32>
    %27 = tpu.matmul %25, %26, %cst_24 {dimension_numbers = #tpu.dot_dimension_numbers<[1], [0], [0], [1], [0, 0, 1, 1], [], []>} : vector<2x32xbf16>, vector<32x1024xbf16>, vector<2x1024xf32> -> vector<2x1024xf32>
    %28 = arith.mulf %24, %27 : vector<2x1024xf32>
    %29 = arith.truncf %28 : vector<2x1024xf32> to vector<2x1024xbf16>
    %c0_25 = arith.constant 0 : index
    %c0_26 = arith.constant 0 : index
    %30 = vector.load %arg11[%c0_25, %c0_26] : memref<1024x1024xbf16, #tpu.memory_space<vmem>>, vector<1024x1024xbf16>
    %cst_27 = arith.constant dense<0.000000e+00> : vector<2x1024xf32>
    %31 = tpu.matmul %29, %30, %cst_27 {dimension_numbers = #tpu.dot_dimension_numbers<[1], [0], [0], [1], [0, 0, 1, 1], [], []>} : vector<2x1024xbf16>, vector<1024x1024xbf16>, vector<2x1024xf32> -> vector<2x1024xf32>
    %c0_28 = arith.constant 0 : index
    %c0_29 = arith.constant 0 : index
    %32 = vector.load %arg12[%c0_28, %c0_29] : memref<1x1024xf32, #tpu.memory_space<vmem>>, vector<1x1024xf32>
    %33 = vector.broadcast %32 : vector<1x1024xf32> to vector<2x1024xf32>
    %34 = arith.addf %31, %33 : vector<2x1024xf32>
    %cst_30 = arith.constant 0.000000e+00 : f32
    %35 = vector.broadcast %cst_30 : f32 to vector<2x1024xf32>
    %36 = arith.maximumf %34, %35 : vector<2x1024xf32>
    %37 = arith.truncf %36 : vector<2x1024xf32> to vector<2x1024xbf16>
    %c0_31 = arith.constant 0 : index
    %c0_32 = arith.constant 0 : index
    %38 = vector.load %arg13[%c0_31, %c0_32] : memref<1024x32xbf16, #tpu.memory_space<vmem>>, vector<1024x32xbf16>
    %cst_33 = arith.constant dense<0.000000e+00> : vector<2x32xf32>
    %39 = tpu.matmul %37, %38, %cst_33 {dimension_numbers = #tpu.dot_dimension_numbers<[1], [0], [0], [1], [0, 0, 1, 1], [], []>} : vector<2x1024xbf16>, vector<1024x32xbf16>, vector<2x32xf32> -> vector<2x32xf32>
    %c0_34 = arith.constant 0 : index
    %c0_35 = arith.constant 0 : index
    %40 = vector.load %arg14[%c0_34, %c0_35] : memref<1x32xf32, #tpu.memory_space<vmem>>, vector<1x32xf32>
    %41 = vector.broadcast %40 : vector<1x32xf32> to vector<2x32xf32>
    %42 = arith.addf %39, %41 : vector<2x32xf32>
    %c0_36 = arith.constant 0 : index
    %c0_37 = arith.constant 0 : index
    %43 = vector.load %arg15[%c0_36, %c0_37] : memref<2x32xf32, #tpu.memory_space<vmem>>, vector<2x32xf32>
    tpu.vector_store %arg15[%c0_36, %c0_37], %42 {strides = array<i32>} : memref<2x32xf32, #tpu.memory_space<vmem>>, vector<2x32xf32>,
    return
  }
}

</mosaic_0001>

<bundles_post_ra>
// kernel: tpu_custom_call.1
= control target key start
LH: loop header
LB: loop body
LE: loop exit
PB: predicated region body
PF: predicated region fallthrough
CT: control target
= control target key end

     0   :  { %20 = vsyncpa [#allocation3], 0  ;;  %s7113_s0 = inlined_call_operand.hbm [shape: f32[2,32], index: 0, kind: input, shape index: {}]   ;;  %s7114_s1 = inlined_call_operand.hbm [shape: f32[2,64], index: 1, kind: input, shape index: {}]   ;;  %s7115_s2 = inlined_call_operand.hbm [shape: f32[2,32], index: 2, kind: input, shape index: {}]   ;;  %s7116_s3 = inlined_call_operand.hbm [shape: bf16[32,32], index: 3, kind: input, shape index: {}]   ;;  %s7117_s4 = inlined_call_operand.hbm [shape: f32[1,32], index: 4, kind: input, shape index: {}]   ;;  %s7118_s5 = inlined_call_operand.vmem [shape: bf16[64,32], index: 5, kind: input, shape index: {}]   ;;  %s7119_s6 = inlined_call_operand.hbm [shape: f32[1,32], index: 6, kind: input, shape index: {}]   ;;  %s7120_s7 = inlined_call_operand.hbm [shape: bf16[32,32], index: 7, kind: input, shape index: {}]   ;;  %s7121_s8 = inlined_call_operand.hbm [shape: f32[1,32], index: 8, kind: input, shape index: {}]   ;;  %s7122_s9 = inlined_call_operand.hbm [shape: bf16[32,1024], index: 9, kind: input, shape index: {}]   ;;  %s7123_s10 = inlined_call_operand.hbm [shape: bf16[32,1024], index: 10, kind: input, shape index: {}]   ;;  %s7124_s11 = inlined_call_operand.hbm [shape: bf16[1024,1024], index: 11, kind: input, shape index: {}]   ;;  %s7125_s12 = inlined_call_operand.hbm [shape: f32[1,1024], index: 12, kind: input, shape index: {}]   ;;  %s7126_s13 = inlined_call_operand.vmem [shape: bf16[1024,32], index: 13, kind: input, shape index: {}]   ;;  %s7127_s14 = inlined_call_operand.hbm [shape: f32[1,32], index: 14, kind: input, shape index: {}]   ;;  %s7128_s15 = inlined_call_operand.hbm [shape: f32[2,32], index: 15, kind: output, shape index: {}]  }
   0x1   :  { %21 = vsyncpa [#allocation6], 0 }
   0x2   :  { %22 = vsyncpa [#allocation9], 0 }
   0x3   :  { %23 = vsyncpa [#allocation12], 0 }
   0x4   :  { %24 = vsyncpa [#allocation15], 0 }
   0x5   :  { %25 = vsyncpa [#allocation18], 0 }
   0x6   :  { %26 = vsyncpa [#allocation21], 0 }
   0x7   :  { %27 = vsyncpa [#allocation4], 0  ;;  %s6615_s18 = smov [#allocation5]   ;;  %s6616_s20 = smov [#allocation8]  }
   0x8   :  { %s44_s19 = sshll.u32 %s6615_s18, 4  ;;  %s63_s21 = sshll.u32 %s6616_s20, 4  ;;  %s45_s19 = int_to_ptr.vmem [resolvable:$true] %s44_s19  ;;  %s64_s21 = int_to_ptr.vmem [resolvable:$true] %s63_s21 }
   0x9   :  { %s6327_s22 = scalar_lea.vmem %s45_s19, 32  ;;  %p6332_p1 = scmp.lt.s32.totalorder %s45_s19, %s45_s19 }
   0xa   :  { %p6328_p0 = scmp.ne.s32.totalorder %s45_s19, %s6327_s22  ;;  %p6333_p2 = scmp.lt.s32.totalorder %s6327_s22, %s6327_s22 }
   0xc   :  { %p6334_p3 = por %p6333_p2, %p6332_p1 }
   0xe   :  { %p6335_p4 = pnand %p6334_p3, %p6328_p0 }
  0x10   :  { %6338 = shalt.err (!%p6335_p4)
}
  0x11   :  { %47 = dma.hbm_to_vmem [thread:$0]  %s7114_s1, 32, %s45_s19, [#allocation6]  }
  0x12   :  { %s6347_s25 = scalar_lea.vmem %s64_s21, 256  ;;  %p6352_p6 = scmp.lt.s32.totalorder %s64_s21, %s64_s21 }
  0x13   :  { %p6348_p5 = scmp.ne.s32.totalorder %s64_s21, %s6347_s25  ;;  %p6353_p7 = scmp.lt.s32.totalorder %s6347_s25, %s6347_s25 }
  0x15   :  { %p6354_p8 = por %p6353_p7, %p6352_p6 }
  0x17   :  { %p6355_p9 = pnand %p6354_p8, %p6348_p5 }
  0x19   :  { %6358 = shalt.err (!%p6355_p9)
}
  0x1a   :  { %s6617_s26 = smov 64   ;;  %s6618_s27 = smov 4  }
  0x1b   :  { %69 = dma.hbm_to_vmem [thread:$0]  %s7116_s3, 256, %s64_s21, [#allocation9], %s6617_s26, %s6617_s26, %s6618_s27  }
  0x1c   :  { %s6619_s30 = smov [#allocation11]   ;;  %s6620_s17 = smov [#allocation14]  }
  0x1d   :  { %s88_s16 = sshll.u32 %s6619_s30, 4  ;;  %s110_s1 = sshll.u32 %s6620_s17, 4  ;;  %s89_s16 = int_to_ptr.vmem [resolvable:$true] %s88_s16  ;;  %s111_s1 = int_to_ptr.vmem [resolvable:$true] %s110_s1 }
  0x1e   :  { %s6367_s18 = scalar_lea.vmem %s89_s16, 16  ;;  %s6371_s19 = scalar_lea.vmem %s89_s16, 32 }
  0x1f   :  { %p6368_p10 = scmp.ne.s32.totalorder %s89_s16, %s6367_s18  ;;  %p6372_p11 = scmp.lt.s32.totalorder %s89_s16, %s89_s16 }
  0x20   :  { %p6373_p12 = scmp.lt.s32.totalorder %s6371_s19, %s6367_s18 }
  0x22   :  { %p6374_p13 = por %p6373_p12, %p6372_p11 }
  0x24   :  { %p6375_p0 = pnand %p6374_p13, %p6368_p10 }
  0x26   :  { %6378 = shalt.err (!%p6375_p0)
}
  0x27   :  { %91 = dma.hbm_to_vmem [thread:$0]  %s7119_s6, 16, %s89_s16, [#allocation12]  }
  0x28   :  { %s6387_s23 = scalar_lea.vmem %s111_s1, 16  ;;  %s6391_s3 = scalar_lea.vmem %s111_s1, 32 }
  0x29   :  { %p6388_p1 = scmp.ne.s32.totalorder %s111_s1, %s6387_s23  ;;  %p6392_p2 = scmp.lt.s32.totalorder %s111_s1, %s111_s1 }
  0x2a   :  { %p6393_p3 = scmp.lt.s32.totalorder %s6391_s3, %s6387_s23 }
  0x2c   :  { %p6394_p4 = por %p6393_p3, %p6392_p2 }
  0x2e   :  { %p6395_p5 = pnand %p6394_p4, %p6388_p1 }
  0x30   :  { %6398 = shalt.err (!%p6395_p5)
}
  0x31   :  { %113 = dma.hbm_to_vmem [thread:$0]  %s7121_s8, 16, %s111_s1, [#allocation15]  }
  0x32   :  { %s6621_s25 = smov [#allocation17]   ;;  %s6622_s29 = smov [#allocation20]  }
  0x33   :  { %s131_s28 = sshll.u32 %s6621_s25, 4  ;;  %s156_s30 = sshll.u32 %s6622_s29, 4  ;;  %s132_s28 = int_to_ptr.vmem [resolvable:$true] %s131_s28  ;;  %s157_s30 = int_to_ptr.vmem [resolvable:$true] %s156_s30 }
  0x34   :  { %s6407_s17 = scalar_lea.vmem %s132_s28, 2048  ;;  %p6412_p7 = scmp.lt.s32.totalorder %s132_s28, %s132_s28 }
  0x35   :  { %p6408_p6 = scmp.ne.s32.totalorder %s132_s28, %s6407_s17  ;;  %p6413_p8 = scmp.lt.s32.totalorder %s6407_s17, %s6407_s17 }
  0x37   :  { %p6414_p9 = por %p6413_p8, %p6412_p7 }
  0x39   :  { %p6415_p10 = pnand %p6414_p9, %p6408_p6 }
  0x3b   :  { %6418 = shalt.err (!%p6415_p10)
}
  0x3c   :  { %s6623_s6 = smov 512   ;;  %s6624_s16 = smov 32  }
  0x3d   :  { %137 = dma.hbm_to_vmem [thread:$0]  %s7123_s10, 2048, %s132_s28, [#allocation18], %s6623_s6, %s6623_s6, %s6624_s16  }
  0x3e   :  { %s6427_s1 = scalar_lea.vmem %s157_s30, 128  ;;  %p6432_p12 = scmp.lt.s32.totalorder %s157_s30, %s157_s30 }
  0x3f   :  { %p6428_p11 = scmp.ne.s32.totalorder %s157_s30, %s6427_s1  ;;  %p6433_p13 = scmp.lt.s32.totalorder %s6427_s1, %s6427_s1 }
  0x41   :  { %p6434_p0 = por %p6433_p13, %p6432_p12 }
  0x43   :  { %p6435_p1 = pnand %p6434_p0, %p6428_p11 }
  0x45   :  { %6438 = shalt.err (!%p6435_p1)
}
  0x46   :  { %159 = dma.hbm_to_vmem [thread:$0]  %s7125_s12, 128, %s157_s30, [#allocation21]  }
  0x47   :  { %s6625_s22 = smov [#allocation2]   ;;  %s6626_s3 = smov [#allocation7]  }
  0x48   :  { %s34_s23 = sshll.u32 %s6625_s22, 4  ;;  %s54_s21 = sshll.u32 %s6626_s3, 4  ;;  %s35_s23 = int_to_ptr.vmem [resolvable:$true] %s34_s23  ;;  %s55_s21 = int_to_ptr.vmem [resolvable:$true] %s54_s21 }
  0x49   :  { %s6447_s24 = scalar_lea.vmem %s35_s23, 32  ;;  %p6452_p3 = scmp.lt.s32.totalorder %s35_s23, %s35_s23 }
  0x4a   :  { %p6448_p2 = scmp.ne.s32.totalorder %s35_s23, %s6447_s24  ;;  %p6453_p4 = scmp.lt.s32.totalorder %s6447_s24, %s6447_s24 }
  0x4c   :  { %p6454_p5 = por %p6453_p4, %p6452_p3 }
  0x4e   :  { %p6455_p6 = pnand %p6454_p5, %p6448_p2 }
  0x50   :  { %6458 = shalt.err (!%p6455_p6)
}
  0x51   :  { %37 = dma.hbm_to_vmem [thread:$0]  %s7113_s0, 32, %s35_s23, [#allocation3]  }
  0x52   :  { %s6467_s28 = scalar_lea.vmem %s55_s21, 32  ;;  %p6472_p8 = scmp.lt.s32.totalorder %s55_s21, %s55_s21 }
  0x53   :  { %p6468_p7 = scmp.ne.s32.totalorder %s55_s21, %s6467_s28  ;;  %p6473_p9 = scmp.lt.s32.totalorder %s6467_s28, %s6467_s28 }
  0x55   :  { %p6474_p10 = por %p6473_p9, %p6472_p8 }
  0x57   :  { %p6475_p11 = pnand %p6474_p10, %p6468_p7 }
  0x59   :  { %6478 = shalt.err (!%p6475_p11)
}
  0x5a   :  { %57 = dma.hbm_to_vmem [thread:$0]  %s7115_s2, 32, %s55_s21, [#allocation6]  }
  0x5b   :  { %s6627_s30 = smov [#allocation10]   ;;  %s6628_s18 = smov [#allocation13]  }
  0x5c   :  { %s76_s17 = sshll.u32 %s6627_s30, 4  ;;  %s97_s8 = sshll.u32 %s6628_s18, 4  ;;  %s77_s17 = int_to_ptr.vmem [resolvable:$true] %s76_s17  ;;  %s98_s8 = int_to_ptr.vmem [resolvable:$true] %s97_s8 }
  0x5d   :  { %s6487_s1 = scalar_lea.vmem %s77_s17, 16  ;;  %s6491_s0 = scalar_lea.vmem %s77_s17, 32 }
  0x5e   :  { %p6488_p12 = scmp.ne.s32.totalorder %s77_s17, %s6487_s1  ;;  %p6492_p13 = scmp.lt.s32.totalorder %s77_s17, %s77_s17 }
  0x5f   :  { %p6493_p0 = scmp.lt.s32.totalorder %s6491_s0, %s6487_s1 }
  0x61   :  { %p6494_p1 = por %p6493_p0, %p6492_p13 }
  0x63   :  { %p6495_p2 = pnand %p6494_p1, %p6488_p12 }
  0x65   :  { %6498 = shalt.err (!%p6495_p2)
}
  0x66   :  { %79 = dma.hbm_to_vmem [thread:$0]  %s7117_s4, 16, %s77_s17, [#allocation9]  }
  0x67   :  { %s6507_s22 = scalar_lea.vmem %s98_s8, 256  ;;  %p6512_p4 = scmp.lt.s32.totalorder %s98_s8, %s98_s8 }
  0x68   :  { %p6508_p3 = scmp.ne.s32.totalorder %s98_s8, %s6507_s22  ;;  %p6513_p5 = scmp.lt.s32.totalorder %s6507_s22, %s6507_s22 }
  0x6a   :  { %p6514_p6 = por %p6513_p5, %p6512_p4 }
  0x6c   :  { %p6515_p7 = pnand %p6514_p6, %p6508_p3 }
  0x6e   :  { %6518 = shalt.err (!%p6515_p7)
}
  0x6f   :  { %103 = dma.hbm_to_vmem [thread:$0]  %s7120_s7, 256, %s98_s8, [#allocation12], %s6617_s26, %s6617_s26, %s6618_s27  }
  0x70   :  { %s6629_s3 = smov [#allocation16]   ;;  %s6630_s24 = smov [#allocation19]  }
  0x71   :  { %s119_s21 = sshll.u32 %s6629_s3, 4  ;;  %s143_s10 = sshll.u32 %s6630_s24, 4  ;;  %s120_s21 = int_to_ptr.vmem [resolvable:$true] %s119_s21  ;;  %s144_s10 = int_to_ptr.vmem [resolvable:$true] %s143_s10 }
  0x72   :  { %s6527_s4 = scalar_lea.vmem %s120_s21, 2048  ;;  %p6532_p9 = scmp.lt.s32.totalorder %s120_s21, %s120_s21 }
  0x73   :  { %p6528_p8 = scmp.ne.s32.totalorder %s120_s21, %s6527_s4  ;;  %p6533_p10 = scmp.lt.s32.totalorder %s6527_s4, %s6527_s4 }
  0x75   :  { %p6534_p11 = por %p6533_p10, %p6532_p9 }
  0x77   :  { %p6535_p12 = pnand %p6534_p11, %p6528_p8 }
  0x79   :  { %6538 = shalt.err (!%p6535_p12)
}
  0x7a   :  { %125 = dma.hbm_to_vmem [thread:$0]  %s7122_s9, 2048, %s120_s21, [#allocation15], %s6623_s6, %s6623_s6, %s6624_s16  }
  0x7b   :  { %s6547_s7 = scalar_lea.vmem %s144_s10, 65536  ;;  %p6552_p0 = scmp.lt.s32.totalorder %s144_s10, %s144_s10 }
  0x7c   :  { %p6548_p13 = scmp.ne.s32.totalorder %s144_s10, %s6547_s7  ;;  %p6553_p1 = scmp.lt.s32.totalorder %s6547_s7, %s6547_s7 }
  0x7e   :  { %p6554_p2 = por %p6553_p1, %p6552_p0 }
  0x80   :  { %p6555_p3 = pnand %p6554_p2, %p6548_p13 }
  0x82   :  { %6558 = shalt.err (!%p6555_p3)
}
  0x83   :  { %149 = dma.hbm_to_vmem [thread:$0]  %s7124_s11, 65536, %s144_s10, [#allocation18], %s6623_s6, %s6623_s6, %s6624_s16  }
  0x84   :  { %s6631_s12 = smov [#allocation22]  }
  0x85   :  { %s168_s29 = sshll.u32 %s6631_s12, 4  ;;  %s169_s29 = int_to_ptr.vmem [resolvable:$true] %s168_s29 }
  0x86   :  { %s6567_s30 = scalar_lea.vmem %s169_s29, 16  ;;  %s6571_s9 = scalar_lea.vmem %s169_s29, 32 }
  0x87   :  { %p6568_p4 = scmp.ne.s32.totalorder %s169_s29, %s6567_s30  ;;  %p6572_p5 = scmp.lt.s32.totalorder %s169_s29, %s169_s29 }
  0x88   :  { %p6573_p6 = scmp.lt.s32.totalorder %s6571_s9, %s6567_s30 }
  0x8a   :  { %p6574_p7 = por %p6573_p6, %p6572_p5 }
  0x8c   :  { %p6575_p8 = pnand %p6574_p7, %p6568_p4 }
  0x8e   :  { %6578 = shalt.err (!%p6575_p8)
}
  0x8f   :  { %171 = dma.hbm_to_vmem [thread:$0]  %s7127_s14, 16, %s169_s29, [#allocation21]  }
  0x90   :  { %6599 = dma.done.wait [#allocation3], 32  }
  0x91   :  { %6600 = vsyncadd [#allocation3], 4294967264 }
  0x92   :  { %6601 = dma.done.wait [#allocation6], 64  }
  0x93   :  { %6602 = vsyncadd [#allocation6], 4294967232 }
  0x94   :  { %6603 = dma.done.wait [#allocation9], 272  }
  0x95   :  { %6604 = vsyncadd [#allocation9], 4294967024 }
  0x96   :  { %6605 = dma.done.wait [#allocation12], 272  }
  0x97   :  { %6606 = vsyncadd [#allocation12], 4294967024 }
  0x98   :  { %6607 = dma.done.wait [#allocation15], 2064  }
  0x99   :  { %6608 = vsyncadd [#allocation15], 4294965232 }
  0x9a   :  { %6609 = dma.done.wait [#allocation18], 67584  }
  0x9b   :  { %6610 = vsyncadd [#allocation18], 4294899712 }
  0x9c   :  { %6611 = dma.done.wait [#allocation21], 144  }
  0x9d   :  { %6612 = vsyncadd [#allocation21], 4294967152  ;;  %v6632_v0 = vmov 0.0   ;;  %vm6633_vm0 = vmmov 0   ;;  %v6246_v1 = vld [vmem:[%s7118_s5 + $0x18] sm:$0xff]   ;;  %v6247_v2 = vld [vmem:[#allocation8 + $0x8] sm:$0xff]  }
  0x9e   :  { %6205 = vmatprep.subr.bf16.mxu1 %v6632_v0  ;;  %6197 = vmatprep.subr.bf16.mxu0 %v6632_v0  ;;  %v6248_v3 = vld [vmem:[%s7118_s5 + $0x10] sm:$0xff]   ;;  %v6249_v4 = vld [vmem:[#allocation8] sm:$0xff]   ;;  %v212_v5 = vld [vmem:[#allocation2] sm:$0x3]  ;;  %vm237_vm1 = vcmask 261120   ;;  %vm322_vm2 = vcmask 523264  }
  0x9f   :  { %6201 = vmatprep.mubr.msk.bf16.mxu0 %vm6633_vm0, %v6632_v0  ;;  %6213 = vmatprep.mubr.msk.bf16.mxu1 %vm6633_vm0, %v6632_v0  ;;  %v6250_v6 = vld [vmem:[%s7118_s5 + $0x8] sm:$0xff]   ;;  %v213_v7 = vpack.c.bf16 %v212_v5, %v212_v5  ;;  %v6251_v9 = vld [vmem:[%s7118_s5] sm:$0xff]   ;;  %v445_v17 = vld [vmem:[#allocation16 + $0x48] sm:$0xff]  ;;  %v6634_v36 = vmov 0   ;;  %vm5444_vm3 = vcmask 254976  }
  0xa0   :  { %6206 = vmatpush3.bf16.msra.mxu1 %v6246_v1  ;;  %6198 = vmatpush3.bf16.msra.mxu0 %v6247_v2  ;;  %v6252_v8 = vld [vmem:[#allocation13 + $0x8] sm:$0xff]   ;;  %v6253_v11 = vld [vmem:[#allocation13] sm:$0xff]   ;;  %v444_v15 = vld [vmem:[#allocation16 + $0x40] sm:$0xff] }
  0xa1   :  { %6207 = vmatprep.subr.bf16.mxu1 %v6632_v0  ;;  %6199 = vmatprep.subr.bf16.mxu0 %v6632_v0  ;;  %v281_v10 = vld [vmem:[#allocation5] sm:$0x3]  ;;  %v366_v12 = vld [vmem:[#allocation7] sm:$0x3]  ;;  %v448_v16 = vld [vmem:[#allocation16 + $0x60] sm:$0xff] }
  0xa2   :  { %v282_v13 = vpack.c.bf16 %v281_v10, %v281_v10  ;;  %v367_v14 = vpack.c.bf16 %v366_v12, %v366_v12  ;;  %v5489_v18 = vcombine.low %v444_v15, %v448_v16  ;;  %v5490_v19 = vcombine.high %v444_v15, %v448_v16  ;;  %v449_v20 = vld [vmem:[#allocation16 + $0x68] sm:$0xff]  ;;  %v436_v23 = vld [vmem:[#allocation16] sm:$0xff]  ;;  %v446_v31 = vld [vmem:[#allocation16 + $0x50] sm:$0xff] }
  0xa3   :  { %v5491_v21 = vcombine.low %v445_v17, %v449_v20  ;;  %v5492_v22 = vcombine.high %v445_v17, %v449_v20  ;;  %v440_v24 = vld [vmem:[#allocation16 + $0x20] sm:$0xff]  ;;  %v437_v25 = vld [vmem:[#allocation16 + $0x8] sm:$0xff]  ;;  %v450_v32 = vld [vmem:[#allocation16 + $0x70] sm:$0xff] }
  0xa4   :  { %6208 = vmatpush3.bf16.msra.mxu1 %v6248_v3  ;;  %6200 = vmatpush3.bf16.msra.mxu0 %v6249_v4  ;;  %v5482_v26 = vcombine.high %v436_v23, %v440_v24  ;;  %v441_v27 = vld [vmem:[#allocation16 + $0x28] sm:$0xff]  ;;  %v5481_v28 = vcombine.low %v436_v23, %v440_v24  ;;  %v447_v33 = vld [vmem:[#allocation16 + $0x58] sm:$0xff]  ;;  %v5494_v34 = vcombine.high %v446_v31, %v450_v32  ;;  %v438_v49 = vld [vmem:[#allocation16 + $0x10] sm:$0xff] }
  0xa5   :  { %6209 = vmatprep.subr.bf16.mxu1 %v6632_v0  ;;  %6217 = vmatprep.subr.bf16.mxu0 %v6632_v0  ;;  %v5483_v29 = vcombine.low %v437_v25, %v441_v27  ;;  %v5484_v30 = vcombine.high %v437_v25, %v441_v27  ;;  %v451_v35 = vld [vmem:[#allocation16 + $0x78] sm:$0xff]  ;;  %v5493_v37 = vcombine.low %v446_v31, %v450_v32  ;;  %v5467_v42 = vld [vmem:[#allocation10] ss:$0 sm:$0xff]  ;;  %v5471_v44 = vld [vmem:[#allocation11] ss:$0 sm:$0xff] }
  0xa6   :  { %v5495_v38 = vcombine.low %v447_v33, %v451_v35  ;;  %v5496_v39 = vcombine.high %v447_v33, %v451_v35  ;;  %v442_v52 = vld [vmem:[#allocation16 + $0x30] sm:$0xff]  ;;  %v439_v53 = vld [vmem:[#allocation16 + $0x18] sm:$0xff]  ;;  %v708_v61 = vld [vmem:[#allocation17 + $0x40] sm:$0xff] }
  0xa7   :  { %6202 = vmatmul.mubr.msk.bf16.vlgmr.msra.gmra.mxu0 %vm237_vm1, %v213_v7  ;;  %v443_v54 = vld [vmem:[#allocation16 + $0x38] sm:$0xff]  ;;  %v5486_v59 = vcombine.high %v438_v49, %v442_v52  ;;  %v709_v1 = vld [vmem:[#allocation17 + $0x48] sm:$0xff]  ;;  %v5485_v4 = vcombine.low %v438_v49, %v442_v52  ;;  %v710_v17 = vld [vmem:[#allocation17 + $0x50] sm:$0xff] }
  0xa8   :  { %6210 = vmatpush3.bf16.msra.mxu1 %v6250_v6  ;;  %6218 = vmatpush3.bf16.msra.mxu0 %v6252_v8  ;;  %v5488_v60 = vcombine.high %v439_v53, %v443_v54  ;;  %v713_v2 = vld [vmem:[#allocation17 + $0x68] sm:$0xff]  ;;  %v5487_v5 = vcombine.low %v439_v53, %v443_v54  ;;  %v700_v8 = vld [vmem:[#allocation17] sm:$0xff]  ;;  %v5477_v12 = vld [vmem:[#allocation14] ss:$0 sm:$0xff] }
  0xa9   :  { %6211 = vmatprep.subr.bf16.mxu1 %v6632_v0  ;;  %6219 = vmatprep.subr.bf16.mxu0 %v6632_v0  ;;  %v5512_v7 = vcombine.high %v709_v1, %v713_v2  ;;  %v701_v10 = vld [vmem:[#allocation17 + $0x8] sm:$0xff]  ;;  %v715_v20 = vld [vmem:[#allocation17 + $0x78] sm:$0xff]  ;;  %v706_v27 = vld [vmem:[#allocation17 + $0x30] sm:$0xff] }
  0xaa   :  { %6221 = vmatprep.mubr.msk.bf16.mxu0 %vm6633_vm0, %v6632_v0  ;;  %v712_v0 = vld [vmem:[#allocation17 + $0x60] sm:$0xff] }
  0xab   :  { %v5510_v6 = vcombine.high %v708_v61, %v712_v0  ;;  %v1035_v35 = vld [vmem:[#allocation19 + $0x1c0] sm:$0xff] }
  0xac   :  { %6212 = vmatpush3.bf16.msra.mxu1 %v6251_v9  ;;  %6220 = vmatpush3.bf16.msra.mxu0 %v6253_v11  ;;  %v704_v9 = vld [vmem:[#allocation17 + $0x20] sm:$0xff]  ;;  %v705_v11 = vld [vmem:[#allocation17 + $0x28] sm:$0xff] }
  0xad   :  { %547 = vmatprep.subr.bf16.mxu0 %v5490_v19  ;;  %588 = vmatprep.subr.bf16.mxu1 %v5492_v22  ;;  %v5502_v15 = vcombine.high %v700_v8, %v704_v9  ;;  %v5504_v16 = vcombine.high %v701_v10, %v705_v11  ;;  %v711_v19 = vld [vmem:[#allocation17 + $0x58] sm:$0xff]  ;;  %v5501_v22 = vcombine.low %v700_v8, %v704_v9  ;;  %v1019_v52 = vld [vmem:[#allocation19 + $0x140] sm:$0xff] }
  0xae   :  { %v5503_v23 = vcombine.low %v701_v10, %v705_v11  ;;  %v5516_v25 = vcombine.high %v711_v19, %v715_v20  ;;  %v5515_v32 = vcombine.low %v711_v19, %v715_v20  ;;  %v1023_v53 = vld [vmem:[#allocation19 + $0x160] sm:$0xff] }
  0xaf   :  { %6214 = vmatmul.mubr.msk.bf16.vlgmr.msra.gmra.mxu1 %vm322_vm2, %v282_v13  ;;  %6222 = vmatmul.mubr.msk.bf16.vlgmr.msra.gmra.mxu0 %vm237_vm1, %v367_v14  ;;  %v5509_v13 = vcombine.low %v708_v61, %v712_v0  ;;  %v5511_v14 = vcombine.low %v709_v1, %v713_v2  ;;  %v1147_v54 = vld [vmem:[#allocation19 + $0x540] sm:$0xff] }
  0xb0   :  { %548 = vmatpush1.bf16.msra.mxu0 %v5489_v18  ;;  %589 = vmatpush1.bf16.msra.mxu1 %v5491_v21  ;;  %v714_v18 = vld [vmem:[#allocation17 + $0x70] sm:$0xff]  ;;  %v1139_v61 = vld [vmem:[#allocation19 + $0x500] sm:$0xff] }
  0xb1   :  { %549 = vmatprep.subr.bf16.mxu0 %v5482_v26  ;;  %590 = vmatprep.subr.bf16.mxu1 %v5484_v30  ;;  %v5514_v24 = vcombine.high %v710_v17, %v714_v18  ;;  %v702_v26 = vld [vmem:[#allocation17 + $0x10] sm:$0xff]  ;;  %v5513_v31 = vcombine.low %v710_v17, %v714_v18  ;;  %v995_v11 = vld [vmem:[#allocation19 + $0x80] sm:$0xff] }
  0xb2   :  { %567 = vmatprep.mubr.bf16.mxu0 %v6634_v36  ;;  %608 = vmatprep.mubr.bf16.mxu1 %v6634_v36  ;;  %v5506_v33 = vcombine.high %v702_v26, %v706_v27  ;;  %v987_v19 = vld [vmem:[#allocation19 + $0x40] sm:$0xff] }
  0xb3   :  { %v991_v20 = vld [vmem:[#allocation19 + $0x60] sm:$0xff] }
  0xb4   :  { %550 = vmatpush1.bf16.msra.mxu0 %v5481_v28  ;;  %591 = vmatpush1.bf16.msra.mxu1 %v5483_v29  ;;  %v703_v28 = vld [vmem:[#allocation17 + $0x18] sm:$0xff] }
  0xb5   :  { %629 = vmatprep.subr.bf16.mxu0 %v5494_v34  ;;  %670 = vmatprep.subr.bf16.mxu1 %v5496_v39  ;;  %v707_v29 = vld [vmem:[#allocation17 + $0x38] sm:$0xff]  ;;  %v1167_v39 = vld [vmem:[#allocation19 + $0x5e0] sm:$0xff] }
  0xb6   :  { %v5508_v34 = vcombine.high %v703_v28, %v707_v29 }
 0x167   :  { %v275_v40 = vpop.f32.mrf.mxu0 }
 0x168   :  { %v276_v45 = vadd.f32 %v5467_v42, %v275_v40  ;;  %v5505_v40 = vcombine.low %v702_v26, %v706_v27  ;;  %v979_v27 = vld [vmem:[#allocation19] sm:$0xff] }
 0x169   :  { %v6203_v41 = vpop.f32.mrf.mxu0 }
 0x16a   :  { %v5507_v41 = vcombine.low %v703_v28, %v707_v29  ;;  %v983_v28 = vld [vmem:[#allocation19 + $0x20] sm:$0xff] }
 0x16b   :  { %v278_v43 = vpop.f32.mrf.mxu0  ;;  %v1107_v29 = vld [vmem:[#allocation19 + $0x400] sm:$0xff] }
 0x16d   :  { %v6204_v46 = vpop.f32.mrf.mxu0 }
 0x16e   :  { %v1155_v46 = vld [vmem:[#allocation19 + $0x580] sm:$0xff] }
 0x16f   :  { %v360_v47 = vpop.f32.mrf.mxu1  ;;  %v428_v50 = vpop.f32.mrf.mxu0 }
 0x170   :  { %v361_v48 = vadd.f32 %v5471_v44, %v360_v47  ;;  %v429_v21 = vadd.f32 %v5477_v12, %v428_v50  ;;  %v1027_v44 = vld [vmem:[#allocation19 + $0x180] sm:$0xff] }
 0x171   :  { %v6215_v51 = vpop.f32.mrf.mxu1  ;;  %v6223_v56 = vpop.f32.mrf.mxu0  ;;  %v1159_v47 = vld [vmem:[#allocation19 + $0x5a0] sm:$0xff] }
 0x172   :  { %v434_v55 = vmul.f32 %v361_v48, %v276_v45  ;;  %v699_v30 = vpack.c.bf16 %v429_v21, %v429_v21  ;;  %v1031_v45 = vld [vmem:[#allocation19 + $0x1a0] sm:$0xff]  ;;  %v5698_v51 = vcombine.high %v1155_v46, %v1159_v47  ;;  %v5697_v56 = vcombine.low %v1155_v46, %v1159_v47 }
 0x173   :  { %v363_v57 = vpop.f32.mrf.mxu1  ;;  %v431_v62 = vpop.f32.mrf.mxu0  ;;  %v5570_v50 = vcombine.high %v1027_v44, %v1031_v45  ;;  %v999_v12 = vld [vmem:[#allocation19 + $0xa0] sm:$0xff] }
 0x174   :  { %v435_v58 = vpack.c.bf16 %v434_v55, %v434_v55  ;;  %v1151_v55 = vld [vmem:[#allocation19 + $0x560] sm:$0xff]  ;;  %v5562_v57 = vcombine.high %v1019_v52, %v1023_v53  ;;  %v5538_v17 = vcombine.high %v995_v11, %v999_v12 }
 0x175   :  { %v6216_v63 = vpop.f32.mrf.mxu1  ;;  %v6224_v3 = vpop.f32.mrf.mxu0  ;;  %v1143_v62 = vld [vmem:[#allocation19 + $0x520] sm:$0xff]  ;;  %v5689_v0 = vcombine.low %v1147_v54, %v1151_v55 }
 0x176   :  { %5497 = vmatmul.mubr.msk.bf16.vlgmr.msra.gmra.mxu0 %vm237_vm1, %v435_v58  ;;  %5498 = vmatmul.mubr.msk.bf16.vlgmr.msra.gmra.mxu1 %vm237_vm1, %v435_v58  ;;  %v5561_v63 = vcombine.low %v1019_v52, %v1023_v53  ;;  %v5682_v2 = vcombine.high %v1139_v61, %v1143_v62  ;;  %v1003_v3 = vld [vmem:[#allocation19 + $0xc0] sm:$0xff]  ;;  %v5681_v8 = vcombine.low %v1139_v61, %v1143_v62 }
 0x177   :  { %630 = vmatpush1.bf16.msra.mxu0 %v5493_v37  ;;  %671 = vmatpush1.bf16.msra.mxu1 %v5495_v38  ;;  %v1039_v37 = vld [vmem:[#allocation19 + $0x1e0] sm:$0xff] }
 0x178   :  { %631 = vmatprep.subr.bf16.mxu0 %v5486_v59  ;;  %672 = vmatprep.subr.bf16.mxu1 %v5488_v60  ;;  %v1163_v38 = vld [vmem:[#allocation19 + $0x5c0] sm:$0xff]  ;;  %v5578_v42 = vcombine.high %v1035_v35, %v1039_v37  ;;  %v5577_v48 = vcombine.low %v1035_v35, %v1039_v37 }
 0x179   :  { %649 = vmatprep.mubr.bf16.mxu0 %v6634_v36  ;;  %690 = vmatprep.mubr.bf16.mxu1 %v6634_v36  ;;  %v5706_v43 = vcombine.high %v1163_v38, %v1167_v39  ;;  %v5705_v49 = vcombine.low %v1163_v38, %v1167_v39  ;;  %v1011_v59 = vld [vmem:[#allocation19 + $0x100] sm:$0xff] }
 0x17a   :  { %v1015_v60 = vld [vmem:[#allocation19 + $0x120] sm:$0xff] }
 0x17b   :  { %632 = vmatpush1.bf16.msra.mxu0 %v5485_v4  ;;  %673 = vmatpush1.bf16.msra.mxu1 %v5487_v5  ;;  %v5554_v1 = vcombine.high %v1011_v59, %v1015_v60  ;;  %v1007_v4 = vld [vmem:[#allocation19 + $0xe0] sm:$0xff] }
 0x17c   :  { %811 = vmatprep.subr.bf16.mxu0 %v5510_v6  ;;  %852 = vmatprep.subr.bf16.mxu1 %v5512_v7  ;;  %v1131_v5 = vld [vmem:[#allocation19 + $0x4c0] sm:$0xff]  ;;  %v5553_v7 = vcombine.low %v1011_v59, %v1015_v60  ;;  %v5546_v9 = vcombine.high %v1003_v3, %v1007_v4 }
 0x17d   :  { %v1135_v6 = vld [vmem:[#allocation19 + $0x4e0] sm:$0xff] }
 0x17e   :  { %5499 = vmatmul.mubr.msk.bf16.vlgmr.msra.gmra.mxu0 %vm237_vm1, %v435_v58  ;;  %5500 = vmatmul.mubr.msk.bf16.vlgmr.msra.gmra.mxu1 %vm237_vm1, %v435_v58  ;;  %v5690_v58 = vcombine.high %v1147_v54, %v1151_v55  ;;  %v5674_v10 = vcombine.high %v1131_v5, %v1135_v6  ;;  %v1115_v21 = vld [vmem:[#allocation19 + $0x440] sm:$0xff] }
 0x17f   :  { %812 = vmatpush1.bf16.msra.mxu0 %v5509_v13  ;;  %853 = vmatpush1.bf16.msra.mxu1 %v5511_v14  ;;  %v1123_v13 = vld [vmem:[#allocation19 + $0x480] sm:$0xff] }
 0x180   :  { %813 = vmatprep.subr.bf16.mxu0 %v5502_v15  ;;  %854 = vmatprep.subr.bf16.mxu1 %v5504_v16  ;;  %v1127_v14 = vld [vmem:[#allocation19 + $0x4a0] sm:$0xff]  ;;  %v5545_v15 = vcombine.low %v1003_v3, %v1007_v4  ;;  %v5673_v16 = vcombine.low %v1131_v5, %v1135_v6 }
 0x181   :  { %831 = vmatprep.mubr.bf16.mxu0 %v6634_v36  ;;  %872 = vmatprep.mubr.bf16.mxu1 %v6634_v36  ;;  %v5666_v18 = vcombine.high %v1123_v13, %v1127_v14  ;;  %v1099_v35 = vld [vmem:[#allocation19 + $0x3c0] sm:$0xff] }
 0x182   :  { %v1103_v37 = vld [vmem:[#allocation19 + $0x3e0] sm:$0xff] }
 0x183   :  { %814 = vmatpush1.bf16.msra.mxu0 %v5501_v22  ;;  %855 = vmatpush1.bf16.msra.mxu1 %v5503_v23  ;;  %v1119_v22 = vld [vmem:[#allocation19 + $0x460] sm:$0xff]  ;;  %v5537_v23 = vcombine.low %v995_v11, %v999_v12 }
 0x184   :  { %893 = vmatprep.subr.bf16.mxu0 %v5514_v24  ;;  %934 = vmatprep.subr.bf16.mxu1 %v5516_v25  ;;  %v5665_v24 = vcombine.low %v1123_v13, %v1127_v14  ;;  %v5530_v25 = vcombine.high %v987_v19, %v991_v20  ;;  %v5658_v26 = vcombine.high %v1115_v21, %v1119_v22  ;;  %v1227_v38 = vld [vmem:[#allocation19 + $0x7c0] sm:$0xff] }
 0x185   :  { %v1231_v39 = vld [vmem:[#allocation19 + $0x7e0] sm:$0xff] }
 0x186   :  { %5517 = vmatmul.mubr.msk.bf16.vlgmr.msra.gmra.mxu0 %vm237_vm1, %v699_v30  ;;  %5518 = vmatmul.mubr.msk.bf16.vlgmr.msra.gmra.mxu1 %vm237_vm1, %v699_v30  ;;  %v1219_v46 = vld [vmem:[#allocation19 + $0x780] sm:$0xff] }
 0x187   :  { %894 = vmatpush1.bf16.msra.mxu0 %v5513_v31  ;;  %935 = vmatpush1.bf16.msra.mxu1 %v5515_v32  ;;  %v5529_v31 = vcombine.low %v987_v19, %v991_v20  ;;  %v5657_v32 = vcombine.low %v1115_v21, %v1119_v22  ;;  %v1223_v47 = vld [vmem:[#allocation19 + $0x7a0] sm:$0xff] }
 0x188   :  { %895 = vmatprep.subr.bf16.mxu0 %v5506_v33  ;;  %936 = vmatprep.subr.bf16.mxu1 %v5508_v34  ;;  %v5522_v33 = vcombine.high %v979_v27, %v983_v28  ;;  %v1083_v52 = vld [vmem:[#allocation19 + $0x340] sm:$0xff] }
 0x189   :  { %913 = vmatprep.mubr.bf16.mxu0 %v6634_v36  ;;  %954 = vmatprep.mubr.bf16.mxu1 %v6634_v36  ;;  %v5569_v36 = vcombine.low %v1027_v44, %v1031_v45  ;;  %v1091_v44 = vld [vmem:[#allocation19 + $0x380] sm:$0xff] }
 0x18a   :  { %v1095_v45 = vld [vmem:[#allocation19 + $0x3a0] sm:$0xff] }
 0x18b   :  { %896 = vmatpush1.bf16.msra.mxu0 %v5505_v40  ;;  %937 = vmatpush1.bf16.msra.mxu1 %v5507_v41  ;;  %v5521_v40 = vcombine.low %v979_v27, %v983_v28  ;;  %v1087_v53 = vld [vmem:[#allocation19 + $0x360] sm:$0xff] }
 0x18c   :  { %4093 = vmatprep.subr.bf16.mxu0 %v5578_v42  ;;  %4134 = vmatprep.subr.bf16.mxu1 %v5706_v43  ;;  %v5642_v42 = vcombine.high %v1099_v35, %v1103_v37  ;;  %v5770_v43 = vcombine.high %v1227_v38, %v1231_v39  ;;  %v1211_v54 = vld [vmem:[#allocation19 + $0x740] sm:$0xff]  ;;  %v5625_v59 = vcombine.low %v1083_v52, %v1087_v53 }
 0x18d   :  { %v1215_v55 = vld [vmem:[#allocation19 + $0x760] sm:$0xff] }
 0x18e   :  { %5519 = vmatmul.mubr.msk.bf16.vlgmr.msra.gmra.mxu0 %vm237_vm1, %v699_v30  ;;  %5520 = vmatmul.mubr.msk.bf16.vlgmr.msra.gmra.mxu1 %vm237_vm1, %v699_v30  ;;  %v1111_v30 = vld [vmem:[#allocation19 + $0x420] sm:$0xff]  ;;  %v5753_v60 = vcombine.low %v1211_v54, %v1215_v55 }
 0x18f   :  { %4094 = vmatpush1.bf16.msra.mxu0 %v5577_v48  ;;  %4135 = vmatpush1.bf16.msra.mxu1 %v5705_v49  ;;  %v5650_v34 = vcombine.high %v1107_v29, %v1111_v30  ;;  %v5649_v41 = vcombine.low %v1107_v29, %v1111_v30  ;;  %v5641_v48 = vcombine.low %v1099_v35, %v1103_v37  ;;  %v1075_v61 = vld [vmem:[#allocation19 + $0x300] sm:$0xff] }
 0x190   :  { %4095 = vmatprep.subr.bf16.mxu0 %v5570_v50  ;;  %4136 = vmatprep.subr.bf16.mxu1 %v5698_v51  ;;  %v5769_v49 = vcombine.low %v1227_v38, %v1231_v39  ;;  %v5634_v50 = vcombine.high %v1091_v44, %v1095_v45  ;;  %v5762_v51 = vcombine.high %v1219_v46, %v1223_v47  ;;  %v1079_v62 = vld [vmem:[#allocation19 + $0x320] sm:$0xff] }
 0x191   :  { %v1067_v5 = vld [vmem:[#allocation19 + $0x2c0] sm:$0xff] }
 0x192   :  { %v1071_v6 = vld [vmem:[#allocation19 + $0x2e0] sm:$0xff] }
 0x193   :  { %4096 = vmatpush1.bf16.msra.mxu0 %v5569_v36  ;;  %4137 = vmatpush1.bf16.msra.mxu1 %v5697_v56  ;;  %v5633_v36 = vcombine.low %v1091_v44, %v1095_v45  ;;  %v5761_v56 = vcombine.low %v1219_v46, %v1223_v47  ;;  %v1059_v13 = vld [vmem:[#allocation19 + $0x280] sm:$0xff] }
 0x194   :  { %4097 = vmatprep.subr.bf16.mxu0 %v5562_v57  ;;  %4138 = vmatprep.subr.bf16.mxu1 %v5690_v58  ;;  %v5626_v57 = vcombine.high %v1083_v52, %v1087_v53  ;;  %v5754_v58 = vcombine.high %v1211_v54, %v1215_v55  ;;  %v1063_v14 = vld [vmem:[#allocation19 + $0x2a0] sm:$0xff] }
 0x195   :  { %v1051_v21 = vld [vmem:[#allocation19 + $0x240] sm:$0xff] }
 0x196   :  { %v1055_v22 = vld [vmem:[#allocation19 + $0x260] sm:$0xff] }
 0x197   :  { %4098 = vmatpush1.bf16.msra.mxu0 %v5561_v63  ;;  %4139 = vmatpush1.bf16.msra.mxu1 %v5689_v0  ;;  %v1203_v63 = vld [vmem:[#allocation19 + $0x700] sm:$0xff]  ;;  %v5618_v0 = vcombine.high %v1075_v61, %v1079_v62 }
 0x198   :  { %4099 = vmatprep.subr.bf16.mxu0 %v5554_v1  ;;  %4140 = vmatprep.subr.bf16.mxu1 %v5682_v2  ;;  %v1207_v1 = vld [vmem:[#allocation19 + $0x720] sm:$0xff]  ;;  %v5617_v2 = vcombine.low %v1075_v61, %v1079_v62 }
 0x199   :  { %v5745_v3 = vcombine.low %v1203_v63, %v1207_v1  ;;  %v5746_v4 = vcombine.high %v1203_v63, %v1207_v1  ;;  %v1043_v29 = vld [vmem:[#allocation19 + $0x200] sm:$0xff] }
 0x19a   :  { %v1047_v30 = vld [vmem:[#allocation19 + $0x220] sm:$0xff] }
 0x19b   :  { %4100 = vmatpush1.bf16.msra.mxu0 %v5553_v7  ;;  %4141 = vmatpush1.bf16.msra.mxu1 %v5681_v8  ;;  %v1195_v7 = vld [vmem:[#allocation19 + $0x6c0] sm:$0xff]  ;;  %v5610_v8 = vcombine.high %v1067_v5, %v1071_v6 }
 0x19c   :  { %4101 = vmatprep.subr.bf16.mxu0 %v5546_v9  ;;  %4142 = vmatprep.subr.bf16.mxu1 %v5674_v10  ;;  %v1199_v9 = vld [vmem:[#allocation19 + $0x6e0] sm:$0xff]  ;;  %v5609_v10 = vcombine.low %v1067_v5, %v1071_v6 }
 0x19d   :  { %v5737_v11 = vcombine.low %v1195_v7, %v1199_v9  ;;  %v5738_v12 = vcombine.high %v1195_v7, %v1199_v9  ;;  %v1291_v38 = vld [vmem:[#allocation19 + $0x9c0] sm:$0xff] }
 0x19e   :  { %v1295_v39 = vld [vmem:[#allocation19 + $0x9e0] sm:$0xff] }
 0x19f   :  { %4102 = vmatpush1.bf16.msra.mxu0 %v5545_v15  ;;  %4143 = vmatpush1.bf16.msra.mxu1 %v5673_v16  ;;  %v1187_v15 = vld [vmem:[#allocation19 + $0x680] sm:$0xff]  ;;  %v5602_v16 = vcombine.high %v1059_v13, %v1063_v14 }
 0x1a0   :  { %4103 = vmatprep.subr.bf16.mxu0 %v5538_v17  ;;  %4144 = vmatprep.subr.bf16.mxu1 %v5666_v18  ;;  %v1191_v17 = vld [vmem:[#allocation19 + $0x6a0] sm:$0xff]  ;;  %v5601_v18 = vcombine.low %v1059_v13, %v1063_v14 }
 0x1a1   :  { %v5729_v19 = vcombine.low %v1187_v15, %v1191_v17  ;;  %v5730_v20 = vcombine.high %v1187_v15, %v1191_v17  ;;  %v1287_v6 = vld [vmem:[#allocation19 + $0x9a0] sm:$0xff] }
 0x1a2   :  { %v1411_v7 = vld [vmem:[#allocation19 + $0xd80] sm:$0xff] }
 0x1a3   :  { %4104 = vmatpush1.bf16.msra.mxu0 %v5537_v23  ;;  %4145 = vmatpush1.bf16.msra.mxu1 %v5665_v24  ;;  %v1179_v23 = vld [vmem:[#allocation19 + $0x640] sm:$0xff]  ;;  %v5594_v24 = vcombine.high %v1051_v21, %v1055_v22 }
 0x1a4   :  { %4105 = vmatprep.subr.bf16.mxu0 %v5530_v25  ;;  %4146 = vmatprep.subr.bf16.mxu1 %v5658_v26  ;;  %v1183_v25 = vld [vmem:[#allocation19 + $0x660] sm:$0xff]  ;;  %v5593_v26 = vcombine.low %v1051_v21, %v1055_v22 }
 0x1a5   :  { %v5721_v27 = vcombine.low %v1179_v23, %v1183_v25  ;;  %v5722_v28 = vcombine.high %v1179_v23, %v1183_v25  ;;  %v1403_v21 = vld [vmem:[#allocation19 + $0xd40] sm:$0xff] }
 0x1a6   :  { %v1407_v22 = vld [vmem:[#allocation19 + $0xd60] sm:$0xff] }
 0x1a7   :  { %4106 = vmatpush1.bf16.msra.mxu0 %v5529_v31  ;;  %4147 = vmatpush1.bf16.msra.mxu1 %v5657_v32  ;;  %v1171_v31 = vld [vmem:[#allocation19 + $0x600] sm:$0xff]  ;;  %v5586_v32 = vcombine.high %v1043_v29, %v1047_v30 }
 0x1a8   :  { %4107 = vmatprep.subr.bf16.mxu0 %v5522_v33  ;;  %4148 = vmatprep.subr.bf16.mxu1 %v5650_v34  ;;  %v1175_v33 = vld [vmem:[#allocation19 + $0x620] sm:$0xff]  ;;  %v5585_v34 = vcombine.low %v1043_v29, %v1047_v30  ;;  %v5946_v30 = vcombine.high %v1403_v21, %v1407_v22 }
 0x1a9   :  { %v5713_v35 = vcombine.low %v1171_v31, %v1175_v33  ;;  %v5714_v37 = vcombine.high %v1171_v31, %v1175_v33  ;;  %v1267_v31 = vld [vmem:[#allocation19 + $0x900] sm:$0xff] }
 0x1ab   :  { %4108 = vmatpush1.bf16.msra.mxu0 %v5521_v40  ;;  %4149 = vmatpush1.bf16.msra.mxu1 %v5649_v41  ;;  %v1419_v40 = vld [vmem:[#allocation19 + $0xdc0] sm:$0xff]  ;;  %v5834_v41 = vcombine.high %v1291_v38, %v1295_v39 }
 0x1ac   :  { %4109 = vmatprep.subr.bf16.mxu0 %v5642_v42  ;;  %4150 = vmatprep.subr.bf16.mxu1 %v5770_v43  ;;  %v1423_v42 = vld [vmem:[#allocation19 + $0xde0] sm:$0xff]  ;;  %v5833_v43 = vcombine.low %v1291_v38, %v1295_v39 }
 0x1ad   :  { %v5961_v44 = vcombine.low %v1419_v40, %v1423_v42  ;;  %v5962_v45 = vcombine.high %v1419_v40, %v1423_v42 }
 0x1af   :  { %4110 = vmatpush2.bf16.msra.mxu0 %v5641_v48  ;;  %4151 = vmatpush2.bf16.msra.mxu1 %v5769_v49 }
 0x1b0   :  { %4111 = vmatprep.subr.bf16.mxu0 %v5634_v50  ;;  %4152 = vmatprep.subr.bf16.mxu1 %v5762_v51 }
 0x1b3   :  { %4112 = vmatpush2.bf16.msra.mxu0 %v5633_v36  ;;  %4153 = vmatpush2.bf16.msra.mxu1 %v5761_v56 }
 0x1b4   :  { %4113 = vmatprep.subr.bf16.mxu0 %v5626_v57  ;;  %4154 = vmatprep.subr.bf16.mxu1 %v5754_v58 }
 0x1b7   :  { %4114 = vmatpush2.bf16.msra.mxu0 %v5625_v59  ;;  %4155 = vmatpush2.bf16.msra.mxu1 %v5753_v60 }
 0x1b8   :  { %4115 = vmatprep.subr.bf16.mxu0 %v5618_v0  ;;  %4156 = vmatprep.subr.bf16.mxu1 %v5746_v4 }
 0x1bb   :  { %4116 = vmatpush2.bf16.msra.mxu0 %v5617_v2  ;;  %4157 = vmatpush2.bf16.msra.mxu1 %v5745_v3  ;;  %v1283_v3 = vld [vmem:[#allocation19 + $0x980] sm:$0xff] }
 0x1bc   :  { %4117 = vmatprep.subr.bf16.mxu0 %v5610_v8  ;;  %4158 = vmatprep.subr.bf16.mxu1 %v5738_v12  ;;  %v1415_v8 = vld [vmem:[#allocation19 + $0xda0] sm:$0xff]  ;;  %v5826_v17 = vcombine.high %v1283_v3, %v1287_v6  ;;  %v5825_v25 = vcombine.low %v1283_v3, %v1287_v6 }
 0x1bd   :  { %v1371_v3 = vld [vmem:[#allocation19 + $0xc40] sm:$0xff] }
 0x1bf   :  { %4118 = vmatpush2.bf16.msra.mxu0 %v5609_v10  ;;  %4159 = vmatpush2.bf16.msra.mxu1 %v5737_v11 }
 0x1c0   :  { %4119 = vmatprep.subr.bf16.mxu0 %v5602_v16  ;;  %4160 = vmatprep.subr.bf16.mxu1 %v5730_v20  ;;  %v1279_v20 = vld [vmem:[#allocation19 + $0x960] sm:$0xff] }
 0x1c3   :  { %4120 = vmatpush2.bf16.msra.mxu0 %v5601_v18  ;;  %4161 = vmatpush2.bf16.msra.mxu1 %v5729_v19  ;;  %v5954_v18 = vcombine.high %v1411_v7, %v1415_v8  ;;  %v1275_v19 = vld [vmem:[#allocation19 + $0x940] sm:$0xff] }
 0x1c4   :  { %4121 = vmatprep.subr.bf16.mxu0 %v5594_v24  ;;  %4162 = vmatprep.subr.bf16.mxu1 %v5722_v28  ;;  %v5818_v29 = vcombine.high %v1275_v19, %v1279_v20  ;;  %v5817_v40 = vcombine.low %v1275_v19, %v1279_v20 }
 0x1c7   :  { %4122 = vmatpush2.bf16.msra.mxu0 %v5593_v26  ;;  %4163 = vmatpush2.bf16.msra.mxu1 %v5721_v27  ;;  %v5953_v26 = vcombine.low %v1411_v7, %v1415_v8 }
 0x1c8   :  { %4123 = vmatprep.subr.bf16.mxu0 %v5586_v32  ;;  %4164 = vmatprep.subr.bf16.mxu1 %v5714_v37  ;;  %v1399_v37 = vld [vmem:[#allocation19 + $0xd20] sm:$0xff] }
 0x1cb   :  { %4124 = vmatpush2.bf16.msra.mxu0 %v5585_v34  ;;  %4165 = vmatpush2.bf16.msra.mxu1 %v5713_v35  ;;  %v1271_v34 = vld [vmem:[#allocation19 + $0x920] sm:$0xff] }
 0x1cc   :  { %4175 = vmatprep.subr.bf16.mxu0 %v5834_v41  ;;  %4216 = vmatprep.subr.bf16.mxu1 %v5962_v45  ;;  %v1395_v35 = vld [vmem:[#allocation19 + $0xd00] sm:$0xff] }
 0x236   :  { %v569_v46 = vpop.f32.mrf.mxu0  ;;  %v610_v47 = vpop.f32.mrf.mxu1 }
 0x238   :  { %v571_v48 = vpop.f32.mrf.mxu0  ;;  %v612_v49 = vpop.f32.mrf.mxu1 }
 0x23a   :  { %v573_v50 = vpop.f32.mrf.mxu0  ;;  %v614_v51 = vpop.f32.mrf.mxu1 }
 0x23b   :  { %v1387_v50 = vld [vmem:[#allocation19 + $0xcc0] sm:$0xff] }
 0x23c   :  { %v574_v52 = vpop.f32.mrf.mxu0  ;;  %v615_v53 = vpop.f32.mrf.mxu1  ;;  %v1391_v51 = vld [vmem:[#allocation19 + $0xce0] sm:$0xff] }
 0x23d   :  { %v5809_v52 = vcombine.low %v1267_v31, %v1271_v34  ;;  %v5937_v53 = vcombine.low %v1395_v35, %v1399_v37 }
 0x23e   :  { %v6803_v54 = vpop.f32.mrf.mxu0  ;;  %v6805_v55 = vpop.f32.mrf.mxu1 }
 0x240   :  { %v653_v36 = vpop.f32.mrf.mxu0  ;;  %v694_v56 = vpop.f32.mrf.mxu1 }
 0x242   :  { %v655_v57 = vpop.f32.mrf.mxu0  ;;  %v696_v58 = vpop.f32.mrf.mxu1 }
 0x243   :  { %v1251_v57 = vld [vmem:[#allocation19 + $0x880] sm:$0xff] }
 0x244   :  { %v656_v59 = vpop.f32.mrf.mxu0  ;;  %v697_v60 = vpop.f32.mrf.mxu1  ;;  %v1255_v58 = vld [vmem:[#allocation19 + $0x8a0] sm:$0xff] }
 0x245   :  { %v1379_v59 = vld [vmem:[#allocation19 + $0xc80] sm:$0xff] }
 0x246   :  { %v833_v61 = vpop.f32.mrf.mxu0  ;;  %v874_v62 = vpop.f32.mrf.mxu1  ;;  %v1383_v60 = vld [vmem:[#allocation19 + $0xca0] sm:$0xff] }
 0x247   :  { %v963_v63 = vmul.f32 %v833_v61, %v569_v46  ;;  %v965_v0 = vmul.f32 %v874_v62, %v610_v47  ;;  %v5810_v46 = vcombine.high %v1267_v31, %v1271_v34  ;;  %v5938_v47 = vcombine.high %v1395_v35, %v1399_v37  ;;  %v1347_v31 = vld [vmem:[#allocation19 + $0xb80] sm:$0xff] }
 0x248   :  { %v835_v1 = vpop.f32.mrf.mxu0  ;;  %v876_v2 = vpop.f32.mrf.mxu1  ;;  %v5929_v62 = vcombine.low %v1387_v50, %v1391_v51  ;;  %v5921_v6 = vcombine.low %v1379_v59, %v1383_v60  ;;  %v1479_v34 = vld [vmem:[#allocation19 + $0xfa0] sm:$0xff] }
 0x249   :  { %v964_v4 = vmul.f32 %v835_v1, %v571_v48  ;;  %v966_v5 = vmul.f32 %v876_v2, %v612_v49  ;;  %v6811_v13 = vpack.c.bf16 %v963_v63, %v963_v63  ;;  %v6813_v14 = vpack.c.bf16 %v965_v0, %v965_v0  ;;  %v1259_v48 = vld [vmem:[#allocation19 + $0x8c0] sm:$0xff] }
 0x24a   :  { %v837_v9 = vpop.f32.mrf.mxu0  ;;  %v878_v10 = vpop.f32.mrf.mxu1  ;;  %v1263_v49 = vld [vmem:[#allocation19 + $0x8e0] sm:$0xff]  ;;  %v5794_v63 = vcombine.high %v1251_v57, %v1255_v58  ;;  %v5922_v0 = vcombine.high %v1379_v59, %v1383_v60 }
 0x24b   :  { %v6807_v11 = vpack.c.bf16 %v964_v4, %v964_v4  ;;  %v6809_v12 = vpack.c.bf16 %v966_v5, %v966_v5  ;;  %v5801_v61 = vcombine.low %v1259_v48, %v1263_v49  ;;  %v1243_v1 = vld [vmem:[#allocation19 + $0x840] sm:$0xff]  ;;  %v5793_v5 = vcombine.low %v1251_v57, %v1255_v58 }
 0x24c   :  { %v838_v15 = vpop.f32.mrf.mxu0  ;;  %v879_v16 = vpop.f32.mrf.mxu1  ;;  %v1247_v2 = vld [vmem:[#allocation19 + $0x860] sm:$0xff] }
 0x24d   :  { %4125 = vmatprep.mubr.bf16.mxu0 %v6807_v11  ;;  %4166 = vmatprep.mubr.bf16.mxu1 %v6809_v12  ;;  %v1375_v4 = vld [vmem:[#allocation19 + $0xc60] sm:$0xff]  ;;  %v5786_v7 = vcombine.high %v1243_v1, %v1247_v2 }
 0x24e   :  { %v6817_v23 = vpop.f32.mrf.mxu0  ;;  %v6819_v24 = vpop.f32.mrf.mxu1  ;;  %4126 = vmatmul.mubr.bf16.vlgmr.msra.gmra.mxu0 %v6811_v13  ;;  %4167 = vmatmul.mubr.bf16.vlgmr.msra.gmra.mxu1 %v6813_v14  ;;  %v5914_v8 = vcombine.high %v1371_v3, %v1375_v4  ;;  %v1235_v9 = vld [vmem:[#allocation19 + $0x800] sm:$0xff] }
 0x24f   :  { %4176 = vmatpush1.bf16.msra.mxu0 %v5833_v43  ;;  %4217 = vmatpush1.bf16.msra.mxu1 %v5961_v44  ;;  %v5945_v43 = vcombine.low %v1403_v21, %v1407_v22  ;;  %v1239_v10 = vld [vmem:[#allocation19 + $0x820] sm:$0xff] }
 0x250   :  { %v917_v27 = vpop.f32.mrf.mxu0  ;;  %v958_v28 = vpop.f32.mrf.mxu1  ;;  %4177 = vmatprep.subr.bf16.mxu0 %v5826_v17  ;;  %4218 = vmatprep.subr.bf16.mxu1 %v5954_v18  ;;  %v1363_v15 = vld [vmem:[#allocation19 + $0xc00] sm:$0xff]  ;;  %v5785_v17 = vcombine.low %v1243_v1, %v1247_v2  ;;  %v5913_v18 = vcombine.low %v1371_v3, %v1375_v4  ;;  %v5778_v19 = vcombine.high %v1235_v9, %v1239_v10 }
 0x251   :  { %v968_v32 = vmul.f32 %v917_v27, %v653_v36  ;;  %v970_v33 = vmul.f32 %v958_v28, %v694_v56  ;;  %v5802_v36 = vcombine.high %v1259_v48, %v1263_v49  ;;  %v5930_v56 = vcombine.high %v1387_v50, %v1391_v51  ;;  %v1367_v16 = vld [vmem:[#allocation19 + $0xc20] sm:$0xff] }
 0x252   :  { %v919_v38 = vpop.f32.mrf.mxu0  ;;  %v960_v39 = vpop.f32.mrf.mxu1  ;;  %v5906_v20 = vcombine.high %v1363_v15, %v1367_v16  ;;  %v1355_v21 = vld [vmem:[#allocation19 + $0xbc0] sm:$0xff]  ;;  %v5777_v27 = vcombine.low %v1235_v9, %v1239_v10  ;;  %v5905_v28 = vcombine.low %v1363_v15, %v1367_v16 }
 0x253   :  { %v6823_v41 = vpack.c.bf16 %v968_v32, %v968_v32  ;;  %v6825_v42 = vpack.c.bf16 %v970_v33, %v970_v33  ;;  %4178 = vmatpush1.bf16.msra.mxu0 %v5825_v25  ;;  %4219 = vmatpush1.bf16.msra.mxu1 %v5953_v26  ;;  %v1359_v22 = vld [vmem:[#allocation19 + $0xbe0] sm:$0xff] }
 0x254   :  { %v920_v44 = vpop.f32.mrf.mxu0  ;;  %v961_v45 = vpop.f32.mrf.mxu1  ;;  %4179 = vmatprep.subr.bf16.mxu0 %v5818_v29  ;;  %4220 = vmatprep.subr.bf16.mxu1 %v5946_v30  ;;  %v1483_v25 = vld [vmem:[#allocation19 + $0xfc0] sm:$0xff]  ;;  %v5898_v29 = vcombine.high %v1355_v21, %v1359_v22  ;;  %v5897_v35 = vcombine.low %v1355_v21, %v1359_v22 }
 0x255   :  { %4207 = vmatprep.mubr.bf16.mxu0 %v6823_v41  ;;  %4248 = vmatprep.mubr.bf16.mxu1 %v6825_v42  ;;  %v1487_v26 = vld [vmem:[#allocation19 + $0xfe0] sm:$0xff] }
 0x256   :  { %v6026_v30 = vcombine.high %v1483_v25, %v1487_v26  ;;  %v1351_v32 = vld [vmem:[#allocation19 + $0xba0] sm:$0xff]  ;;  %v6025_v37 = vcombine.low %v1483_v25, %v1487_v26 }
 0x257   :  { %4180 = vmatpush1.bf16.msra.mxu0 %v5817_v40  ;;  %4221 = vmatpush1.bf16.msra.mxu1 %v5945_v43  ;;  %v1475_v33 = vld [vmem:[#allocation19 + $0xf80] sm:$0xff]  ;;  %v5890_v38 = vcombine.high %v1347_v31, %v1351_v32 }
 0x258   :  { %4181 = vmatprep.subr.bf16.mxu0 %v5810_v46  ;;  %4222 = vmatprep.subr.bf16.mxu1 %v5938_v47  ;;  %v6018_v39 = vcombine.high %v1475_v33, %v1479_v34  ;;  %v1339_v40 = vld [vmem:[#allocation19 + $0xb40] sm:$0xff]  ;;  %v5889_v46 = vcombine.low %v1347_v31, %v1351_v32  ;;  %v6017_v47 = vcombine.low %v1475_v33, %v1479_v34  ;;  %v1036_v33 = vld [vmem:[#allocation19 + $0x1c8] sm:$0xff] }
 0x259   :  { %v1343_v43 = vld [vmem:[#allocation19 + $0xb60] sm:$0xff]  ;;  %v1040_v34 = vld [vmem:[#allocation19 + $0x1e8] sm:$0xff] }
 0x25a   :  { %v1467_v44 = vld [vmem:[#allocation19 + $0xf40] sm:$0xff]  ;;  %v5882_v48 = vcombine.high %v1339_v40, %v1343_v43 }
 0x25b   :  { %4182 = vmatpush1.bf16.msra.mxu0 %v5809_v52  ;;  %4223 = vmatpush1.bf16.msra.mxu1 %v5937_v53  ;;  %v1471_v45 = vld [vmem:[#allocation19 + $0xf60] sm:$0xff] }
 0x25c   :  { %4183 = vmatprep.subr.bf16.mxu0 %v5802_v36  ;;  %4224 = vmatprep.subr.bf16.mxu1 %v5930_v56  ;;  %v6010_v49 = vcombine.high %v1467_v44, %v1471_v45  ;;  %v1331_v50 = vld [vmem:[#allocation19 + $0xb00] sm:$0xff]  ;;  %v5881_v36 = vcombine.low %v1339_v40, %v1343_v43  ;;  %v6009_v56 = vcombine.low %v1467_v44, %v1471_v45 }
 0x25d   :  { %v1335_v51 = vld [vmem:[#allocation19 + $0xb20] sm:$0xff]  ;;  %v5580_v40 = vcombine.high %v1036_v33, %v1040_v34  ;;  %v967_v43 = vmul.f32 %v6817_v23, %v6803_v54  ;;  %v969_v44 = vmul.f32 %v6819_v24, %v6805_v55  ;;  %v1020_v55 = vld [vmem:[#allocation19 + $0x148] sm:$0xff] }
 0x25e   :  { %v1459_v52 = vld [vmem:[#allocation19 + $0xf00] sm:$0xff]  ;;  %v5874_v57 = vcombine.high %v1331_v50, %v1335_v51  ;;  %v1024_v24 = vld [vmem:[#allocation19 + $0x168] sm:$0xff] }
 0x25f   :  { %4184 = vmatpush1.bf16.msra.mxu0 %v5801_v61  ;;  %4225 = vmatpush1.bf16.msra.mxu1 %v5929_v62  ;;  %v1463_v53 = vld [vmem:[#allocation19 + $0xf20] sm:$0xff] }
 0x260   :  { %4185 = vmatprep.subr.bf16.mxu0 %v5794_v63  ;;  %4226 = vmatprep.subr.bf16.mxu1 %v5922_v0  ;;  %v6002_v58 = vcombine.high %v1459_v52, %v1463_v53  ;;  %v1323_v59 = vld [vmem:[#allocation19 + $0xac0] sm:$0xff]  ;;  %v5873_v63 = vcombine.low %v1331_v50, %v1335_v51  ;;  %v6001_v0 = vcombine.low %v1459_v52, %v1463_v53 }
 0x261   :  { %v1327_v60 = vld [vmem:[#allocation19 + $0xae0] sm:$0xff]  ;;  %v5579_v50 = vcombine.low %v1036_v33, %v1040_v34  ;;  %v6833_v51 = vpack.c.bf16 %v967_v43, %v967_v43  ;;  %v6835_v52 = vpack.c.bf16 %v969_v44, %v969_v44 }
 0x262   :  { %v1451_v61 = vld [vmem:[#allocation19 + $0xec0] sm:$0xff]  ;;  %v5866_v1 = vcombine.high %v1323_v59, %v1327_v60 }
 0x263   :  { %4186 = vmatpush1.bf16.msra.mxu0 %v5793_v5  ;;  %4227 = vmatpush1.bf16.msra.mxu1 %v5921_v6  ;;  %v1455_v62 = vld [vmem:[#allocation19 + $0xee0] sm:$0xff] }
 0x264   :  { %4187 = vmatprep.subr.bf16.mxu0 %v5786_v7  ;;  %4228 = vmatprep.subr.bf16.mxu1 %v5914_v8  ;;  %v5994_v2 = vcombine.high %v1451_v61, %v1455_v62  ;;  %v1315_v3 = vld [vmem:[#allocation19 + $0xa80] sm:$0xff]  ;;  %v5865_v7 = vcombine.low %v1323_v59, %v1327_v60  ;;  %v5993_v8 = vcombine.low %v1451_v61, %v1455_v62  ;;  %v1012_v61 = vld [vmem:[#allocation19 + $0x108] sm:$0xff] }
 0x265   :  { %v1319_v4 = vld [vmem:[#allocation19 + $0xaa0] sm:$0xff]  ;;  %v5564_v59 = vcombine.high %v1020_v55, %v1024_v24  ;;  %v1016_v62 = vld [vmem:[#allocation19 + $0x128] sm:$0xff] }
 0x266   :  { %v1443_v5 = vld [vmem:[#allocation19 + $0xe80] sm:$0xff]  ;;  %v5858_v9 = vcombine.high %v1315_v3, %v1319_v4 }
 0x267   :  { %4188 = vmatpush1.bf16.msra.mxu0 %v5785_v17  ;;  %4229 = vmatpush1.bf16.msra.mxu1 %v5913_v18  ;;  %v1447_v6 = vld [vmem:[#allocation19 + $0xea0] sm:$0xff] }
 0x268   :  { %4189 = vmatprep.subr.bf16.mxu0 %v5778_v19  ;;  %4230 = vmatprep.subr.bf16.mxu1 %v5906_v20  ;;  %v5986_v10 = vcombine.high %v1443_v5, %v1447_v6  ;;  %v1307_v15 = vld [vmem:[#allocation19 + $0xa40] sm:$0xff]  ;;  %v5857_v19 = vcombine.low %v1315_v3, %v1319_v4  ;;  %v5985_v20 = vcombine.low %v1443_v5, %v1447_v6  ;;  %v1004_v5 = vld [vmem:[#allocation19 + $0xc8] sm:$0xff] }
 0x269   :  { %v1311_v16 = vld [vmem:[#allocation19 + $0xa60] sm:$0xff]  ;;  %v5556_v3 = vcombine.high %v1012_v61, %v1016_v62  ;;  %v1008_v6 = vld [vmem:[#allocation19 + $0xe8] sm:$0xff] }
 0x26a   :  { %v1435_v17 = vld [vmem:[#allocation19 + $0xe40] sm:$0xff]  ;;  %v5850_v21 = vcombine.high %v1307_v15, %v1311_v16 }
 0x26b   :  { %4190 = vmatpush1.bf16.msra.mxu0 %v5777_v27  ;;  %4231 = vmatpush1.bf16.msra.mxu1 %v5905_v28  ;;  %v1439_v18 = vld [vmem:[#allocation19 + $0xe60] sm:$0xff] }
 0x26c   :  { %4191 = vmatprep.subr.bf16.mxu0 %v5898_v29  ;;  %4232 = vmatprep.subr.bf16.mxu1 %v6026_v30  ;;  %v5978_v22 = vcombine.high %v1435_v17, %v1439_v18  ;;  %v1299_v25 = vld [vmem:[#allocation19 + $0xa00] sm:$0xff]  ;;  %v5849_v29 = vcombine.low %v1307_v15, %v1311_v16  ;;  %v5977_v30 = vcombine.low %v1435_v17, %v1439_v18  ;;  %v996_v17 = vld [vmem:[#allocation19 + $0x88] sm:$0xff] }
 0x26d   :  { %v1303_v26 = vld [vmem:[#allocation19 + $0xa20] sm:$0xff]  ;;  %v5548_v15 = vcombine.high %v1004_v5, %v1008_v6  ;;  %v1000_v18 = vld [vmem:[#allocation19 + $0xa8] sm:$0xff] }
 0x26e   :  { %v1427_v27 = vld [vmem:[#allocation19 + $0xe00] sm:$0xff]  ;;  %v5842_v31 = vcombine.high %v1299_v25, %v1303_v26 }
 0x26f   :  { %4192 = vmatpush2.bf16.msra.mxu0 %v5897_v35  ;;  %4233 = vmatpush2.bf16.msra.mxu1 %v6025_v37  ;;  %v1431_v28 = vld [vmem:[#allocation19 + $0xe20] sm:$0xff]  ;;  %v1164_v35 = vld [vmem:[#allocation19 + $0x5c8] sm:$0xff] }
 0x270   :  { %4193 = vmatprep.subr.bf16.mxu0 %v5890_v38  ;;  %4234 = vmatprep.subr.bf16.mxu1 %v6018_v39  ;;  %v5970_v32 = vcombine.high %v1427_v27, %v1431_v28  ;;  %v1168_v37 = vld [vmem:[#allocation19 + $0x5e8] sm:$0xff]  ;;  %v5841_v38 = vcombine.low %v1299_v25, %v1303_v26  ;;  %v5969_v39 = vcombine.low %v1427_v27, %v1431_v28 }
 0x271   :  { %v5708_v45 = vcombine.high %v1164_v35, %v1168_v37  ;;  %v5707_v53 = vcombine.low %v1164_v35, %v1168_v37  ;;  %v5540_v25 = vcombine.high %v996_v17, %v1000_v18  ;;  %v988_v27 = vld [vmem:[#allocation19 + $0x48] sm:$0xff] }
 0x272   :  { %v992_v28 = vld [vmem:[#allocation19 + $0x68] sm:$0xff] }
 0x273   :  { %4194 = vmatpush2.bf16.msra.mxu0 %v5889_v46  ;;  %4235 = vmatpush2.bf16.msra.mxu1 %v6017_v47  ;;  %v1028_v46 = vld [vmem:[#allocation19 + $0x188] sm:$0xff]  ;;  %v5532_v33 = vcombine.high %v988_v27, %v992_v28 }
 0x274   :  { %4195 = vmatprep.subr.bf16.mxu0 %v5882_v48  ;;  %4236 = vmatprep.subr.bf16.mxu1 %v6010_v49  ;;  %v1032_v47 = vld [vmem:[#allocation19 + $0x1a8] sm:$0xff] }
 0x275   :  { %v1156_v48 = vld [vmem:[#allocation19 + $0x588] sm:$0xff]  ;;  %v5572_v54 = vcombine.high %v1028_v46, %v1032_v47 }
 0x276   :  { %v1160_v49 = vld [vmem:[#allocation19 + $0x5a8] sm:$0xff] }
 0x277   :  { %4196 = vmatpush2.bf16.msra.mxu0 %v5881_v36  ;;  %4237 = vmatpush2.bf16.msra.mxu1 %v6009_v56  ;;  %v5700_v23 = vcombine.high %v1156_v48, %v1160_v49  ;;  %v1148_v36 = vld [vmem:[#allocation19 + $0x548] sm:$0xff] }
 0x278   :  { %4197 = vmatprep.subr.bf16.mxu0 %v5874_v57  ;;  %4238 = vmatprep.subr.bf16.mxu1 %v6002_v58  ;;  %v1152_v56 = vld [vmem:[#allocation19 + $0x568] sm:$0xff]  ;;  %v5571_v57 = vcombine.low %v1028_v46, %v1032_v47  ;;  %v5699_v58 = vcombine.low %v1156_v48, %v1160_v49 }
 0x279   :  { %v5692_v60 = vcombine.high %v1148_v36, %v1152_v56  ;;  %v980_v35 = vld [vmem:[#allocation19 + $0x8] sm:$0xff] }
 0x27a   :  { %v984_v37 = vld [vmem:[#allocation19 + $0x28] sm:$0xff] }
 0x27b   :  { %4198 = vmatpush2.bf16.msra.mxu0 %v5873_v63  ;;  %4239 = vmatpush2.bf16.msra.mxu1 %v6001_v0  ;;  %v1140_v63 = vld [vmem:[#allocation19 + $0x508] sm:$0xff]  ;;  %v5524_v44 = vcombine.high %v980_v35, %v984_v37 }
 0x27c   :  { %4199 = vmatprep.subr.bf16.mxu0 %v5866_v1  ;;  %4240 = vmatprep.subr.bf16.mxu1 %v5994_v2  ;;  %v1144_v0 = vld [vmem:[#allocation19 + $0x528] sm:$0xff]  ;;  %v5563_v1 = vcombine.low %v1020_v55, %v1024_v24  ;;  %v5691_v2 = vcombine.low %v1148_v36, %v1152_v56 }
 0x27d   :  { %v5684_v4 = vcombine.high %v1140_v63, %v1144_v0  ;;  %v1100_v46 = vld [vmem:[#allocation19 + $0x3c8] sm:$0xff] }
 0x27e   :  { %v1104_v47 = vld [vmem:[#allocation19 + $0x3e8] sm:$0xff] }
 0x27f   :  { %4200 = vmatpush2.bf16.msra.mxu0 %v5865_v7  ;;  %4241 = vmatpush2.bf16.msra.mxu1 %v5993_v8  ;;  %v1132_v7 = vld [vmem:[#allocation19 + $0x4c8] sm:$0xff] }
 0x280   :  { %4201 = vmatprep.subr.bf16.mxu0 %v5858_v9  ;;  %4242 = vmatprep.subr.bf16.mxu1 %v5986_v10  ;;  %v1136_v8 = vld [vmem:[#allocation19 + $0x4e8] sm:$0xff]  ;;  %v5555_v9 = vcombine.low %v1012_v61, %v1016_v62  ;;  %v5683_v10 = vcombine.low %v1140_v63, %v1144_v0 }
 0x281   :  { %v5676_v16 = vcombine.high %v1132_v7, %v1136_v8  ;;  %v1228_v48 = vld [vmem:[#allocation19 + $0x7c8] sm:$0xff] }
 0x282   :  { %v1232_v49 = vld [vmem:[#allocation19 + $0x7e8] sm:$0xff] }
 0x283   :  { %4202 = vmatpush2.bf16.msra.mxu0 %v5857_v19  ;;  %4243 = vmatpush2.bf16.msra.mxu1 %v5985_v20  ;;  %v1124_v19 = vld [vmem:[#allocation19 + $0x488] sm:$0xff] }
 0x284   :  { %4203 = vmatprep.subr.bf16.mxu0 %v5850_v21  ;;  %4244 = vmatprep.subr.bf16.mxu1 %v5978_v22  ;;  %v1128_v20 = vld [vmem:[#allocation19 + $0x4a8] sm:$0xff]  ;;  %v5547_v21 = vcombine.low %v1004_v5, %v1008_v6  ;;  %v5675_v22 = vcombine.low %v1132_v7, %v1136_v8 }
 0x285   :  { %v5668_v26 = vcombine.high %v1124_v19, %v1128_v20  ;;  %v1092_v55 = vld [vmem:[#allocation19 + $0x388] sm:$0xff] }
 0x286   :  { %v1096_v24 = vld [vmem:[#allocation19 + $0x3a8] sm:$0xff] }
 0x287   :  { %4204 = vmatpush2.bf16.msra.mxu0 %v5849_v29  ;;  %4245 = vmatpush2.bf16.msra.mxu1 %v5977_v30  ;;  %v1116_v29 = vld [vmem:[#allocation19 + $0x448] sm:$0xff] }
 0x288   :  { %4205 = vmatprep.subr.bf16.mxu0 %v5842_v31  ;;  %4246 = vmatprep.subr.bf16.mxu1 %v5970_v32  ;;  %v1120_v30 = vld [vmem:[#allocation19 + $0x468] sm:$0xff]  ;;  %v5539_v31 = vcombine.low %v996_v17, %v1000_v18  ;;  %v5667_v32 = vcombine.low %v1124_v19, %v1128_v20 }
 0x289   :  { %v5660_v34 = vcombine.high %v1116_v29, %v1120_v30  ;;  %v5659_v43 = vcombine.low %v1116_v29, %v1120_v30  ;;  %v1220_v36 = vld [vmem:[#allocation19 + $0x788] sm:$0xff] }
 0x28a   :  { %v1224_v56 = vld [vmem:[#allocation19 + $0x7a8] sm:$0xff] }
 0x28b   :  { %4206 = vmatpush2.bf16.msra.mxu0 %v5841_v38  ;;  %4247 = vmatpush2.bf16.msra.mxu1 %v5969_v39  ;;  %v1108_v38 = vld [vmem:[#allocation19 + $0x408] sm:$0xff] }
 0x28c   :  { %4257 = vmatprep.subr.bf16.mxu0 %v5580_v40  ;;  %4298 = vmatprep.subr.bf16.mxu1 %v5708_v45  ;;  %v1112_v39 = vld [vmem:[#allocation19 + $0x428] sm:$0xff]  ;;  %v5531_v40 = vcombine.low %v988_v27, %v992_v28 }
 0x28d   :  { %v5652_v45 = vcombine.high %v1108_v38, %v1112_v39  ;;  %v1084_v61 = vld [vmem:[#allocation19 + $0x348] sm:$0xff] }
 0x28e   :  { %4208 = vmatmul.mubr.bf16.vlgmr.msra.gmra.mxu0 %v6833_v51  ;;  %4249 = vmatmul.mubr.bf16.vlgmr.msra.gmra.mxu1 %v6835_v52  ;;  %v1088_v62 = vld [vmem:[#allocation19 + $0x368] sm:$0xff] }
 0x28f   :  { %4258 = vmatpush1.bf16.msra.mxu0 %v5579_v50  ;;  %4289 = vmatprep.mubr.bf16.mxu0 %v6807_v11  ;;  %v5523_v50 = vcombine.low %v980_v35, %v984_v37  ;;  %v1212_v63 = vld [vmem:[#allocation19 + $0x748] sm:$0xff] }
 0x290   :  { %4299 = vmatpush1.bf16.msra.mxu1 %v5707_v53  ;;  %4330 = vmatprep.mubr.bf16.mxu1 %v6809_v12  ;;  %v5651_v53 = vcombine.low %v1108_v38, %v1112_v39  ;;  %v1216_v0 = vld [vmem:[#allocation19 + $0x768] sm:$0xff] }
 0x291   :  { %4259 = vmatprep.subr.bf16.mxu0 %v5572_v54  ;;  %4300 = vmatprep.subr.bf16.mxu1 %v5700_v23  ;;  %v5644_v54 = vcombine.high %v1100_v46, %v1104_v47  ;;  %v5772_v23 = vcombine.high %v1228_v48, %v1232_v49  ;;  %v1076_v5 = vld [vmem:[#allocation19 + $0x308] sm:$0xff] }
 0x292   :  { %v1080_v6 = vld [vmem:[#allocation19 + $0x328] sm:$0xff] }
 0x293   :  { %4260 = vmatpush1.bf16.msra.mxu0 %v5571_v57  ;;  %v5643_v57 = vcombine.low %v1100_v46, %v1104_v47  ;;  %v1204_v7 = vld [vmem:[#allocation19 + $0x708] sm:$0xff] }
 0x294   :  { %4301 = vmatpush1.bf16.msra.mxu1 %v5699_v58  ;;  %4261 = vmatprep.subr.bf16.mxu0 %v5564_v59  ;;  %v5771_v58 = vcombine.low %v1228_v48, %v1232_v49  ;;  %v5636_v59 = vcombine.high %v1092_v55, %v1096_v24  ;;  %v1208_v8 = vld [vmem:[#allocation19 + $0x728] sm:$0xff] }
 0x295   :  { %4302 = vmatprep.subr.bf16.mxu1 %v5692_v60  ;;  %v5764_v60 = vcombine.high %v1220_v36, %v1224_v56  ;;  %v1068_v17 = vld [vmem:[#allocation19 + $0x2c8] sm:$0xff] }
 0x296   :  { %v1072_v18 = vld [vmem:[#allocation19 + $0x2e8] sm:$0xff] }
 0x297   :  { %4262 = vmatpush1.bf16.msra.mxu0 %v5563_v1  ;;  %v5635_v1 = vcombine.low %v1092_v55, %v1096_v24  ;;  %v1196_v19 = vld [vmem:[#allocation19 + $0x6c8] sm:$0xff] }
 0x298   :  { %4303 = vmatpush1.bf16.msra.mxu1 %v5691_v2  ;;  %4263 = vmatprep.subr.bf16.mxu0 %v5556_v3  ;;  %v5763_v2 = vcombine.low %v1220_v36, %v1224_v56  ;;  %v5628_v3 = vcombine.high %v1084_v61, %v1088_v62  ;;  %v1200_v20 = vld [vmem:[#allocation19 + $0x6e8] sm:$0xff] }
 0x299   :  { %4304 = vmatprep.subr.bf16.mxu1 %v5684_v4  ;;  %v5756_v4 = vcombine.high %v1212_v63, %v1216_v0  ;;  %v1060_v27 = vld [vmem:[#allocation19 + $0x288] sm:$0xff] }
 0x29a   :  { %v1064_v28 = vld [vmem:[#allocation19 + $0x2a8] sm:$0xff] }
 0x29b   :  { %4264 = vmatpush1.bf16.msra.mxu0 %v5555_v9  ;;  %v5627_v9 = vcombine.low %v1084_v61, %v1088_v62  ;;  %v1188_v29 = vld [vmem:[#allocation19 + $0x688] sm:$0xff] }
 0x29c   :  { %4305 = vmatpush1.bf16.msra.mxu1 %v5683_v10  ;;  %4265 = vmatprep.subr.bf16.mxu0 %v5548_v15  ;;  %v5755_v10 = vcombine.low %v1212_v63, %v1216_v0  ;;  %v5620_v15 = vcombine.high %v1076_v5, %v1080_v6  ;;  %v1192_v30 = vld [vmem:[#allocation19 + $0x6a8] sm:$0xff] }
 0x29d   :  { %4306 = vmatprep.subr.bf16.mxu1 %v5676_v16  ;;  %v5748_v16 = vcombine.high %v1204_v7, %v1208_v8  ;;  %v1052_v35 = vld [vmem:[#allocation19 + $0x248] sm:$0xff] }
 0x29e   :  { %v1056_v37 = vld [vmem:[#allocation19 + $0x268] sm:$0xff] }
 0x29f   :  { %4266 = vmatpush1.bf16.msra.mxu0 %v5547_v21  ;;  %v5619_v21 = vcombine.low %v1076_v5, %v1080_v6  ;;  %v1180_v38 = vld [vmem:[#allocation19 + $0x648] sm:$0xff] }
 0x2a0   :  { %4307 = vmatpush1.bf16.msra.mxu1 %v5675_v22  ;;  %4267 = vmatprep.subr.bf16.mxu0 %v5540_v25  ;;  %v5747_v22 = vcombine.low %v1204_v7, %v1208_v8  ;;  %v5612_v25 = vcombine.high %v1068_v17, %v1072_v18  ;;  %v1184_v39 = vld [vmem:[#allocation19 + $0x668] sm:$0xff] }
 0x2a1   :  { %4308 = vmatprep.subr.bf16.mxu1 %v5668_v26  ;;  %v5740_v26 = vcombine.high %v1196_v19, %v1200_v20  ;;  %v1044_v46 = vld [vmem:[#allocation19 + $0x208] sm:$0xff] }
 0x2a2   :  { %v1048_v47 = vld [vmem:[#allocation19 + $0x228] sm:$0xff] }
 0x2a3   :  { %4268 = vmatpush1.bf16.msra.mxu0 %v5539_v31  ;;  %v5611_v31 = vcombine.low %v1068_v17, %v1072_v18  ;;  %v1172_v48 = vld [vmem:[#allocation19 + $0x608] sm:$0xff] }
 0x2a4   :  { %4309 = vmatpush1.bf16.msra.mxu1 %v5667_v32  ;;  %4269 = vmatprep.subr.bf16.mxu0 %v5532_v33  ;;  %v5739_v32 = vcombine.low %v1196_v19, %v1200_v20  ;;  %v5604_v33 = vcombine.high %v1060_v27, %v1064_v28  ;;  %v1176_v49 = vld [vmem:[#allocation19 + $0x628] sm:$0xff] }
 0x2a5   :  { %4310 = vmatprep.subr.bf16.mxu1 %v5660_v34  ;;  %v5732_v34 = vcombine.high %v1188_v29, %v1192_v30  ;;  %v1292_v55 = vld [vmem:[#allocation19 + $0x9c8] sm:$0xff] }
 0x2a6   :  { %v1296_v24 = vld [vmem:[#allocation19 + $0x9e8] sm:$0xff] }
 0x2a7   :  { %4270 = vmatpush1.bf16.msra.mxu0 %v5531_v40  ;;  %v5603_v40 = vcombine.low %v1060_v27, %v1064_v28  ;;  %v1420_v36 = vld [vmem:[#allocation19 + $0xdc8] sm:$0xff]  ;;  %v5835_v63 = vcombine.low %v1292_v55, %v1296_v24 }
 0x2a8   :  { %4311 = vmatpush1.bf16.msra.mxu1 %v5659_v43  ;;  %4271 = vmatprep.subr.bf16.mxu0 %v5524_v44  ;;  %v5731_v43 = vcombine.low %v1188_v29, %v1192_v30  ;;  %v5596_v44 = vcombine.high %v1052_v35, %v1056_v37  ;;  %v1424_v56 = vld [vmem:[#allocation19 + $0xde8] sm:$0xff] }
 0x2a9   :  { %4312 = vmatprep.subr.bf16.mxu1 %v5652_v45  ;;  %v5724_v45 = vcombine.high %v1180_v38, %v1184_v39  ;;  %v1284_v61 = vld [vmem:[#allocation19 + $0x988] sm:$0xff] }
 0x2aa   :  { %v1288_v62 = vld [vmem:[#allocation19 + $0x9a8] sm:$0xff] }
 0x2ab   :  { %4272 = vmatpush1.bf16.msra.mxu0 %v5523_v50  ;;  %v5595_v50 = vcombine.low %v1052_v35, %v1056_v37  ;;  %v1412_v0 = vld [vmem:[#allocation19 + $0xd88] sm:$0xff] }
 0x2ac   :  { %4313 = vmatpush1.bf16.msra.mxu1 %v5651_v53  ;;  %4273 = vmatprep.subr.bf16.mxu0 %v5644_v54  ;;  %v5723_v53 = vcombine.low %v1180_v38, %v1184_v39  ;;  %v5588_v54 = vcombine.high %v1044_v46, %v1048_v47  ;;  %v1280_v5 = vld [vmem:[#allocation19 + $0x968] sm:$0xff] }
 0x2ad   :  { %4314 = vmatprep.subr.bf16.mxu1 %v5772_v23  ;;  %v5716_v23 = vcombine.high %v1172_v48, %v1176_v49  ;;  %v1404_v7 = vld [vmem:[#allocation19 + $0xd48] sm:$0xff] }
 0x2ae   :  { %v1408_v8 = vld [vmem:[#allocation19 + $0xd68] sm:$0xff] }
 0x2af   :  { %4274 = vmatpush2.bf16.msra.mxu0 %v5643_v57  ;;  %v5587_v57 = vcombine.low %v1044_v46, %v1048_v47  ;;  %v1268_v17 = vld [vmem:[#allocation19 + $0x908] sm:$0xff] }
 0x2b0   :  { %4315 = vmatpush2.bf16.msra.mxu1 %v5771_v58  ;;  %4275 = vmatprep.subr.bf16.mxu0 %v5636_v59  ;;  %v5715_v58 = vcombine.low %v1172_v48, %v1176_v49  ;;  %v5836_v59 = vcombine.high %v1292_v55, %v1296_v24  ;;  %v1272_v18 = vld [vmem:[#allocation19 + $0x928] sm:$0xff] }
 0x2b1   :  { %4316 = vmatprep.subr.bf16.mxu1 %v5764_v60  ;;  %v5964_v60 = vcombine.high %v1420_v36, %v1424_v56  ;;  %v1396_v19 = vld [vmem:[#allocation19 + $0xd08] sm:$0xff] }
 0x2b2   :  { %v1400_v20 = vld [vmem:[#allocation19 + $0xd28] sm:$0xff] }
 0x2b3   :  { %4276 = vmatpush2.bf16.msra.mxu0 %v5635_v1  ;;  %v1416_v1 = vld [vmem:[#allocation19 + $0xda8] sm:$0xff] }
 0x2b4   :  { %4317 = vmatpush2.bf16.msra.mxu1 %v5763_v2  ;;  %4277 = vmatprep.subr.bf16.mxu0 %v5628_v3  ;;  %v5963_v2 = vcombine.low %v1420_v36, %v1424_v56  ;;  %v5828_v3 = vcombine.high %v1284_v61, %v1288_v62  ;;  %v5956_v6 = vcombine.high %v1412_v0, %v1416_v1  ;;  %v1260_v27 = vld [vmem:[#allocation19 + $0x8c8] sm:$0xff] }
 0x2b5   :  { %4318 = vmatprep.subr.bf16.mxu1 %v5756_v4  ;;  %v1276_v4 = vld [vmem:[#allocation19 + $0x948] sm:$0xff] }
 0x2b6   :  { %v1264_v28 = vld [vmem:[#allocation19 + $0x8e8] sm:$0xff] }
 0x2b7   :  { %4278 = vmatpush2.bf16.msra.mxu0 %v5627_v9  ;;  %v5827_v9 = vcombine.low %v1284_v61, %v1288_v62  ;;  %v1388_v29 = vld [vmem:[#allocation19 + $0xcc8] sm:$0xff] }
 0x2b8   :  { %4319 = vmatpush2.bf16.msra.mxu1 %v5755_v10  ;;  %4279 = vmatprep.subr.bf16.mxu0 %v5620_v15  ;;  %v5955_v10 = vcombine.low %v1412_v0, %v1416_v1  ;;  %v5820_v15 = vcombine.high %v1276_v4, %v1280_v5  ;;  %v1392_v30 = vld [vmem:[#allocation19 + $0xce8] sm:$0xff] }
 0x2b9   :  { %4320 = vmatprep.subr.bf16.mxu1 %v5748_v16  ;;  %v5948_v16 = vcombine.high %v1404_v7, %v1408_v8  ;;  %v1252_v35 = vld [vmem:[#allocation19 + $0x888] sm:$0xff] }
 0x2ba   :  { %v1256_v37 = vld [vmem:[#allocation19 + $0x8a8] sm:$0xff] }
 0x2bb   :  { %4280 = vmatpush2.bf16.msra.mxu0 %v5619_v21  ;;  %v5819_v21 = vcombine.low %v1276_v4, %v1280_v5  ;;  %v1380_v38 = vld [vmem:[#allocation19 + $0xc88] sm:$0xff] }
 0x2bc   :  { %4321 = vmatpush2.bf16.msra.mxu1 %v5747_v22  ;;  %4281 = vmatprep.subr.bf16.mxu0 %v5612_v25  ;;  %v5947_v22 = vcombine.low %v1404_v7, %v1408_v8  ;;  %v5812_v25 = vcombine.high %v1268_v17, %v1272_v18  ;;  %v1384_v39 = vld [vmem:[#allocation19 + $0xca8] sm:$0xff] }
 0x2bd   :  { %4322 = vmatprep.subr.bf16.mxu1 %v5740_v26  ;;  %v5940_v26 = vcombine.high %v1396_v19, %v1400_v20  ;;  %v1244_v46 = vld [vmem:[#allocation19 + $0x848] sm:$0xff] }
 0x2be   :  { %v1248_v47 = vld [vmem:[#allocation19 + $0x868] sm:$0xff] }
 0x2bf   :  { %4282 = vmatpush2.bf16.msra.mxu0 %v5611_v31  ;;  %v5811_v31 = vcombine.low %v1268_v17, %v1272_v18  ;;  %v1372_v48 = vld [vmem:[#allocation19 + $0xc48] sm:$0xff] }
 0x2c0   :  { %4323 = vmatpush2.bf16.msra.mxu1 %v5739_v32  ;;  %4283 = vmatprep.subr.bf16.mxu0 %v5604_v33  ;;  %v5939_v32 = vcombine.low %v1396_v19, %v1400_v20  ;;  %v5804_v33 = vcombine.high %v1260_v27, %v1264_v28  ;;  %v1376_v49 = vld [vmem:[#allocation19 + $0xc68] sm:$0xff] }
 0x2c1   :  { %4324 = vmatprep.subr.bf16.mxu1 %v5732_v34  ;;  %v5932_v34 = vcombine.high %v1388_v29, %v1392_v30  ;;  %v1236_v55 = vld [vmem:[#allocation19 + $0x808] sm:$0xff] }
 0x2c2   :  { %v1240_v24 = vld [vmem:[#allocation19 + $0x828] sm:$0xff] }
 0x2c3   :  { %4284 = vmatpush2.bf16.msra.mxu0 %v5603_v40  ;;  %v5803_v40 = vcombine.low %v1260_v27, %v1264_v28  ;;  %v1364_v36 = vld [vmem:[#allocation19 + $0xc08] sm:$0xff]  ;;  %v5779_v1 = vcombine.low %v1236_v55, %v1240_v24 }
 0x2c4   :  { %4325 = vmatpush2.bf16.msra.mxu1 %v5731_v43  ;;  %4285 = vmatprep.subr.bf16.mxu0 %v5596_v44  ;;  %v5931_v43 = vcombine.low %v1388_v29, %v1392_v30  ;;  %v5796_v44 = vcombine.high %v1252_v35, %v1256_v37  ;;  %v1368_v56 = vld [vmem:[#allocation19 + $0xc28] sm:$0xff] }
 0x2c5   :  { %4326 = vmatprep.subr.bf16.mxu1 %v5724_v45  ;;  %v5924_v45 = vcombine.high %v1380_v38, %v1384_v39  ;;  %v1356_v61 = vld [vmem:[#allocation19 + $0xbc8] sm:$0xff] }
 0x2c6   :  { %v1360_v62 = vld [vmem:[#allocation19 + $0xbe8] sm:$0xff] }
 0x2c7   :  { %4286 = vmatpush2.bf16.msra.mxu0 %v5595_v50  ;;  %v5795_v50 = vcombine.low %v1252_v35, %v1256_v37  ;;  %v1488_v0 = vld [vmem:[#allocation19 + $0xfe8] sm:$0xff] }
 0x2c8   :  { %4327 = vmatpush2.bf16.msra.mxu1 %v5723_v53  ;;  %4287 = vmatprep.subr.bf16.mxu0 %v5588_v54  ;;  %v5923_v53 = vcombine.low %v1380_v38, %v1384_v39  ;;  %v5788_v54 = vcombine.high %v1244_v46, %v1248_v47  ;;  %v1348_v5 = vld [vmem:[#allocation19 + $0xb88] sm:$0xff] }
 0x2c9   :  { %4328 = vmatprep.subr.bf16.mxu1 %v5716_v23  ;;  %v5916_v23 = vcombine.high %v1372_v48, %v1376_v49  ;;  %v1476_v7 = vld [vmem:[#allocation19 + $0xf88] sm:$0xff] }
 0x2ca   :  { %v1480_v8 = vld [vmem:[#allocation19 + $0xfa8] sm:$0xff] }
 0x2cb   :  { %4288 = vmatpush2.bf16.msra.mxu0 %v5587_v57  ;;  %v5787_v57 = vcombine.low %v1244_v46, %v1248_v47  ;;  %v1340_v17 = vld [vmem:[#allocation19 + $0xb48] sm:$0xff] }
 0x2cc   :  { %4329 = vmatpush2.bf16.msra.mxu1 %v5715_v58  ;;  %4339 = vmatprep.subr.bf16.mxu0 %v5836_v59  ;;  %v5915_v58 = vcombine.low %v1372_v48, %v1376_v49  ;;  %v5780_v59 = vcombine.high %v1236_v55, %v1240_v24  ;;  %v1344_v18 = vld [vmem:[#allocation19 + $0xb68] sm:$0xff] }
 0x2cd   :  { %4380 = vmatprep.subr.bf16.mxu1 %v5964_v60  ;;  %v5908_v60 = vcombine.high %v1364_v36, %v1368_v56  ;;  %v1468_v19 = vld [vmem:[#allocation19 + $0xf48] sm:$0xff] }
 0x2ce   :  { %4290 = vmatmul.mubr.bf16.vlgmr.msra.gmra.mxu0 %v6811_v13  ;;  %v1472_v20 = vld [vmem:[#allocation19 + $0xf68] sm:$0xff] }
 0x2cf   :  { %4331 = vmatmul.mubr.bf16.vlgmr.msra.gmra.mxu1 %v6813_v14  ;;  %4340 = vmatpush1.bf16.msra.mxu0 %v5835_v63  ;;  %v1484_v63 = vld [vmem:[#allocation19 + $0xfc8] sm:$0xff] }
 0x2d0   :  { %4371 = vmatprep.mubr.bf16.mxu0 %v6823_v41  ;;  %4381 = vmatpush1.bf16.msra.mxu1 %v5963_v2  ;;  %v5907_v2 = vcombine.low %v1364_v36, %v1368_v56  ;;  %v6028_v4 = vcombine.high %v1484_v63, %v1488_v0  ;;  %v1332_v27 = vld [vmem:[#allocation19 + $0xb08] sm:$0xff] }
 0x2d1   :  { %4412 = vmatprep.mubr.bf16.mxu1 %v6825_v42  ;;  %4341 = vmatprep.subr.bf16.mxu0 %v5828_v3  ;;  %v5900_v3 = vcombine.high %v1356_v61, %v1360_v62  ;;  %v1336_v28 = vld [vmem:[#allocation19 + $0xb28] sm:$0xff] }
 0x2d2   :  { %4382 = vmatprep.subr.bf16.mxu1 %v5956_v6  ;;  %v1352_v6 = vld [vmem:[#allocation19 + $0xba8] sm:$0xff] }
 0x2d3   :  { %4342 = vmatpush1.bf16.msra.mxu0 %v5827_v9  ;;  %v5899_v9 = vcombine.low %v1356_v61, %v1360_v62  ;;  %v1460_v29 = vld [vmem:[#allocation19 + $0xf08] sm:$0xff] }
 0x2d4   :  { %4383 = vmatpush1.bf16.msra.mxu1 %v5955_v10  ;;  %4343 = vmatprep.subr.bf16.mxu0 %v5820_v15  ;;  %v6027_v10 = vcombine.low %v1484_v63, %v1488_v0  ;;  %v5892_v15 = vcombine.high %v1348_v5, %v1352_v6  ;;  %v1464_v30 = vld [vmem:[#allocation19 + $0xf28] sm:$0xff] }
 0x2d5   :  { %4384 = vmatprep.subr.bf16.mxu1 %v5948_v16  ;;  %v6020_v16 = vcombine.high %v1476_v7, %v1480_v8  ;;  %v1324_v35 = vld [vmem:[#allocation19 + $0xac8] sm:$0xff] }
 0x2d6   :  { %v1328_v37 = vld [vmem:[#allocation19 + $0xae8] sm:$0xff] }
 0x2d7   :  { %4344 = vmatpush1.bf16.msra.mxu0 %v5819_v21  ;;  %v5891_v21 = vcombine.low %v1348_v5, %v1352_v6  ;;  %v1452_v38 = vld [vmem:[#allocation19 + $0xec8] sm:$0xff] }
 0x2d8   :  { %4385 = vmatpush1.bf16.msra.mxu1 %v5947_v22  ;;  %4345 = vmatprep.subr.bf16.mxu0 %v5812_v25  ;;  %v6019_v22 = vcombine.low %v1476_v7, %v1480_v8  ;;  %v5884_v25 = vcombine.high %v1340_v17, %v1344_v18  ;;  %v1456_v39 = vld [vmem:[#allocation19 + $0xee8] sm:$0xff]  ;;  %v1037_v7 = vld [vmem:[#allocation19 + $0x1d0] sm:$0xff] }
 0x2d9   :  { %4386 = vmatprep.subr.bf16.mxu1 %v5940_v26  ;;  %v6012_v26 = vcombine.high %v1468_v19, %v1472_v20  ;;  %v1316_v46 = vld [vmem:[#allocation19 + $0xa88] sm:$0xff]  ;;  %v1041_v8 = vld [vmem:[#allocation19 + $0x1f0] sm:$0xff] }
 0x2da   :  { %v1320_v47 = vld [vmem:[#allocation19 + $0xaa8] sm:$0xff] }
 0x2db   :  { %4346 = vmatpush1.bf16.msra.mxu0 %v5811_v31  ;;  %v5883_v31 = vcombine.low %v1340_v17, %v1344_v18  ;;  %v1444_v48 = vld [vmem:[#allocation19 + $0xe88] sm:$0xff]  ;;  %v5582_v18 = vcombine.high %v1037_v7, %v1041_v8 }
 0x2dc   :  { %4387 = vmatpush1.bf16.msra.mxu1 %v5939_v32  ;;  %4347 = vmatprep.subr.bf16.mxu0 %v5804_v33  ;;  %v6011_v32 = vcombine.low %v1468_v19, %v1472_v20  ;;  %v5876_v33 = vcombine.high %v1332_v27, %v1336_v28  ;;  %v1448_v49 = vld [vmem:[#allocation19 + $0xea8] sm:$0xff]  ;;  %v6848_v19 = vld [vmem:[#allocation20] sm:$0xff] }
 0x2dd   :  { %4388 = vmatprep.subr.bf16.mxu1 %v5932_v34  ;;  %v6004_v34 = vcombine.high %v1460_v29, %v1464_v30  ;;  %v1308_v55 = vld [vmem:[#allocation19 + $0xa48] sm:$0xff] }
 0x2de   :  { %v1312_v24 = vld [vmem:[#allocation19 + $0xa68] sm:$0xff] }
 0x2df   :  { %4348 = vmatpush1.bf16.msra.mxu0 %v5803_v40  ;;  %v5875_v40 = vcombine.low %v1332_v27, %v1336_v28  ;;  %v1436_v36 = vld [vmem:[#allocation19 + $0xe48] sm:$0xff]  ;;  %v1157_v28 = vld [vmem:[#allocation19 + $0x590] sm:$0xff] }
 0x2e0   :  { %4389 = vmatpush1.bf16.msra.mxu1 %v5931_v43  ;;  %4349 = vmatprep.subr.bf16.mxu0 %v5796_v44  ;;  %v6003_v43 = vcombine.low %v1460_v29, %v1464_v30  ;;  %v5868_v44 = vcombine.high %v1324_v35, %v1328_v37  ;;  %v1440_v56 = vld [vmem:[#allocation19 + $0xe68] sm:$0xff]  ;;  %v1161_v29 = vld [vmem:[#allocation19 + $0x5b0] sm:$0xff] }
 0x2e1   :  { %4390 = vmatprep.subr.bf16.mxu1 %v5924_v45  ;;  %v5996_v45 = vcombine.high %v1452_v38, %v1456_v39  ;;  %v5980_v61 = vcombine.high %v1436_v36, %v1440_v56  ;;  %v1300_v62 = vld [vmem:[#allocation19 + $0xa08] sm:$0xff] }
 0x2e2   :  { %v1304_v63 = vld [vmem:[#allocation19 + $0xa28] sm:$0xff] }
 0x2e3   :  { %4350 = vmatpush1.bf16.msra.mxu0 %v5795_v50  ;;  %v5867_v50 = vcombine.low %v1324_v35, %v1328_v37  ;;  %v1428_v0 = vld [vmem:[#allocation19 + $0xe08] sm:$0xff]  ;;  %v5844_v5 = vcombine.high %v1300_v62, %v1304_v63 }
 0x2e4   :  { %4391 = vmatpush1.bf16.msra.mxu1 %v5923_v53  ;;  %4351 = vmatprep.subr.bf16.mxu0 %v5788_v54  ;;  %v5995_v53 = vcombine.low %v1452_v38, %v1456_v39  ;;  %v5860_v54 = vcombine.high %v1316_v46, %v1320_v47  ;;  %v5702_v38 = vcombine.high %v1157_v28, %v1161_v29  ;;  %v1149_v39 = vld [vmem:[#allocation19 + $0x550] sm:$0xff] }
 0x2e5   :  { %4392 = vmatprep.subr.bf16.mxu1 %v5916_v23  ;;  %v5988_v23 = vcombine.high %v1444_v48, %v1448_v49 }
 0x2e7   :  { %4352 = vmatpush1.bf16.msra.mxu0 %v5787_v57  ;;  %v5859_v57 = vcombine.low %v1316_v46, %v1320_v47  ;;  %v5701_v47 = vcombine.low %v1157_v28, %v1161_v29 }
 0x2e8   :  { %4393 = vmatpush1.bf16.msra.mxu1 %v5915_v58  ;;  %4353 = vmatprep.subr.bf16.mxu0 %v5780_v59  ;;  %v1493_v58 = vlaneseq  ;;  %v5987_v59 = vcombine.low %v1444_v48, %v1448_v49 }
 0x2e9   :  { %4394 = vmatprep.subr.bf16.mxu1 %v5908_v60  ;;  %v5852_v60 = vcombine.high %v1308_v55, %v1312_v24 }
 0x2eb   :  { %4354 = vmatpush1.bf16.msra.mxu0 %v5779_v1  ;;  %v1432_v1 = vld [vmem:[#allocation19 + $0xe28] sm:$0xff] }
 0x2ec   :  { %4395 = vmatpush1.bf16.msra.mxu1 %v5907_v2  ;;  %4355 = vmatprep.subr.bf16.mxu0 %v5900_v3  ;;  %v5851_v2 = vcombine.low %v1308_v55, %v1312_v24  ;;  %v6845_v3 = vshrl.u32 %v1493_v58, 7  ;;  %v5972_v6 = vcombine.high %v1428_v0, %v1432_v1  ;;  %v5971_v17 = vcombine.low %v1428_v0, %v1432_v1  ;;  %v1005_v0 = vld [vmem:[#allocation19 + $0xd0] sm:$0xff] }
 0x2ed   :  { %4396 = vmatprep.subr.bf16.mxu1 %v6028_v4  ;;  %v5979_v4 = vcombine.low %v1436_v36, %v1440_v56  ;;  %v1141_v36 = vld [vmem:[#allocation19 + $0x510] sm:$0xff] }
 0x2ee   :  { %v1145_v56 = vld [vmem:[#allocation19 + $0x530] sm:$0xff] }
 0x2ef   :  { %4356 = vmatpush2.bf16.msra.mxu0 %v5899_v9  ;;  %v1165_v9 = vld [vmem:[#allocation19 + $0x5d0] sm:$0xff] }
 0x2f0   :  { %4397 = vmatpush2.bf16.msra.mxu1 %v6027_v10  ;;  %4357 = vmatprep.subr.bf16.mxu0 %v5892_v15  ;;  %v1169_v10 = vld [vmem:[#allocation19 + $0x5f0] sm:$0xff]  ;;  %v5843_v15 = vcombine.low %v1300_v62, %v1304_v63  ;;  %v5686_v63 = vcombine.high %v1141_v36, %v1145_v56 }
 0x2f1   :  { %4398 = vmatprep.subr.bf16.mxu1 %v6020_v16  ;;  %v1495_v16 = vsub.s32 0, %v6845_v3  ;;  %v5710_v20 = vcombine.high %v1165_v9, %v1169_v10  ;;  %v5709_v30 = vcombine.low %v1165_v9, %v1169_v10  ;;  %v1009_v1 = vld [vmem:[#allocation19 + $0xf0] sm:$0xff] }
 0x2f2   :  { %v997_v9 = vld [vmem:[#allocation19 + $0x90] sm:$0xff] }
 0x2f3   :  { %4358 = vmatpush2.bf16.msra.mxu0 %v5891_v21  ;;  %v1499_v21 = vsub.s32 1, %v6845_v3  ;;  %v1496_v27 = vrot.slane %v6848_v19, %v1495_v16  ;;  %v1001_v10 = vld [vmem:[#allocation19 + $0xb0] sm:$0xff] }
 0x2f4   :  { %4399 = vmatpush2.bf16.msra.mxu1 %v6019_v22  ;;  %4359 = vmatprep.subr.bf16.mxu0 %v5884_v25  ;;  %v1029_v22 = vld [vmem:[#allocation19 + $0x190] sm:$0xff]  ;;  %v5541_v28 = vcombine.low %v997_v9, %v1001_v10 }
 0x2f5   :  { %4400 = vmatprep.subr.bf16.mxu1 %v6012_v26  ;;  %v1033_v25 = vld [vmem:[#allocation19 + $0x1b0] sm:$0xff]  ;;  %v5581_v26 = vcombine.low %v1037_v7, %v1041_v8  ;;  %v5550_v7 = vcombine.high %v1005_v0, %v1009_v1 }
 0x2f6   :  { %v1129_v16 = vld [vmem:[#allocation19 + $0x4b0] sm:$0xff] }
 0x2f7   :  { %4360 = vmatpush2.bf16.msra.mxu0 %v5883_v31  ;;  %v1500_v31 = vrot.slane %v6848_v19, %v1499_v21 }
 0x2f8   :  { %4401 = vmatpush2.bf16.msra.mxu1 %v6011_v32  ;;  %4361 = vmatprep.subr.bf16.mxu0 %v5876_v33  ;;  %v5574_v32 = vcombine.high %v1029_v22, %v1033_v25  ;;  %v1021_v33 = vld [vmem:[#allocation19 + $0x150] sm:$0xff] }
 0x2f9   :  { %4402 = vmatprep.subr.bf16.mxu1 %v6004_v34  ;;  %v1025_v34 = vld [vmem:[#allocation19 + $0x170] sm:$0xff] }
 0x2fa   :  { %v5566_v48 = vcombine.high %v1021_v33, %v1025_v34  ;;  %v5565_v58 = vcombine.low %v1021_v33, %v1025_v34  ;;  %v985_v33 = vld [vmem:[#allocation19 + $0x30] sm:$0xff] }
 0x2fb   :  { %4362 = vmatpush2.bf16.msra.mxu0 %v5875_v40  ;;  %v1153_v40 = vld [vmem:[#allocation19 + $0x570] sm:$0xff] }
 0x2fc   :  { %4403 = vmatpush2.bf16.msra.mxu1 %v6003_v43  ;;  %4363 = vmatprep.subr.bf16.mxu0 %v5868_v44  ;;  %v5573_v44 = vcombine.low %v1029_v22, %v1033_v25  ;;  %v989_v22 = vld [vmem:[#allocation19 + $0x50] sm:$0xff] }
 0x2fd   :  { %4404 = vmatprep.subr.bf16.mxu1 %v5996_v45  ;;  %v993_v25 = vld [vmem:[#allocation19 + $0x70] sm:$0xff] }
 0x2fe   :  { %v1109_v34 = vld [vmem:[#allocation19 + $0x410] sm:$0xff] }
 0x2ff   :  { %4364 = vmatpush2.bf16.msra.mxu0 %v5867_v50 }
 0x300   :  { %4405 = vmatpush2.bf16.msra.mxu1 %v5995_v53  ;;  %4365 = vmatprep.subr.bf16.mxu0 %v5860_v54  ;;  %v5694_v53 = vcombine.high %v1149_v39, %v1153_v40  ;;  %v1013_v54 = vld [vmem:[#allocation19 + $0x110] sm:$0xff] }
 0x301   :  { %4406 = vmatprep.subr.bf16.mxu1 %v5988_v23  ;;  %v1017_v23 = vld [vmem:[#allocation19 + $0x130] sm:$0xff] }
 0x302   :  { %v5558_v62 = vcombine.high %v1013_v54, %v1017_v23 }
 0x303   :  { %4366 = vmatpush2.bf16.msra.mxu0 %v5859_v57 }
 0x304   :  { %4407 = vmatpush2.bf16.msra.mxu1 %v5987_v59  ;;  %4367 = vmatprep.subr.bf16.mxu0 %v5852_v60 }
 0x305   :  { %4408 = vmatprep.subr.bf16.mxu1 %v5980_v61  ;;  %v5693_v61 = vcombine.low %v1149_v39, %v1153_v40 }
 0x307   :  { %4368 = vmatpush2.bf16.msra.mxu0 %v5851_v2  ;;  %v1133_v2 = vld [vmem:[#allocation19 + $0x4d0] sm:$0xff] }
 0x308   :  { %4409 = vmatpush2.bf16.msra.mxu1 %v5979_v4  ;;  %4369 = vmatprep.subr.bf16.mxu0 %v5844_v5  ;;  %v1137_v4 = vld [vmem:[#allocation19 + $0x4f0] sm:$0xff]  ;;  %v5557_v5 = vcombine.low %v1013_v54, %v1017_v23 }
 0x309   :  { %4410 = vmatprep.subr.bf16.mxu1 %v5972_v6  ;;  %v5685_v6 = vcombine.low %v1141_v36, %v1145_v56  ;;  %v5678_v8 = vcombine.high %v1133_v2, %v1137_v4  ;;  %v1093_v54 = vld [vmem:[#allocation19 + $0x390] sm:$0xff] }
 0x30a   :  { %v1097_v23 = vld [vmem:[#allocation19 + $0x3b0] sm:$0xff] }
 0x30b   :  { %4370 = vmatpush2.bf16.msra.mxu0 %v5843_v15  ;;  %v1125_v15 = vld [vmem:[#allocation19 + $0x490] sm:$0xff] }
 0x30c   :  { %4411 = vmatpush2.bf16.msra.mxu1 %v5971_v17  ;;  %4421 = vmatprep.subr.bf16.mxu0 %v5582_v18  ;;  %v5549_v17 = vcombine.low %v1005_v0, %v1009_v1  ;;  %v5677_v18 = vcombine.low %v1133_v2, %v1137_v4  ;;  %v5670_v21 = vcombine.high %v1125_v15, %v1129_v16 }
 0x30d   :  { %4462 = vmatprep.subr.bf16.mxu1 %v5710_v20  ;;  %v5542_v20 = vcombine.high %v997_v9, %v1001_v10  ;;  %v5669_v29 = vcombine.low %v1125_v15, %v1129_v16  ;;  %v5637_v0 = vcombine.low %v1093_v54, %v1097_v23 }
 0x30e   :  { %4372 = vmatmul.mubr.bf16.vlgmr.msra.gmra.mxu0 %v6833_v51  ;;  %v4127_v35 = vpop.f32.mrf.mxu0  ;;  %v4168_v37 = vpop.f32.mrf.mxu1 }
 0x30f   :  { %4413 = vmatmul.mubr.bf16.vlgmr.msra.gmra.mxu1 %v6835_v52  ;;  %v4128_v43 = vadd.f32 %v4127_v35, %v1496_v27  ;;  %4422 = vmatpush1.bf16.msra.mxu0 %v5581_v26  ;;  %v1117_v26 = vld [vmem:[#allocation19 + $0x450] sm:$0xff] }
 0x310   :  { %4453 = vmatprep.mubr.bf16.mxu0 %v6807_v11  ;;  %4463 = vmatpush1.bf16.msra.mxu1 %v5709_v30  ;;  %v4129_v45 = vpop.f32.mrf.mxu0  ;;  %v4170_v46 = vpop.f32.mrf.mxu1  ;;  %v1121_v27 = vld [vmem:[#allocation19 + $0x470] sm:$0xff]  ;;  %v5534_v30 = vcombine.high %v989_v22, %v993_v25 }
 0x311   :  { %v6856_v49 = vadd.f32 %v4168_v37, %v4128_v43  ;;  %4494 = vmatprep.mubr.bf16.mxu1 %v6809_v12  ;;  %v4130_v50 = vadd.f32 %v4129_v45, %v1500_v31  ;;  %4423 = vmatprep.subr.bf16.mxu0 %v5574_v32  ;;  %v5662_v31 = vcombine.high %v1117_v26, %v1121_v27  ;;  %v981_v32 = vld [vmem:[#allocation19 + $0x10] sm:$0xff] }
 0x312   :  { %4464 = vmatprep.subr.bf16.mxu1 %v5702_v38  ;;  %v4131_v55 = vpop.f32.mrf.mxu0  ;;  %v4172_v24 = vpop.f32.mrf.mxu1  ;;  %v1113_v35 = vld [vmem:[#allocation19 + $0x430] sm:$0xff]  ;;  %v5533_v37 = vcombine.low %v989_v22, %v993_v25  ;;  %v5661_v38 = vcombine.low %v1117_v26, %v1121_v27  ;;  %v5526_v39 = vcombine.high %v981_v32, %v985_v33 }
 0x313   :  { %v6859_v57 = vadd.f32 %v4170_v46, %v4130_v50  ;;  %4424 = vmatpush1.bf16.msra.mxu0 %v5573_v44  ;;  %v5654_v40 = vcombine.high %v1109_v34, %v1113_v35  ;;  %v1101_v43 = vld [vmem:[#allocation19 + $0x3d0] sm:$0xff] }
 0x314   :  { %4465 = vmatpush1.bf16.msra.mxu1 %v5701_v47  ;;  %v4132_v59 = vpop.f32.mrf.mxu0  ;;  %v4173_v60 = vpop.f32.mrf.mxu1  ;;  %4425 = vmatprep.subr.bf16.mxu0 %v5566_v48  ;;  %v1105_v44 = vld [vmem:[#allocation19 + $0x3f0] sm:$0xff]  ;;  %v5525_v47 = vcombine.low %v981_v32, %v985_v33  ;;  %v5653_v48 = vcombine.low %v1109_v34, %v1113_v35 }
 0x315   :  { %4466 = vmatprep.subr.bf16.mxu1 %v5694_v53  ;;  %v1229_v45 = vld [vmem:[#allocation19 + $0x7d0] sm:$0xff]  ;;  %v5646_v50 = vcombine.high %v1101_v43, %v1105_v44  ;;  %v5645_v36 = vcombine.low %v1101_v43, %v1105_v44 }
 0x316   :  { %v1233_v46 = vld [vmem:[#allocation19 + $0x7f0] sm:$0xff] }
 0x317   :  { %4426 = vmatpush1.bf16.msra.mxu0 %v5565_v58  ;;  %v5774_v53 = vcombine.high %v1229_v45, %v1233_v46  ;;  %v1221_v55 = vld [vmem:[#allocation19 + $0x790] sm:$0xff]  ;;  %v5773_v56 = vcombine.low %v1229_v45, %v1233_v46  ;;  %v5638_v58 = vcombine.high %v1093_v54, %v1097_v23 }
 0x318   :  { %4467 = vmatpush1.bf16.msra.mxu1 %v5693_v61  ;;  %4427 = vmatprep.subr.bf16.mxu0 %v5558_v62  ;;  %v1225_v24 = vld [vmem:[#allocation19 + $0x7b0] sm:$0xff] }
 0x319   :  { %4468 = vmatprep.subr.bf16.mxu1 %v5686_v63  ;;  %v5766_v59 = vcombine.high %v1221_v55, %v1225_v24  ;;  %v1085_v60 = vld [vmem:[#allocation19 + $0x350] sm:$0xff]  ;;  %v5765_v1 = vcombine.low %v1221_v55, %v1225_v24 }
 0x31a   :  { %v1089_v61 = vld [vmem:[#allocation19 + $0x370] sm:$0xff] }
 0x31b   :  { %4428 = vmatpush1.bf16.msra.mxu0 %v5557_v5  ;;  %v1213_v62 = vld [vmem:[#allocation19 + $0x750] sm:$0xff]  ;;  %v5630_v2 = vcombine.high %v1085_v60, %v1089_v61  ;;  %v5629_v9 = vcombine.low %v1085_v60, %v1089_v61 }
 0x31c   :  { %4469 = vmatpush1.bf16.msra.mxu1 %v5685_v6  ;;  %4429 = vmatprep.subr.bf16.mxu0 %v5550_v7  ;;  %v1217_v63 = vld [vmem:[#allocation19 + $0x770] sm:$0xff] }
 0x31d   :  { %4470 = vmatprep.subr.bf16.mxu1 %v5678_v8  ;;  %v5758_v4 = vcombine.high %v1213_v62, %v1217_v63  ;;  %v1077_v5 = vld [vmem:[#allocation19 + $0x310] sm:$0xff]  ;;  %v5757_v10 = vcombine.low %v1213_v62, %v1217_v63 }
 0x31e   :  { %v1081_v6 = vld [vmem:[#allocation19 + $0x330] sm:$0xff] }
 0x31f   :  { %4430 = vmatpush1.bf16.msra.mxu0 %v5549_v17  ;;  %v1205_v7 = vld [vmem:[#allocation19 + $0x710] sm:$0xff]  ;;  %v5622_v15 = vcombine.high %v1077_v5, %v1081_v6  ;;  %v5621_v22 = vcombine.low %v1077_v5, %v1081_v6 }
 0x320   :  { %4471 = vmatpush1.bf16.msra.mxu1 %v5677_v18  ;;  %4431 = vmatprep.subr.bf16.mxu0 %v5542_v20  ;;  %v1209_v8 = vld [vmem:[#allocation19 + $0x730] sm:$0xff] }
 0x321   :  { %4472 = vmatprep.subr.bf16.mxu1 %v5670_v21  ;;  %v5750_v16 = vcombine.high %v1205_v7, %v1209_v8  ;;  %v1069_v17 = vld [vmem:[#allocation19 + $0x2d0] sm:$0xff]  ;;  %v5749_v25 = vcombine.low %v1205_v7, %v1209_v8 }
 0x322   :  { %v1073_v18 = vld [vmem:[#allocation19 + $0x2f0] sm:$0xff] }
 0x323   :  { %4432 = vmatpush1.bf16.msra.mxu0 %v5541_v28  ;;  %v1197_v20 = vld [vmem:[#allocation19 + $0x6d0] sm:$0xff]  ;;  %v5614_v26 = vcombine.high %v1069_v17, %v1073_v18  ;;  %v5613_v32 = vcombine.low %v1069_v17, %v1073_v18 }
 0x324   :  { %4473 = vmatpush1.bf16.msra.mxu1 %v5669_v29  ;;  %4433 = vmatprep.subr.bf16.mxu0 %v5534_v30  ;;  %v1201_v21 = vld [vmem:[#allocation19 + $0x6f0] sm:$0xff] }
 0x325   :  { %4474 = vmatprep.subr.bf16.mxu1 %v5662_v31  ;;  %v5742_v27 = vcombine.high %v1197_v20, %v1201_v21  ;;  %v1061_v28 = vld [vmem:[#allocation19 + $0x290] sm:$0xff]  ;;  %v5741_v33 = vcombine.low %v1197_v20, %v1201_v21 }
 0x326   :  { %v1065_v29 = vld [vmem:[#allocation19 + $0x2b0] sm:$0xff] }
 0x327   :  { %4434 = vmatpush1.bf16.msra.mxu0 %v5533_v37  ;;  %v1189_v30 = vld [vmem:[#allocation19 + $0x690] sm:$0xff]  ;;  %v5606_v34 = vcombine.high %v1061_v28, %v1065_v29  ;;  %v5605_v43 = vcombine.low %v1061_v28, %v1065_v29 }
 0x328   :  { %4475 = vmatpush1.bf16.msra.mxu1 %v5661_v38  ;;  %4435 = vmatprep.subr.bf16.mxu0 %v5526_v39  ;;  %v1193_v31 = vld [vmem:[#allocation19 + $0x6b0] sm:$0xff] }
 0x329   :  { %4476 = vmatprep.subr.bf16.mxu1 %v5654_v40  ;;  %v5734_v35 = vcombine.high %v1189_v30, %v1193_v31  ;;  %v1053_v37 = vld [vmem:[#allocation19 + $0x250] sm:$0xff]  ;;  %v5733_v44 = vcombine.low %v1189_v30, %v1193_v31 }
 0x32a   :  { %v1057_v38 = vld [vmem:[#allocation19 + $0x270] sm:$0xff] }
 0x32b   :  { %4436 = vmatpush1.bf16.msra.mxu0 %v5525_v47  ;;  %v1181_v39 = vld [vmem:[#allocation19 + $0x650] sm:$0xff]  ;;  %v5598_v45 = vcombine.high %v1053_v37, %v1057_v38  ;;  %v5597_v54 = vcombine.low %v1053_v37, %v1057_v38 }
 0x32c   :  { %4477 = vmatpush1.bf16.msra.mxu1 %v5653_v48  ;;  %4437 = vmatprep.subr.bf16.mxu0 %v5646_v50  ;;  %v1185_v40 = vld [vmem:[#allocation19 + $0x670] sm:$0xff] }
 0x32d   :  { %4478 = vmatprep.subr.bf16.mxu1 %v5774_v53  ;;  %v5726_v46 = vcombine.high %v1181_v39, %v1185_v40  ;;  %v1045_v47 = vld [vmem:[#allocation19 + $0x210] sm:$0xff]  ;;  %v5725_v23 = vcombine.low %v1181_v39, %v1185_v40 }
 0x32e   :  { %v1049_v48 = vld [vmem:[#allocation19 + $0x230] sm:$0xff] }
 0x32f   :  { %4438 = vmatpush2.bf16.msra.mxu0 %v5645_v36  ;;  %v1173_v50 = vld [vmem:[#allocation19 + $0x610] sm:$0xff]  ;;  %v5590_v55 = vcombine.high %v1045_v47, %v1049_v48  ;;  %v5589_v60 = vcombine.low %v1045_v47, %v1049_v48 }
 0x330   :  { %4479 = vmatpush2.bf16.msra.mxu1 %v5773_v56  ;;  %4439 = vmatprep.subr.bf16.mxu0 %v5638_v58  ;;  %v1177_v53 = vld [vmem:[#allocation19 + $0x630] sm:$0xff] }
 0x331   :  { %4480 = vmatprep.subr.bf16.mxu1 %v5766_v59  ;;  %v5718_v24 = vcombine.high %v1173_v50, %v1177_v53  ;;  %v1293_v36 = vld [vmem:[#allocation19 + $0x9d0] sm:$0xff]  ;;  %v5717_v61 = vcombine.low %v1173_v50, %v1177_v53 }
 0x332   :  { %v1297_v56 = vld [vmem:[#allocation19 + $0x9f0] sm:$0xff] }
 0x333   :  { %4440 = vmatpush2.bf16.msra.mxu0 %v5637_v0  ;;  %v1421_v58 = vld [vmem:[#allocation19 + $0xdd0] sm:$0xff]  ;;  %v5838_v62 = vcombine.high %v1293_v36, %v1297_v56 }
 0x334   :  { %4481 = vmatpush2.bf16.msra.mxu1 %v5765_v1  ;;  %4441 = vmatprep.subr.bf16.mxu0 %v5630_v2  ;;  %v1425_v59 = vld [vmem:[#allocation19 + $0xdf0] sm:$0xff]  ;;  %v5837_v2 = vcombine.low %v1293_v36, %v1297_v56 }
 0x335   :  { %4482 = vmatprep.subr.bf16.mxu1 %v5758_v4  ;;  %v5966_v63 = vcombine.high %v1421_v58, %v1425_v59  ;;  %v1285_v0 = vld [vmem:[#allocation19 + $0x990] sm:$0xff]  ;;  %v5965_v6 = vcombine.low %v1421_v58, %v1425_v59 }
 0x336   :  { %v1289_v1 = vld [vmem:[#allocation19 + $0x9b0] sm:$0xff] }
 0x337   :  { %4442 = vmatpush2.bf16.msra.mxu0 %v5629_v9  ;;  %v1413_v4 = vld [vmem:[#allocation19 + $0xd90] sm:$0xff]  ;;  %v5830_v7 = vcombine.high %v1285_v0, %v1289_v1  ;;  %v5829_v21 = vcombine.low %v1285_v0, %v1289_v1 }
 0x338   :  { %4483 = vmatpush2.bf16.msra.mxu1 %v5757_v10  ;;  %4443 = vmatprep.subr.bf16.mxu0 %v5622_v15  ;;  %v1417_v5 = vld [vmem:[#allocation19 + $0xdb0] sm:$0xff] }
 0x339   :  { %4484 = vmatprep.subr.bf16.mxu1 %v5750_v16  ;;  %v1277_v8 = vld [vmem:[#allocation19 + $0x950] sm:$0xff]  ;;  %v5958_v16 = vcombine.high %v1413_v4, %v1417_v5 }
 0x33a   :  { %v1281_v9 = vld [vmem:[#allocation19 + $0x970] sm:$0xff] }
 0x33b   :  { %4444 = vmatpush2.bf16.msra.mxu0 %v5621_v22  ;;  %v1405_v17 = vld [vmem:[#allocation19 + $0xd50] sm:$0xff]  ;;  %v5821_v38 = vcombine.low %v1277_v8, %v1281_v9 }
 0x33c   :  { %4485 = vmatpush2.bf16.msra.mxu1 %v5749_v25  ;;  %4445 = vmatprep.subr.bf16.mxu0 %v5614_v26  ;;  %v1409_v18 = vld [vmem:[#allocation19 + $0xd70] sm:$0xff]  ;;  %v5957_v26 = vcombine.low %v1413_v4, %v1417_v5 }
 0x33d   :  { %4486 = vmatprep.subr.bf16.mxu1 %v5742_v27  ;;  %v5822_v27 = vcombine.high %v1277_v8, %v1281_v9  ;;  %v5950_v30 = vcombine.high %v1405_v17, %v1409_v18  ;;  %v1273_v31 = vld [vmem:[#allocation19 + $0x930] sm:$0xff] }
 0x33e   :  { %v1389_v47 = vld [vmem:[#allocation19 + $0xcd0] sm:$0xff] }
 0x33f   :  { %4446 = vmatpush2.bf16.msra.mxu0 %v5613_v32  ;;  %v1393_v48 = vld [vmem:[#allocation19 + $0xcf0] sm:$0xff] }
 0x340   :  { %4487 = vmatpush2.bf16.msra.mxu1 %v5741_v33  ;;  %4447 = vmatprep.subr.bf16.mxu0 %v5606_v34  ;;  %v1397_v34 = vld [vmem:[#allocation19 + $0xd10] sm:$0xff]  ;;  %v5933_v59 = vcombine.low %v1389_v47, %v1393_v48 }
 0x341   :  { %4488 = vmatprep.subr.bf16.mxu1 %v5734_v35  ;;  %v1401_v35 = vld [vmem:[#allocation19 + $0xd30] sm:$0xff] }
 0x342   :  { %v5941_v53 = vcombine.low %v1397_v34, %v1401_v35  ;;  %v1381_v36 = vld [vmem:[#allocation19 + $0xc90] sm:$0xff] }
 0x343   :  { %4448 = vmatpush2.bf16.msra.mxu0 %v5605_v43  ;;  %v5949_v43 = vcombine.low %v1405_v17, %v1409_v18  ;;  %v1385_v56 = vld [vmem:[#allocation19 + $0xcb0] sm:$0xff] }
 0x344   :  { %4489 = vmatpush2.bf16.msra.mxu1 %v5733_v44  ;;  %4449 = vmatprep.subr.bf16.mxu0 %v5598_v45  ;;  %v1261_v45 = vld [vmem:[#allocation19 + $0x8d0] sm:$0xff]  ;;  %v5925_v4 = vcombine.low %v1381_v36, %v1385_v56 }
 0x345   :  { %4490 = vmatprep.subr.bf16.mxu1 %v5726_v46  ;;  %v1265_v46 = vld [vmem:[#allocation19 + $0x8f0] sm:$0xff] }
 0x346   :  { %v5805_v58 = vcombine.low %v1261_v45, %v1265_v46  ;;  %v1373_v0 = vld [vmem:[#allocation19 + $0xc50] sm:$0xff] }
 0x347   :  { %4450 = vmatpush2.bf16.msra.mxu0 %v5597_v54  ;;  %v5806_v54 = vcombine.high %v1261_v45, %v1265_v46  ;;  %v1377_v1 = vld [vmem:[#allocation19 + $0xc70] sm:$0xff] }
 0x348   :  { %4491 = vmatpush2.bf16.msra.mxu1 %v5725_v23  ;;  %4451 = vmatprep.subr.bf16.mxu0 %v5590_v55  ;;  %v5934_v23 = vcombine.high %v1389_v47, %v1393_v48  ;;  %v1253_v55 = vld [vmem:[#allocation19 + $0x890] sm:$0xff] }
 0x349   :  { %4492 = vmatprep.subr.bf16.mxu1 %v5718_v24  ;;  %v1257_v24 = vld [vmem:[#allocation19 + $0x8b0] sm:$0xff] }
 0x34a   :  { %v1241_v8 = vld [vmem:[#allocation19 + $0x830] sm:$0xff] }
 0x34b   :  { %4452 = vmatpush2.bf16.msra.mxu0 %v5589_v60  ;;  %v5798_v60 = vcombine.high %v1253_v55, %v1257_v24  ;;  %v1365_v9 = vld [vmem:[#allocation19 + $0xc10] sm:$0xff] }
 0x34c   :  { %4493 = vmatpush2.bf16.msra.mxu1 %v5717_v61  ;;  %4503 = vmatprep.subr.bf16.mxu0 %v5838_v62  ;;  %v5926_v61 = vcombine.high %v1381_v36, %v1385_v56  ;;  %v1245_v62 = vld [vmem:[#allocation19 + $0x850] sm:$0xff] }
 0x34d   :  { %4544 = vmatprep.subr.bf16.mxu1 %v5966_v63  ;;  %v1249_v63 = vld [vmem:[#allocation19 + $0x870] sm:$0xff] }
 0x34e   :  { %v4209_v10 = vpop.f32.mrf.mxu0  ;;  %v4250_v15 = vpop.f32.mrf.mxu1  ;;  %4454 = vmatmul.mubr.bf16.vlgmr.msra.gmra.mxu0 %v6811_v13  ;;  %v5790_v5 = vcombine.high %v1245_v62, %v1249_v63 }
 0x34f   :  { %v4210_v20 = vadd.f32 %v4209_v10, %v6856_v49  ;;  %4495 = vmatmul.mubr.bf16.vlgmr.msra.gmra.mxu1 %v6813_v14  ;;  %4504 = vmatpush1.bf16.msra.mxu0 %v5837_v2  ;;  %v1269_v49 = vld [vmem:[#allocation19 + $0x910] sm:$0xff]  ;;  %v5797_v2 = vcombine.low %v1253_v55, %v1257_v24 }
 0x350   :  { %4535 = vmatprep.mubr.bf16.mxu0 %v6823_v41  ;;  %4545 = vmatpush1.bf16.msra.mxu1 %v5965_v6  ;;  %v4211_v22 = vpop.f32.mrf.mxu0  ;;  %v4252_v25 = vpop.f32.mrf.mxu1  ;;  %v5814_v44 = vcombine.high %v1269_v49, %v1273_v31  ;;  %v5813_v50 = vcombine.low %v1269_v49, %v1273_v31  ;;  %v5918_v6 = vcombine.high %v1373_v0, %v1377_v1  ;;  %v1369_v10 = vld [vmem:[#allocation19 + $0xc30] sm:$0xff] }
 0x351   :  { %v6865_v28 = vadd.f32 %v4250_v15, %v4210_v20  ;;  %4576 = vmatprep.mubr.bf16.mxu1 %v6825_v42  ;;  %v4212_v29 = vadd.f32 %v4211_v22, %v6859_v57  ;;  %4505 = vmatprep.subr.bf16.mxu0 %v5830_v7  ;;  %v5942_v57 = vcombine.high %v1397_v34, %v1401_v35  ;;  %v1237_v7 = vld [vmem:[#allocation19 + $0x810] sm:$0xff] }
 0x352   :  { %v4213_v32 = vpop.f32.mrf.mxu0  ;;  %v4254_v33 = vpop.f32.mrf.mxu1  ;;  %4546 = vmatprep.subr.bf16.mxu1 %v5958_v16  ;;  %v5789_v15 = vcombine.low %v1245_v62, %v1249_v63  ;;  %v5917_v16 = vcombine.low %v1373_v0, %v1377_v1  ;;  %v5782_v17 = vcombine.high %v1237_v7, %v1241_v8  ;;  %v5910_v18 = vcombine.high %v1365_v9, %v1369_v10  ;;  %v1357_v20 = vld [vmem:[#allocation19 + $0xbd0] sm:$0xff] }
 0x353   :  { %v6869_v37 = vadd.f32 %v4252_v25, %v4212_v29  ;;  %4506 = vmatpush1.bf16.msra.mxu0 %v5829_v21  ;;  %v1361_v21 = vld [vmem:[#allocation19 + $0xbf0] sm:$0xff] }
 0x354   :  { %4547 = vmatpush1.bf16.msra.mxu1 %v5957_v26  ;;  %v4214_v39 = vpop.f32.mrf.mxu0  ;;  %v4255_v40 = vpop.f32.mrf.mxu1  ;;  %4507 = vmatprep.subr.bf16.mxu0 %v5822_v27  ;;  %v1485_v22 = vld [vmem:[#allocation19 + $0xfd0] sm:$0xff]  ;;  %v5781_v26 = vcombine.low %v1237_v7, %v1241_v8  ;;  %v5909_v27 = vcombine.low %v1365_v9, %v1369_v10  ;;  %v5902_v29 = vcombine.high %v1357_v20, %v1361_v21 }
 0x355   :  { %4548 = vmatprep.subr.bf16.mxu1 %v5950_v30  ;;  %v1489_v25 = vld [vmem:[#allocation19 + $0xff0] sm:$0xff]  ;;  %v5901_v34 = vcombine.low %v1357_v20, %v1361_v21 }
 0x356   :  { %v6030_v30 = vcombine.high %v1485_v22, %v1489_v25  ;;  %v1349_v49 = vld [vmem:[#allocation19 + $0xb90] sm:$0xff]  ;;  %v6029_v35 = vcombine.low %v1485_v22, %v1489_v25 }
 0x357   :  { %4508 = vmatpush1.bf16.msra.mxu0 %v5821_v38  ;;  %v1353_v31 = vld [vmem:[#allocation19 + $0xbb0] sm:$0xff] }
 0x358   :  { %4549 = vmatpush1.bf16.msra.mxu1 %v5949_v43  ;;  %4509 = vmatprep.subr.bf16.mxu0 %v5814_v44  ;;  %v1477_v32 = vld [vmem:[#allocation19 + $0xf90] sm:$0xff]  ;;  %v5894_v38 = vcombine.high %v1349_v49, %v1353_v31  ;;  %v5893_v45 = vcombine.low %v1349_v49, %v1353_v31 }
 0x359   :  { %4550 = vmatprep.subr.bf16.mxu1 %v5942_v57  ;;  %v1481_v33 = vld [vmem:[#allocation19 + $0xfb0] sm:$0xff] }
 0x35a   :  { %v6022_v39 = vcombine.high %v1477_v32, %v1481_v33  ;;  %v1341_v40 = vld [vmem:[#allocation19 + $0xb50] sm:$0xff]  ;;  %v6021_v46 = vcombine.low %v1477_v32, %v1481_v33 }
 0x35b   :  { %4510 = vmatpush1.bf16.msra.mxu0 %v5813_v50  ;;  %v1345_v43 = vld [vmem:[#allocation19 + $0xb70] sm:$0xff] }
 0x35c   :  { %4551 = vmatpush1.bf16.msra.mxu1 %v5941_v53  ;;  %4511 = vmatprep.subr.bf16.mxu0 %v5806_v54  ;;  %v1469_v44 = vld [vmem:[#allocation19 + $0xf50] sm:$0xff]  ;;  %v5886_v47 = vcombine.high %v1341_v40, %v1345_v43  ;;  %v5885_v55 = vcombine.low %v1341_v40, %v1345_v43  ;;  %v1503_v43 = vsub.s32 2, %v6845_v3 }
 0x35d   :  { %4552 = vmatprep.subr.bf16.mxu1 %v5934_v23  ;;  %v1473_v57 = vld [vmem:[#allocation19 + $0xf70] sm:$0xff] }
 0x35e   :  { %v6014_v48 = vcombine.high %v1469_v44, %v1473_v57  ;;  %v1333_v50 = vld [vmem:[#allocation19 + $0xb10] sm:$0xff]  ;;  %v6013_v24 = vcombine.low %v1469_v44, %v1473_v57 }
 0x35f   :  { %4512 = vmatpush1.bf16.msra.mxu0 %v5805_v58  ;;  %v1337_v53 = vld [vmem:[#allocation19 + $0xb30] sm:$0xff] }
 0x360   :  { %4553 = vmatpush1.bf16.msra.mxu1 %v5933_v59  ;;  %4513 = vmatprep.subr.bf16.mxu0 %v5798_v60  ;;  %v1461_v54 = vld [vmem:[#allocation19 + $0xf10] sm:$0xff]  ;;  %v5878_v36 = vcombine.high %v1333_v50, %v1337_v53  ;;  %v5877_v62 = vcombine.low %v1333_v50, %v1337_v53  ;;  %v1504_v50 = vrot.slane %v6848_v19, %v1503_v43 }
 0x361   :  { %4554 = vmatprep.subr.bf16.mxu1 %v5926_v61  ;;  %v1465_v23 = vld [vmem:[#allocation19 + $0xf30] sm:$0xff] }
 0x362   :  { %v6006_v56 = vcombine.high %v1461_v54, %v1465_v23  ;;  %v1325_v58 = vld [vmem:[#allocation19 + $0xad0] sm:$0xff]  ;;  %v6005_v63 = vcombine.low %v1461_v54, %v1465_v23  ;;  %v1158_v54 = vld [vmem:[#allocation19 + $0x598] sm:$0xff] }
 0x363   :  { %4514 = vmatpush1.bf16.msra.mxu0 %v5797_v2  ;;  %v1329_v59 = vld [vmem:[#allocation19 + $0xaf0] sm:$0xff]  ;;  %v1162_v23 = vld [vmem:[#allocation19 + $0x5b8] sm:$0xff] }
 0x364   :  { %4555 = vmatpush1.bf16.msra.mxu1 %v5925_v4  ;;  %4515 = vmatprep.subr.bf16.mxu0 %v5790_v5  ;;  %v1453_v60 = vld [vmem:[#allocation19 + $0xed0] sm:$0xff]  ;;  %v5870_v0 = vcombine.high %v1325_v58, %v1329_v59  ;;  %v5869_v7 = vcombine.low %v1325_v58, %v1329_v59  ;;  %v1026_v58 = vld [vmem:[#allocation19 + $0x178] sm:$0xff] }
 0x365   :  { %4556 = vmatprep.subr.bf16.mxu1 %v5918_v6  ;;  %v1457_v61 = vld [vmem:[#allocation19 + $0xef0] sm:$0xff] }
 0x366   :  { %v5998_v1 = vcombine.high %v1453_v60, %v1457_v61  ;;  %v1317_v2 = vld [vmem:[#allocation19 + $0xa90] sm:$0xff]  ;;  %v5997_v8 = vcombine.low %v1453_v60, %v1457_v61  ;;  %v5704_v60 = vcombine.high %v1158_v54, %v1162_v23  ;;  %v1150_v61 = vld [vmem:[#allocation19 + $0x558] sm:$0xff] }
 0x367   :  { %4516 = vmatpush1.bf16.msra.mxu0 %v5789_v15  ;;  %v1321_v4 = vld [vmem:[#allocation19 + $0xab0] sm:$0xff] }
 0x368   :  { %4557 = vmatpush1.bf16.msra.mxu1 %v5917_v16  ;;  %4517 = vmatprep.subr.bf16.mxu0 %v5782_v17  ;;  %v1445_v5 = vld [vmem:[#allocation19 + $0xe90] sm:$0xff]  ;;  %v5862_v9 = vcombine.high %v1317_v2, %v1321_v4  ;;  %v5861_v20 = vcombine.low %v1317_v2, %v1321_v4 }
 0x369   :  { %4558 = vmatprep.subr.bf16.mxu1 %v5910_v18  ;;  %v1449_v6 = vld [vmem:[#allocation19 + $0xeb0] sm:$0xff] }
 0x36a   :  { %v5990_v10 = vcombine.high %v1445_v5, %v1449_v6  ;;  %v1309_v15 = vld [vmem:[#allocation19 + $0xa50] sm:$0xff]  ;;  %v5989_v21 = vcombine.low %v1445_v5, %v1449_v6 }
 0x36b   :  { %4518 = vmatpush1.bf16.msra.mxu0 %v5781_v26  ;;  %v1313_v16 = vld [vmem:[#allocation19 + $0xa70] sm:$0xff] }
 0x36c   :  { %4559 = vmatpush1.bf16.msra.mxu1 %v5909_v27  ;;  %4519 = vmatprep.subr.bf16.mxu0 %v5902_v29  ;;  %v1437_v17 = vld [vmem:[#allocation19 + $0xe50] sm:$0xff]  ;;  %v5854_v22 = vcombine.high %v1309_v15, %v1313_v16  ;;  %v5853_v49 = vcombine.low %v1309_v15, %v1313_v16  ;;  %v1142_v16 = vld [vmem:[#allocation19 + $0x518] sm:$0xff] }
 0x36d   :  { %4560 = vmatprep.subr.bf16.mxu1 %v6030_v30  ;;  %v1441_v18 = vld [vmem:[#allocation19 + $0xe70] sm:$0xff] }
 0x36e   :  { %v5982_v25 = vcombine.high %v1437_v17, %v1441_v18  ;;  %v1301_v26 = vld [vmem:[#allocation19 + $0xa10] sm:$0xff]  ;;  %v5981_v31 = vcombine.low %v1437_v17, %v1441_v18  ;;  %v1146_v17 = vld [vmem:[#allocation19 + $0x538] sm:$0xff] }
 0x36f   :  { %4520 = vmatpush2.bf16.msra.mxu0 %v5901_v34  ;;  %v1305_v27 = vld [vmem:[#allocation19 + $0xa30] sm:$0xff]  ;;  %v1038_v34 = vld [vmem:[#allocation19 + $0x1d8] sm:$0xff] }
 0x370   :  { %4561 = vmatpush2.bf16.msra.mxu1 %v6029_v35  ;;  %4521 = vmatprep.subr.bf16.mxu0 %v5894_v38  ;;  %v1429_v29 = vld [vmem:[#allocation19 + $0xe10] sm:$0xff]  ;;  %v5846_v32 = vcombine.high %v1301_v26, %v1305_v27  ;;  %v1042_v35 = vld [vmem:[#allocation19 + $0x1f8] sm:$0xff]  ;;  %v5845_v40 = vcombine.low %v1301_v26, %v1305_v27  ;;  %v5688_v26 = vcombine.high %v1142_v16, %v1146_v17 }
 0x371   :  { %4562 = vmatprep.subr.bf16.mxu1 %v6022_v39  ;;  %v1433_v30 = vld [vmem:[#allocation19 + $0xe30] sm:$0xff]  ;;  %v1166_v38 = vld [vmem:[#allocation19 + $0x5d8] sm:$0xff]  ;;  %v5584_v57 = vcombine.high %v1038_v34, %v1042_v35  ;;  %v5583_v53 = vcombine.low %v1038_v34, %v1042_v35 }
 0x372   :  { %v5974_v33 = vcombine.high %v1429_v29, %v1433_v30  ;;  %v1170_v39 = vld [vmem:[#allocation19 + $0x5f8] sm:$0xff]  ;;  %v5973_v44 = vcombine.low %v1429_v29, %v1433_v30 }
 0x373   :  { %4522 = vmatpush2.bf16.msra.mxu0 %v5893_v45  ;;  %v5712_v45 = vcombine.high %v1166_v38, %v1170_v39  ;;  %v1006_v27 = vld [vmem:[#allocation19 + $0xd8] sm:$0xff] }
 0x374   :  { %4563 = vmatpush2.bf16.msra.mxu1 %v6021_v46  ;;  %4523 = vmatprep.subr.bf16.mxu0 %v5886_v47  ;;  %v1507_v46 = vsub.s32 3, %v6845_v3  ;;  %v1030_v47 = vld [vmem:[#allocation19 + $0x198] sm:$0xff] }
 0x375   :  { %4564 = vmatprep.subr.bf16.mxu1 %v6014_v48  ;;  %v1034_v48 = vld [vmem:[#allocation19 + $0x1b8] sm:$0xff] }
 0x376   :  { %v1010_v29 = vld [vmem:[#allocation19 + $0xf8] sm:$0xff] }
 0x377   :  { %4524 = vmatpush2.bf16.msra.mxu0 %v5885_v55  ;;  %v5711_v55 = vcombine.low %v1166_v38, %v1170_v39  ;;  %v1134_v30 = vld [vmem:[#allocation19 + $0x4d8] sm:$0xff]  ;;  %v5551_v43 = vcombine.low %v1006_v27, %v1010_v29 }
 0x378   :  { %4565 = vmatpush2.bf16.msra.mxu1 %v6013_v24  ;;  %4525 = vmatprep.subr.bf16.mxu0 %v5878_v36  ;;  %v1508_v24 = vrot.slane %v6848_v19, %v1507_v46  ;;  %v5576_v36 = vcombine.high %v1030_v47, %v1034_v48  ;;  %v5703_v19 = vcombine.low %v1158_v54, %v1162_v23  ;;  %v998_v35 = vld [vmem:[#allocation19 + $0x98] sm:$0xff] }
 0x379   :  { %4566 = vmatprep.subr.bf16.mxu1 %v6006_v56  ;;  %v1022_v56 = vld [vmem:[#allocation19 + $0x158] sm:$0xff] }
 0x37a   :  { %v5568_v4 = vcombine.high %v1022_v56, %v1026_v58  ;;  %v1002_v38 = vld [vmem:[#allocation19 + $0xb8] sm:$0xff] }
 0x37b   :  { %4526 = vmatpush2.bf16.msra.mxu0 %v5877_v62  ;;  %v1154_v62 = vld [vmem:[#allocation19 + $0x578] sm:$0xff] }
 0x37c   :  { %4567 = vmatpush2.bf16.msra.mxu1 %v6005_v63  ;;  %4527 = vmatprep.subr.bf16.mxu0 %v5870_v0  ;;  %v1126_v39 = vld [vmem:[#allocation19 + $0x498] sm:$0xff] }
 0x37d   :  { %4568 = vmatprep.subr.bf16.mxu1 %v5998_v1  ;;  %v5575_v1 = vcombine.low %v1030_v47, %v1034_v48  ;;  %v990_v46 = vld [vmem:[#allocation19 + $0x58] sm:$0xff] }
 0x37e   :  { %v994_v47 = vld [vmem:[#allocation19 + $0x78] sm:$0xff] }
 0x37f   :  { %4528 = vmatpush2.bf16.msra.mxu0 %v5869_v7  ;;  %v1118_v48 = vld [vmem:[#allocation19 + $0x458] sm:$0xff]  ;;  %v5536_v23 = vcombine.high %v990_v46, %v994_v47 }
 0x380   :  { %4569 = vmatpush2.bf16.msra.mxu1 %v5997_v8  ;;  %4529 = vmatprep.subr.bf16.mxu0 %v5862_v9  ;;  %v5696_v8 = vcombine.high %v1150_v61, %v1154_v62  ;;  %v1014_v9 = vld [vmem:[#allocation19 + $0x118] sm:$0xff] }
 0x381   :  { %4570 = vmatprep.subr.bf16.mxu1 %v5990_v10  ;;  %v1018_v10 = vld [vmem:[#allocation19 + $0x138] sm:$0xff] }
 0x383   :  { %4530 = vmatpush2.bf16.msra.mxu0 %v5861_v20  ;;  %v5567_v20 = vcombine.low %v1022_v56, %v1026_v58  ;;  %v1110_v56 = vld [vmem:[#allocation19 + $0x418] sm:$0xff] }
 0x384   :  { %4571 = vmatpush2.bf16.msra.mxu1 %v5989_v21  ;;  %4531 = vmatprep.subr.bf16.mxu0 %v5854_v22  ;;  %v5695_v22 = vcombine.low %v1150_v61, %v1154_v62  ;;  %v1114_v58 = vld [vmem:[#allocation19 + $0x438] sm:$0xff] }
 0x385   :  { %4572 = vmatprep.subr.bf16.mxu1 %v5982_v25  ;;  %v5656_v62 = vcombine.high %v1110_v56, %v1114_v58 }
 0x387   :  { %4532 = vmatpush2.bf16.msra.mxu0 %v5853_v49  ;;  %v1138_v49 = vld [vmem:[#allocation19 + $0x4f8] sm:$0xff] }
 0x388   :  { %4573 = vmatpush2.bf16.msra.mxu1 %v5981_v31  ;;  %4533 = vmatprep.subr.bf16.mxu0 %v5846_v32  ;;  %v5559_v31 = vcombine.low %v1014_v9, %v1018_v10  ;;  %v5687_v32 = vcombine.low %v1142_v16, %v1146_v17  ;;  %v5680_v34 = vcombine.high %v1134_v30, %v1138_v49 }
 0x389   :  { %4574 = vmatprep.subr.bf16.mxu1 %v5974_v33  ;;  %v5552_v33 = vcombine.high %v1006_v27, %v1010_v29 }
 0x38b   :  { %4534 = vmatpush2.bf16.msra.mxu0 %v5845_v40  ;;  %v1130_v40 = vld [vmem:[#allocation19 + $0x4b8] sm:$0xff] }
 0x38c   :  { %4575 = vmatpush2.bf16.msra.mxu1 %v5973_v44  ;;  %4585 = vmatprep.subr.bf16.mxu0 %v5584_v57  ;;  %v5679_v44 = vcombine.low %v1134_v30, %v1138_v49  ;;  %v5544_v57 = vcombine.high %v998_v35, %v1002_v38  ;;  %v5671_v54 = vcombine.low %v1126_v39, %v1130_v40  ;;  %v1078_v49 = vld [vmem:[#allocation19 + $0x318] sm:$0xff] }
 0x38d   :  { %4626 = vmatprep.subr.bf16.mxu1 %v5712_v45  ;;  %v5672_v45 = vcombine.high %v1126_v39, %v1130_v40  ;;  %v1070_v40 = vld [vmem:[#allocation19 + $0x2d8] sm:$0xff] }
 0x38e   :  { %v4291_v59 = vpop.f32.mrf.mxu0  ;;  %4536 = vmatmul.mubr.bf16.vlgmr.msra.gmra.mxu0 %v6833_v51 }
 0x38f   :  { %v4292_v63 = vadd.f32 %v4291_v59, %v1504_v50  ;;  %v4332_v0 = vpop.f32.mrf.mxu1  ;;  %4577 = vmatmul.mubr.bf16.vlgmr.msra.gmra.mxu1 %v6835_v52  ;;  %4586 = vmatpush1.bf16.msra.mxu0 %v5583_v53  ;;  %v1122_v50 = vld [vmem:[#allocation19 + $0x478] sm:$0xff]  ;;  %v5543_v53 = vcombine.low %v998_v35, %v1002_v38  ;;  %v5535_v59 = vcombine.low %v990_v46, %v994_v47 }
 0x390   :  { %4617 = vmatprep.mubr.bf16.mxu0 %v6807_v11  ;;  %4627 = vmatpush1.bf16.msra.mxu1 %v5711_v55  ;;  %v4293_v2 = vpop.f32.mrf.mxu0  ;;  %v5664_v55 = vcombine.high %v1118_v48, %v1122_v50 }
 0x391   :  { %v6878_v5 = vadd.f32 %v4332_v0, %v4292_v63  ;;  %4658 = vmatprep.mubr.bf16.mxu1 %v6809_v12  ;;  %v4294_v6 = vadd.f32 %v4293_v2, %v1508_v24  ;;  %v4334_v7 = vpop.f32.mrf.mxu1  ;;  %4587 = vmatprep.subr.bf16.mxu0 %v5576_v36  ;;  %v5560_v12 = vcombine.high %v1014_v9, %v1018_v10  ;;  %v982_v24 = vld [vmem:[#allocation19 + $0x18] sm:$0xff] }
 0x392   :  { %v4295_v15 = vpop.f32.mrf.mxu0  ;;  %4628 = vmatprep.subr.bf16.mxu1 %v5704_v60  ;;  %v986_v36 = vld [vmem:[#allocation19 + $0x38] sm:$0xff]  ;;  %v5663_v60 = vcombine.low %v1118_v48, %v1122_v50 }
 0x393   :  { %v6881_v18 = vadd.f32 %v4334_v7, %v4294_v6  ;;  %v4336_v11 = vpop.f32.mrf.mxu1  ;;  %4588 = vmatpush1.bf16.msra.mxu0 %v5575_v1  ;;  %v5528_v61 = vcombine.high %v982_v24, %v986_v36  ;;  %v1102_v63 = vld [vmem:[#allocation19 + $0x3d8] sm:$0xff] }
 0x394   :  { %4629 = vmatpush1.bf16.msra.mxu1 %v5703_v19  ;;  %v4296_v21 = vpop.f32.mrf.mxu0  ;;  %4589 = vmatprep.subr.bf16.mxu0 %v5568_v4  ;;  %v1106_v0 = vld [vmem:[#allocation19 + $0x3f8] sm:$0xff]  ;;  %v5527_v19 = vcombine.low %v982_v24, %v986_v36  ;;  %v5655_v4 = vcombine.low %v1110_v56, %v1114_v58 }
 0x395   :  { %v4337_v25 = vpop.f32.mrf.mxu1  ;;  %4630 = vmatprep.subr.bf16.mxu1 %v5696_v8  ;;  %v1230_v1 = vld [vmem:[#allocation19 + $0x7d8] sm:$0xff]  ;;  %v5648_v6 = vcombine.high %v1102_v63, %v1106_v0  ;;  %v5647_v16 = vcombine.low %v1102_v63, %v1106_v0 }
 0x396   :  { %v1234_v2 = vld [vmem:[#allocation19 + $0x7f8] sm:$0xff] }
 0x397   :  { %4590 = vmatpush1.bf16.msra.mxu0 %v5567_v20  ;;  %v5776_v7 = vcombine.high %v1230_v1, %v1234_v2  ;;  %v1094_v8 = vld [vmem:[#allocation19 + $0x398] sm:$0xff]  ;;  %v5775_v17 = vcombine.low %v1230_v1, %v1234_v2 }
 0x398   :  { %4631 = vmatpush1.bf16.msra.mxu1 %v5695_v22  ;;  %4591 = vmatprep.subr.bf16.mxu0 %v5560_v12  ;;  %v1098_v9 = vld [vmem:[#allocation19 + $0x3b8] sm:$0xff] }
 0x399   :  { %4632 = vmatprep.subr.bf16.mxu1 %v5688_v26  ;;  %v1222_v10 = vld [vmem:[#allocation19 + $0x798] sm:$0xff]  ;;  %v5640_v11 = vcombine.high %v1094_v8, %v1098_v9  ;;  %v5639_v26 = vcombine.low %v1094_v8, %v1098_v9 }
 0x39a   :  { %v1226_v15 = vld [vmem:[#allocation19 + $0x7b8] sm:$0xff] }
 0x39b   :  { %4592 = vmatpush1.bf16.msra.mxu0 %v5559_v31  ;;  %v5768_v20 = vcombine.high %v1222_v10, %v1226_v15  ;;  %v1086_v21 = vld [vmem:[#allocation19 + $0x358] sm:$0xff]  ;;  %v5767_v27 = vcombine.low %v1222_v10, %v1226_v15 }
 0x39c   :  { %4633 = vmatpush1.bf16.msra.mxu1 %v5687_v32  ;;  %4593 = vmatprep.subr.bf16.mxu0 %v5552_v33  ;;  %v1090_v22 = vld [vmem:[#allocation19 + $0x378] sm:$0xff] }
 0x39d   :  { %4634 = vmatprep.subr.bf16.mxu1 %v5680_v34  ;;  %v1214_v12 = vld [vmem:[#allocation19 + $0x758] sm:$0xff]  ;;  %v5632_v29 = vcombine.high %v1086_v21, %v1090_v22  ;;  %v5631_v34 = vcombine.low %v1086_v21, %v1090_v22 }
 0x39e   :  { %v1218_v25 = vld [vmem:[#allocation19 + $0x778] sm:$0xff] }
 0x39f   :  { %4594 = vmatpush1.bf16.msra.mxu0 %v5551_v43  ;;  %v5760_v30 = vcombine.high %v1214_v12, %v1218_v25  ;;  %v1082_v31 = vld [vmem:[#allocation19 + $0x338] sm:$0xff]  ;;  %v5759_v35 = vcombine.low %v1214_v12, %v1218_v25 }
 0x3a0   :  { %4635 = vmatpush1.bf16.msra.mxu1 %v5679_v44  ;;  %4595 = vmatprep.subr.bf16.mxu0 %v5544_v57  ;;  %v1206_v32 = vld [vmem:[#allocation19 + $0x718] sm:$0xff]  ;;  %v5624_v38 = vcombine.high %v1078_v49, %v1082_v31 }
 0x3a1   :  { %4636 = vmatprep.subr.bf16.mxu1 %v5672_v45  ;;  %v1210_v33 = vld [vmem:[#allocation19 + $0x738] sm:$0xff]  ;;  %v5623_v45 = vcombine.low %v1078_v49, %v1082_v31 }
 0x3a2   :  { %v5752_v39 = vcombine.high %v1206_v32, %v1210_v33  ;;  %v1074_v43 = vld [vmem:[#allocation19 + $0x2f8] sm:$0xff]  ;;  %v5751_v46 = vcombine.low %v1206_v32, %v1210_v33 }
 0x3a3   :  { %4596 = vmatpush1.bf16.msra.mxu0 %v5543_v53  ;;  %v1198_v44 = vld [vmem:[#allocation19 + $0x6d8] sm:$0xff]  ;;  %v5616_v47 = vcombine.high %v1070_v40, %v1074_v43 }
 0x3a4   :  { %4637 = vmatpush1.bf16.msra.mxu1 %v5671_v54  ;;  %4597 = vmatprep.subr.bf16.mxu0 %v5536_v23  ;;  %v1202_v57 = vld [vmem:[#allocation19 + $0x6f8] sm:$0xff] }
 0x3a5   :  { %4638 = vmatprep.subr.bf16.mxu1 %v5664_v55  ;;  %v5744_v48 = vcombine.high %v1198_v44, %v1202_v57  ;;  %v1062_v50 = vld [vmem:[#allocation19 + $0x298] sm:$0xff]  ;;  %v5615_v55 = vcombine.low %v1070_v40, %v1074_v43  ;;  %v5743_v24 = vcombine.low %v1198_v44, %v1202_v57 }
 0x3a6   :  { %v1066_v53 = vld [vmem:[#allocation19 + $0x2b8] sm:$0xff] }
 0x3a7   :  { %4598 = vmatpush1.bf16.msra.mxu0 %v5535_v59  ;;  %v1190_v54 = vld [vmem:[#allocation19 + $0x698] sm:$0xff]  ;;  %v5608_v36 = vcombine.high %v1062_v50, %v1066_v53 }
 0x3a8   :  { %4639 = vmatpush1.bf16.msra.mxu1 %v5663_v60  ;;  %4599 = vmatprep.subr.bf16.mxu0 %v5528_v61  ;;  %v1194_v23 = vld [vmem:[#allocation19 + $0x6b8] sm:$0xff] }
 0x3a9   :  { %4640 = vmatprep.subr.bf16.mxu1 %v5656_v62  ;;  %v5736_v56 = vcombine.high %v1190_v54, %v1194_v23  ;;  %v1054_v58 = vld [vmem:[#allocation19 + $0x258] sm:$0xff]  ;;  %v5607_v62 = vcombine.low %v1062_v50, %v1066_v53  ;;  %v5735_v63 = vcombine.low %v1190_v54, %v1194_v23 }
 0x3aa   :  { %v1058_v59 = vld [vmem:[#allocation19 + $0x278] sm:$0xff] }
 0x3ab   :  { %4600 = vmatpush1.bf16.msra.mxu0 %v5527_v19  ;;  %v1182_v60 = vld [vmem:[#allocation19 + $0x658] sm:$0xff]  ;;  %v5600_v0 = vcombine.high %v1054_v58, %v1058_v59 }
 0x3ac   :  { %4641 = vmatpush1.bf16.msra.mxu1 %v5655_v4  ;;  %4601 = vmatprep.subr.bf16.mxu0 %v5648_v6  ;;  %v1186_v61 = vld [vmem:[#allocation19 + $0x678] sm:$0xff] }
 0x3ad   :  { %4642 = vmatprep.subr.bf16.mxu1 %v5776_v7  ;;  %v5728_v1 = vcombine.high %v1182_v60, %v1186_v61  ;;  %v1046_v2 = vld [vmem:[#allocation19 + $0x218] sm:$0xff]  ;;  %v5599_v7 = vcombine.low %v1054_v58, %v1058_v59  ;;  %v5727_v8 = vcombine.low %v1182_v60, %v1186_v61 }
 0x3ae   :  { %v1050_v19 = vld [vmem:[#allocation19 + $0x238] sm:$0xff] }
 0x3af   :  { %4602 = vmatpush2.bf16.msra.mxu0 %v5647_v16  ;;  %v1174_v4 = vld [vmem:[#allocation19 + $0x618] sm:$0xff]  ;;  %v5592_v9 = vcombine.high %v1046_v2, %v1050_v19 }
 0x3b0   :  { %4643 = vmatpush2.bf16.msra.mxu1 %v5775_v17  ;;  %4603 = vmatprep.subr.bf16.mxu0 %v5640_v11  ;;  %v1178_v6 = vld [vmem:[#allocation19 + $0x638] sm:$0xff] }
 0x3b1   :  { %4644 = vmatprep.subr.bf16.mxu1 %v5768_v20  ;;  %v5720_v10 = vcombine.high %v1174_v4, %v1178_v6  ;;  %v1294_v15 = vld [vmem:[#allocation19 + $0x9d8] sm:$0xff]  ;;  %v5591_v20 = vcombine.low %v1046_v2, %v1050_v19  ;;  %v5719_v21 = vcombine.low %v1174_v4, %v1178_v6 }
 0x3b2   :  { %v1298_v16 = vld [vmem:[#allocation19 + $0x9f8] sm:$0xff] }
 0x3b3   :  { %4604 = vmatpush2.bf16.msra.mxu0 %v5639_v26  ;;  %v1422_v17 = vld [vmem:[#allocation19 + $0xdd8] sm:$0xff]  ;;  %v5840_v22 = vcombine.high %v1294_v15, %v1298_v16 }
 0x3b4   :  { %4645 = vmatpush2.bf16.msra.mxu1 %v5767_v27  ;;  %4605 = vmatprep.subr.bf16.mxu0 %v5632_v29  ;;  %v1426_v11 = vld [vmem:[#allocation19 + $0xdf8] sm:$0xff]  ;;  %v5839_v27 = vcombine.low %v1294_v15, %v1298_v16 }
 0x3b5   :  { %4646 = vmatprep.subr.bf16.mxu1 %v5760_v30  ;;  %v5968_v12 = vcombine.high %v1422_v17, %v1426_v11  ;;  %v1286_v25 = vld [vmem:[#allocation19 + $0x998] sm:$0xff]  ;;  %v5967_v49 = vcombine.low %v1422_v17, %v1426_v11 }
 0x3b6   :  { %v1290_v26 = vld [vmem:[#allocation19 + $0x9b8] sm:$0xff] }
 0x3b7   :  { %4606 = vmatpush2.bf16.msra.mxu0 %v5631_v34  ;;  %v1414_v29 = vld [vmem:[#allocation19 + $0xd98] sm:$0xff]  ;;  %v5832_v31 = vcombine.high %v1286_v25, %v1290_v26  ;;  %v5831_v44 = vcombine.low %v1286_v25, %v1290_v26 }
 0x3b8   :  { %4647 = vmatpush2.bf16.msra.mxu1 %v5759_v35  ;;  %4607 = vmatprep.subr.bf16.mxu0 %v5624_v38  ;;  %v1418_v30 = vld [vmem:[#allocation19 + $0xdb8] sm:$0xff] }
 0x3b9   :  { %4648 = vmatprep.subr.bf16.mxu1 %v5752_v39  ;;  %v1278_v32 = vld [vmem:[#allocation19 + $0x958] sm:$0xff]  ;;  %v5960_v35 = vcombine.high %v1414_v29, %v1418_v30 }
 0x3ba   :  { %v1282_v33 = vld [vmem:[#allocation19 + $0x978] sm:$0xff] }
 0x3bb   :  { %4608 = vmatpush2.bf16.msra.mxu0 %v5623_v45  ;;  %v1406_v38 = vld [vmem:[#allocation19 + $0xd58] sm:$0xff]  ;;  %v5959_v45 = vcombine.low %v1414_v29, %v1418_v30  ;;  %v5823_v23 = vcombine.low %v1278_v32, %v1282_v33 }
 0x3bc   :  { %4649 = vmatpush2.bf16.msra.mxu1 %v5751_v46  ;;  %4609 = vmatprep.subr.bf16.mxu0 %v5616_v47  ;;  %v1410_v39 = vld [vmem:[#allocation19 + $0xd78] sm:$0xff]  ;;  %v5824_v46 = vcombine.high %v1278_v32, %v1282_v33 }
 0x3bd   :  { %4650 = vmatprep.subr.bf16.mxu1 %v5744_v48  ;;  %v1270_v48 = vld [vmem:[#allocation19 + $0x918] sm:$0xff] }
 0x3be   :  { %v1274_v50 = vld [vmem:[#allocation19 + $0x938] sm:$0xff] }
 0x3bf   :  { %4610 = vmatpush2.bf16.msra.mxu0 %v5615_v55  ;;  %v1398_v53 = vld [vmem:[#allocation19 + $0xd18] sm:$0xff] }
 0x3c0   :  { %4651 = vmatpush2.bf16.msra.mxu1 %v5743_v24  ;;  %4611 = vmatprep.subr.bf16.mxu0 %v5608_v36  ;;  %v1402_v54 = vld [vmem:[#allocation19 + $0xd38] sm:$0xff]  ;;  %v5951_v24 = vcombine.low %v1406_v38, %v1410_v39  ;;  %v5816_v36 = vcombine.high %v1270_v48, %v1274_v50 }
 0x3c1   :  { %4652 = vmatprep.subr.bf16.mxu1 %v5736_v56  ;;  %v1262_v58 = vld [vmem:[#allocation19 + $0x8d8] sm:$0xff] }
 0x3c2   :  { %v1266_v59 = vld [vmem:[#allocation19 + $0x8f8] sm:$0xff] }
 0x3c3   :  { %4612 = vmatpush2.bf16.msra.mxu0 %v5607_v62  ;;  %v1390_v60 = vld [vmem:[#allocation19 + $0xcd8] sm:$0xff]  ;;  %v5815_v62 = vcombine.low %v1270_v48, %v1274_v50 }
 0x3c4   :  { %4653 = vmatpush2.bf16.msra.mxu1 %v5735_v63  ;;  %4613 = vmatprep.subr.bf16.mxu0 %v5600_v0  ;;  %v1394_v61 = vld [vmem:[#allocation19 + $0xcf8] sm:$0xff]  ;;  %v5943_v63 = vcombine.low %v1398_v53, %v1402_v54  ;;  %v5808_v0 = vcombine.high %v1262_v58, %v1266_v59 }
 0x3c5   :  { %4654 = vmatprep.subr.bf16.mxu1 %v5728_v1  ;;  %v5936_v1 = vcombine.high %v1390_v60, %v1394_v61  ;;  %v1254_v2 = vld [vmem:[#allocation19 + $0x898] sm:$0xff] }
 0x3c6   :  { %v1258_v19 = vld [vmem:[#allocation19 + $0x8b8] sm:$0xff] }
 0x3c7   :  { %4614 = vmatpush2.bf16.msra.mxu0 %v5599_v7  ;;  %v1382_v4 = vld [vmem:[#allocation19 + $0xc98] sm:$0xff]  ;;  %v5807_v7 = vcombine.low %v1262_v58, %v1266_v59 }
 0x3c8   :  { %4655 = vmatpush2.bf16.msra.mxu1 %v5727_v8  ;;  %4615 = vmatprep.subr.bf16.mxu0 %v5592_v9  ;;  %v1386_v6 = vld [vmem:[#allocation19 + $0xcb8] sm:$0xff]  ;;  %v5935_v8 = vcombine.low %v1390_v60, %v1394_v61  ;;  %v5800_v9 = vcombine.high %v1254_v2, %v1258_v19 }
 0x3c9   :  { %4656 = vmatprep.subr.bf16.mxu1 %v5720_v10  ;;  %v5928_v10 = vcombine.high %v1382_v4, %v1386_v6  ;;  %v1246_v15 = vld [vmem:[#allocation19 + $0x858] sm:$0xff] }
 0x3ca   :  { %v1250_v16 = vld [vmem:[#allocation19 + $0x878] sm:$0xff] }
 0x3cb   :  { %4616 = vmatpush2.bf16.msra.mxu0 %v5591_v20  ;;  %v1374_v17 = vld [vmem:[#allocation19 + $0xc58] sm:$0xff]  ;;  %v5799_v20 = vcombine.low %v1254_v2, %v1258_v19  ;;  %v5791_v30 = vcombine.low %v1246_v15, %v1250_v16 }
 0x3cc   :  { %4657 = vmatpush2.bf16.msra.mxu1 %v5719_v21  ;;  %4667 = vmatprep.subr.bf16.mxu0 %v5840_v22  ;;  %v1378_v11 = vld [vmem:[#allocation19 + $0xc78] sm:$0xff]  ;;  %v5927_v21 = vcombine.low %v1382_v4, %v1386_v6  ;;  %v5792_v22 = vcombine.high %v1246_v15, %v1250_v16 }
 0x3cd   :  { %4708 = vmatprep.subr.bf16.mxu1 %v5968_v12  ;;  %v5920_v12 = vcombine.high %v1374_v17, %v1378_v11  ;;  %v1238_v25 = vld [vmem:[#allocation19 + $0x818] sm:$0xff] }
 0x3ce   :  { %v4373_v34 = vpop.f32.mrf.mxu0  ;;  %4618 = vmatmul.mubr.bf16.vlgmr.msra.gmra.mxu0 %v6811_v13  ;;  %v1242_v26 = vld [vmem:[#allocation19 + $0x838] sm:$0xff] }
 0x3cf   :  { %v4374_v40 = vadd.f32 %v4373_v34, %v6878_v5  ;;  %v4414_v43 = vpop.f32.mrf.mxu1  ;;  %4659 = vmatmul.mubr.bf16.vlgmr.msra.gmra.mxu1 %v6813_v14  ;;  %4668 = vmatpush1.bf16.msra.mxu0 %v5839_v27  ;;  %v5952_v5 = vcombine.high %v1406_v38, %v1410_v39  ;;  %v1366_v27 = vld [vmem:[#allocation19 + $0xc18] sm:$0xff]  ;;  %v5783_v39 = vcombine.low %v1238_v25, %v1242_v26 }
 0x3d0   :  { %4699 = vmatprep.mubr.bf16.mxu0 %v6823_v41  ;;  %4709 = vmatpush1.bf16.msra.mxu1 %v5967_v49  ;;  %v6887_v57 = vpop.f32.mrf.mxu0  ;;  %v1370_v29 = vld [vmem:[#allocation19 + $0xc38] sm:$0xff]  ;;  %v5919_v49 = vcombine.low %v1374_v17, %v1378_v11 }
 0x3d1   :  { %v6889_v47 = vadd.f32 %v4414_v43, %v4374_v40  ;;  %4740 = vmatprep.mubr.bf16.mxu1 %v6825_v42  ;;  %v6892_v13 = vpop.f32.mrf.mxu1  ;;  %4669 = vmatprep.subr.bf16.mxu0 %v5832_v31  ;;  %v5944_v42 = vcombine.high %v1398_v53, %v1402_v54  ;;  %v5784_v31 = vcombine.high %v1238_v25, %v1242_v26  ;;  %v1358_v33 = vld [vmem:[#allocation19 + $0xbd8] sm:$0xff] }
 0x3d2   :  { %v4377_v14 = vpop.f32.mrf.mxu0  ;;  %4710 = vmatprep.subr.bf16.mxu1 %v5960_v35  ;;  %v5912_v32 = vcombine.high %v1366_v27, %v1370_v29  ;;  %v1362_v34 = vld [vmem:[#allocation19 + $0xbf8] sm:$0xff]  ;;  %v5911_v40 = vcombine.low %v1366_v27, %v1370_v29 }
 0x3d3   :  { %v4418_v41 = vpop.f32.mrf.mxu1  ;;  %4670 = vmatpush1.bf16.msra.mxu0 %v5831_v44  ;;  %v1486_v35 = vld [vmem:[#allocation19 + $0xfd8] sm:$0xff]  ;;  %v5904_v43 = vcombine.high %v1358_v33, %v1362_v34  ;;  %v5903_v50 = vcombine.low %v1358_v33, %v1362_v34 }
 0x3d4   :  { %4711 = vmatpush1.bf16.msra.mxu1 %v5959_v45  ;;  %v4378_v55 = vpop.f32.mrf.mxu0  ;;  %4671 = vmatprep.subr.bf16.mxu0 %v5824_v46  ;;  %v1490_v38 = vld [vmem:[#allocation19 + $0xff8] sm:$0xff] }
 0x3d5   :  { %v4419_v56 = vpop.f32.mrf.mxu1  ;;  %4712 = vmatprep.subr.bf16.mxu1 %v5952_v5  ;;  %v6032_v44 = vcombine.high %v1486_v35, %v1490_v38  ;;  %v1350_v45 = vld [vmem:[#allocation19 + $0xb98] sm:$0xff]  ;;  %v6031_v14 = vcombine.low %v1486_v35, %v1490_v38 }
 0x3d6   :  { %v1354_v46 = vld [vmem:[#allocation19 + $0xbb8] sm:$0xff] }
 0x3d7   :  { %4672 = vmatpush1.bf16.msra.mxu0 %v5823_v23  ;;  %v1478_v5 = vld [vmem:[#allocation19 + $0xf98] sm:$0xff]  ;;  %v5896_v53 = vcombine.high %v1350_v45, %v1354_v46 }
 0x3d8   :  { %4713 = vmatpush1.bf16.msra.mxu1 %v5951_v24  ;;  %4673 = vmatprep.subr.bf16.mxu0 %v5816_v36  ;;  %v1482_v48 = vld [vmem:[#allocation19 + $0xfb8] sm:$0xff]  ;;  %v5895_v36 = vcombine.low %v1350_v45, %v1354_v46 }
 0x3d9   :  { %4714 = vmatprep.subr.bf16.mxu1 %v5944_v42  ;;  %v6024_v54 = vcombine.high %v1478_v5, %v1482_v48  ;;  %v1342_v41 = vld [vmem:[#allocation19 + $0xb58] sm:$0xff]  ;;  %v6023_v56 = vcombine.low %v1478_v5, %v1482_v48 }
 0x3da   :  { %v1346_v23 = vld [vmem:[#allocation19 + $0xb78] sm:$0xff] }
 0x3db   :  { %4674 = vmatpush1.bf16.msra.mxu0 %v5815_v62  ;;  %v1470_v55 = vld [vmem:[#allocation19 + $0xf58] sm:$0xff]  ;;  %v5888_v42 = vcombine.high %v1342_v41, %v1346_v23 }
 0x3dc   :  { %4715 = vmatpush1.bf16.msra.mxu1 %v5943_v63  ;;  %4675 = vmatprep.subr.bf16.mxu0 %v5808_v0  ;;  %v1474_v24 = vld [vmem:[#allocation19 + $0xf78] sm:$0xff]  ;;  %v5887_v63 = vcombine.low %v1342_v41, %v1346_v23  ;;  %v6258_v41 = vld [vmem:[%s7126_s13 + $0x70] sm:$0xff]  }
 0x3dd   :  { %4716 = vmatprep.subr.bf16.mxu1 %v5936_v1  ;;  %v6016_v58 = vcombine.high %v1470_v55, %v1474_v24  ;;  %v1334_v59 = vld [vmem:[#allocation19 + $0xb18] sm:$0xff]  ;;  %v6015_v0 = vcombine.low %v1470_v55, %v1474_v24 }
 0x3de   :  { %v1338_v60 = vld [vmem:[#allocation19 + $0xb38] sm:$0xff] }
 0x3df   :  { %4676 = vmatpush1.bf16.msra.mxu0 %v5807_v7  ;;  %v1462_v61 = vld [vmem:[#allocation19 + $0xf18] sm:$0xff]  ;;  %v5880_v1 = vcombine.high %v1334_v59, %v1338_v60 }
 0x3e0   :  { %4717 = vmatpush1.bf16.msra.mxu1 %v5935_v8  ;;  %4677 = vmatprep.subr.bf16.mxu0 %v5800_v9  ;;  %v1466_v62 = vld [vmem:[#allocation19 + $0xf38] sm:$0xff]  ;;  %v5879_v8 = vcombine.low %v1334_v59, %v1338_v60 }
 0x3e1   :  { %4718 = vmatprep.subr.bf16.mxu1 %v5928_v10  ;;  %v6008_v2 = vcombine.high %v1462_v61, %v1466_v62  ;;  %v1326_v19 = vld [vmem:[#allocation19 + $0xad8] sm:$0xff]  ;;  %v6007_v9 = vcombine.low %v1462_v61, %v1466_v62 }
 0x3e2   :  { %v1330_v4 = vld [vmem:[#allocation19 + $0xaf8] sm:$0xff] }
 0x3e3   :  { %4678 = vmatpush1.bf16.msra.mxu0 %v5799_v20  ;;  %v1454_v6 = vld [vmem:[#allocation19 + $0xed8] sm:$0xff]  ;;  %v5872_v10 = vcombine.high %v1326_v19, %v1330_v4 }
 0x3e4   :  { %4719 = vmatpush1.bf16.msra.mxu1 %v5927_v21  ;;  %4679 = vmatprep.subr.bf16.mxu0 %v5792_v22  ;;  %v1458_v7 = vld [vmem:[#allocation19 + $0xef8] sm:$0xff]  ;;  %v5871_v21 = vcombine.low %v1326_v19, %v1330_v4 }
 0x3e5   :  { %4720 = vmatprep.subr.bf16.mxu1 %v5920_v12  ;;  %v6000_v15 = vcombine.high %v1454_v6, %v1458_v7  ;;  %v1318_v16 = vld [vmem:[#allocation19 + $0xa98] sm:$0xff]  ;;  %v5999_v22 = vcombine.low %v1454_v6, %v1458_v7  ;;  %v6270_v7 = vld [vmem:[%s7126_s13 + $0x58] sm:$0xff]  }
 0x3e6   :  { %v1322_v17 = vld [vmem:[#allocation19 + $0xab8] sm:$0xff] }
 0x3e7   :  { %4680 = vmatpush1.bf16.msra.mxu0 %v5791_v30  ;;  %v1446_v11 = vld [vmem:[#allocation19 + $0xe98] sm:$0xff]  ;;  %v5864_v12 = vcombine.high %v1318_v16, %v1322_v17 }
 0x3e8   :  { %4721 = vmatpush1.bf16.msra.mxu1 %v5919_v49  ;;  %4681 = vmatprep.subr.bf16.mxu0 %v5784_v31  ;;  %v1450_v20 = vld [vmem:[#allocation19 + $0xeb8] sm:$0xff]  ;;  %v5863_v49 = vcombine.low %v1318_v16, %v1322_v17  ;;  %v6275_v16 = vld [vmem:[%s7126_s13 + $0xd0] sm:$0xff]  }
 0x3e9   :  { %4722 = vmatprep.subr.bf16.mxu1 %v5912_v32  ;;  %v5992_v25 = vcombine.high %v1446_v11, %v1450_v20  ;;  %v1310_v26 = vld [vmem:[#allocation19 + $0xa58] sm:$0xff]  ;;  %v5991_v31 = vcombine.low %v1446_v11, %v1450_v20  ;;  %v6276_v17 = vld [vmem:[%s7126_s13 + $0x10] sm:$0xff]  }
 0x3ea   :  { %v1314_v27 = vld [vmem:[#allocation19 + $0xa78] sm:$0xff]  ;;  %v6277_v11 = vld [vmem:[%s7126_s13 + $0x90] sm:$0xff]  }
 0x3eb   :  { %4682 = vmatpush1.bf16.msra.mxu0 %v5783_v39  ;;  %v1438_v29 = vld [vmem:[#allocation19 + $0xe58] sm:$0xff]  ;;  %v5856_v32 = vcombine.high %v1310_v26, %v1314_v27 }
 0x3ec   :  { %4723 = vmatpush1.bf16.msra.mxu1 %v5911_v40  ;;  %4683 = vmatprep.subr.bf16.mxu0 %v5904_v43  ;;  %v1442_v30 = vld [vmem:[#allocation19 + $0xe78] sm:$0xff]  ;;  %v4376_v40 = vadd.f32 %v6887_v57, %v6881_v18  ;;  %v5855_v43 = vcombine.low %v1310_v26, %v1314_v27  ;;  %v6255_v18 = vld [vmem:[%s7126_s13 + $0xf8] sm:$0xff]   ;;  %v4750_v57 = vmax.f32 %v6869_v37, 0.0  ;;  %v6259_v37 = vld [vmem:[%s7126_s13 + $0xf0] sm:$0xff]  }
 0x3ed   :  { %4724 = vmatprep.subr.bf16.mxu1 %v6032_v44  ;;  %v5984_v33 = vcombine.high %v1438_v29, %v1442_v30  ;;  %v1302_v34 = vld [vmem:[#allocation19 + $0xa18] sm:$0xff]  ;;  %v5983_v44 = vcombine.low %v1438_v29, %v1442_v30  ;;  %v4749_v29 = vmax.f32 %v6865_v28, 0.0  ;;  %v6287_v28 = vld [vmem:[%s7126_s13 + $0x138] sm:$0xff]  }
 0x3ee   :  { %v1306_v35 = vld [vmem:[#allocation19 + $0xa38] sm:$0xff]  ;;  %v4417_v5 = vadd.f32 %v6892_v13, %v4376_v40  ;;  %v6256_v13 = vld [vmem:[%s7126_s13 + $0x38] sm:$0xff]   ;;  %v4758_v23 = vpack.c.bf16 %v4750_v57, %v4750_v57 }
 0x3ef   :  { %4684 = vmatpush2.bf16.msra.mxu0 %v5903_v50  ;;  %v1430_v38 = vld [vmem:[#allocation19 + $0xe18] sm:$0xff]  ;;  %v5848_v45 = vcombine.high %v1302_v34, %v1306_v35  ;;  %v5847_v48 = vcombine.low %v1302_v34, %v1306_v35  ;;  %v6288_v34 = vld [vmem:[%s7126_s13 + $0x170] sm:$0xff]   ;;  %v6310_v57 = vld [vmem:[%s7126_s13 + $0x1d8] sm:$0xff]  }
 0x3f0   :  { %4725 = vmatpush2.bf16.msra.mxu1 %v6031_v14  ;;  %4685 = vmatprep.subr.bf16.mxu0 %v5896_v53  ;;  %v1434_v39 = vld [vmem:[#allocation19 + $0xe38] sm:$0xff]  ;;  %v6254_v14 = vld [vmem:[%s7126_s13 + $0x78] sm:$0xff]   ;;  %v4752_v53 = vmax.f32 %v4417_v5, 0.0 }
 0x3f1   :  { %4726 = vmatprep.subr.bf16.mxu1 %v6024_v54  ;;  %v5976_v46 = vcombine.high %v1430_v38, %v1434_v39  ;;  %v5975_v50 = vcombine.low %v1430_v38, %v1434_v39  ;;  %v6257_v54 = vld [vmem:[%s7126_s13 + $0xb8] sm:$0xff]   ;;  %v6264_v62 = vld [vmem:[%s7126_s13 + $0x28] sm:$0xff]   ;;  %v6267_v19 = vld [vmem:[%s7126_s13 + $0xe0] sm:$0xff]  }
 0x3f2   :  { %v4760_v24 = vpack.c.bf16 %v4752_v53, %v4752_v53  ;;  %v6268_v4 = vld [vmem:[%s7126_s13 + $0x20] sm:$0xff]   ;;  %v6278_v20 = vld [vmem:[%s7126_s13 + $0x48] sm:$0xff]   ;;  %v6304_v38 = vld [vmem:[%s7126_s13 + $0x1f0] sm:$0xff]  }
 0x3f3   :  { %4686 = vmatpush2.bf16.msra.mxu0 %v5895_v36  ;;  %v6269_v6 = vld [vmem:[%s7126_s13 + $0xa0] sm:$0xff]   ;;  %v6289_v39 = vld [vmem:[%s7126_s13 + $0x130] sm:$0xff]   ;;  %v6290_v40 = vld [vmem:[%s7126_s13 + $0x168] sm:$0xff]  }
 0x3f4   :  { %4727 = vmatpush2.bf16.msra.mxu1 %v6023_v56  ;;  %4687 = vmatprep.subr.bf16.mxu0 %v5888_v42  ;;  %v6260_v56 = vld [vmem:[%s7126_s13 + $0x30] sm:$0xff]   ;;  %v6283_v26 = vld [vmem:[%s7126_s13 + $0xc0] sm:$0xff]   ;;  %v6307_v5 = vld [vmem:[%s7126_s13 + $0x1a8] sm:$0xff]  }
 0x3f5   :  { %4728 = vmatprep.subr.bf16.mxu1 %v6016_v58  ;;  %v6262_v58 = vld [vmem:[%s7126_s13 + $0x68] sm:$0xff]   ;;  %v6284_v27 = vld [vmem:[%s7126_s13] sm:$0xff]   ;;  %v6295_v53 = vld [vmem:[%s7126_s13 + $0x118] sm:$0xff]  }
 0x3f6   :  { %v6285_v30 = vld [vmem:[%s7126_s13 + $0x80] sm:$0xff]  }
 0x3f7   :  { %4688 = vmatpush2.bf16.msra.mxu0 %v5887_v63 }
 0x3f8   :  { %4729 = vmatpush2.bf16.msra.mxu1 %v6015_v0  ;;  %4689 = vmatprep.subr.bf16.mxu0 %v5880_v1  ;;  %v6265_v0 = vld [vmem:[%s7126_s13 + $0xa8] sm:$0xff]   ;;  %v6266_v1 = vld [vmem:[%s7126_s13 + $0x60] sm:$0xff]  }
 0x3f9   :  { %4730 = vmatprep.subr.bf16.mxu1 %v6008_v2 }
 0x3fb   :  { %4690 = vmatpush2.bf16.msra.mxu0 %v5879_v8  ;;  %v6271_v8 = vld [vmem:[%s7126_s13 + $0xd8] sm:$0xff]  }
 0x3fc   :  { %4731 = vmatpush2.bf16.msra.mxu1 %v6007_v9  ;;  %4691 = vmatprep.subr.bf16.mxu0 %v5872_v10  ;;  %v6272_v9 = vld [vmem:[%s7126_s13 + $0x18] sm:$0xff]  }
 0x3fd   :  { %4732 = vmatprep.subr.bf16.mxu1 %v6000_v15  ;;  %v6273_v10 = vld [vmem:[%s7126_s13 + $0x98] sm:$0xff]   ;;  %v6274_v15 = vld [vmem:[%s7126_s13 + $0x50] sm:$0xff]  }
 0x3ff   :  { %4692 = vmatpush2.bf16.msra.mxu0 %v5871_v21  ;;  %v6279_v21 = vld [vmem:[%s7126_s13 + $0xc8] sm:$0xff]  }
 0x400   :  { %4733 = vmatpush2.bf16.msra.mxu1 %v5999_v22  ;;  %4693 = vmatprep.subr.bf16.mxu0 %v5864_v12  ;;  %v6280_v22 = vld [vmem:[%s7126_s13 + $0x8] sm:$0xff]  }
 0x401   :  { %4734 = vmatprep.subr.bf16.mxu1 %v5992_v25  ;;  %v6281_v12 = vld [vmem:[%s7126_s13 + $0x88] sm:$0xff]   ;;  %v6282_v25 = vld [vmem:[%s7126_s13 + $0x40] sm:$0xff]  }
 0x403   :  { %4694 = vmatpush2.bf16.msra.mxu0 %v5863_v49  ;;  %v6286_v49 = vld [vmem:[%s7126_s13 + $0x178] sm:$0xff]  }
 0x404   :  { %4735 = vmatpush2.bf16.msra.mxu1 %v5991_v31  ;;  %4695 = vmatprep.subr.bf16.mxu0 %v5856_v32  ;;  %v4751_v31 = vmax.f32 %v6889_v47, 0.0  ;;  %v6302_v32 = vld [vmem:[%s7126_s13 + $0x1f8] sm:$0xff]  }
 0x405   :  { %4736 = vmatprep.subr.bf16.mxu1 %v5984_v33  ;;  %v4757_v33 = vpack.c.bf16 %v4749_v29, %v4749_v29  ;;  %v6303_v47 = vld [vmem:[%s7126_s13 + $0x1b8] sm:$0xff]  }
 0x406   :  { %v4759_v35 = vpack.c.bf16 %v4751_v31, %v4751_v31 }
 0x407   :  { %4696 = vmatpush2.bf16.msra.mxu0 %v5855_v43  ;;  %v6305_v43 = vld [vmem:[%s7126_s13 + $0x1b0] sm:$0xff]  }
 0x408   :  { %4737 = vmatpush2.bf16.msra.mxu1 %v5983_v44  ;;  %4697 = vmatprep.subr.bf16.mxu0 %v5848_v45  ;;  %v6306_v44 = vld [vmem:[%s7126_s13 + $0x1e8] sm:$0xff]  }
 0x409   :  { %4738 = vmatprep.subr.bf16.mxu1 %v5976_v46  ;;  %v6291_v45 = vld [vmem:[%s7126_s13 + $0x128] sm:$0xff]   ;;  %v6292_v46 = vld [vmem:[%s7126_s13 + $0x160] sm:$0xff]  }
 0x40b   :  { %4698 = vmatpush2.bf16.msra.mxu0 %v5847_v48  ;;  %v6308_v48 = vld [vmem:[%s7126_s13 + $0x1e0] sm:$0xff]  }
 0x40c   :  { %4739 = vmatpush2.bf16.msra.mxu1 %v5975_v50  ;;  %6109 = vmatprep.subr.bf16.mxu0 %v6254_v14  ;;  %v6293_v50 = vld [vmem:[%s7126_s13 + $0x120] sm:$0xff]   ;;  %v6294_v14 = vld [vmem:[%s7126_s13 + $0x158] sm:$0xff]  }
 0x40d   :  { %6131 = vmatprep.subr.bf16.mxu1 %v6255_v18  ;;  %v6309_v18 = vld [vmem:[%s7126_s13 + $0x1a0] sm:$0xff]  }
 0x40e   :  { %v6913_v55 = vpop.f32.mrf.mxu0  ;;  %4700 = vmatmul.mubr.bf16.vlgmr.msra.gmra.mxu0 %v6833_v51  ;;  %v6261_v51 = vld [vmem:[%s7126_s13 + $0xb0] sm:$0xff]  }
 0x40f   :  { %v6919_v36 = vpop.f32.mrf.mxu1  ;;  %4741 = vmatmul.mubr.bf16.vlgmr.msra.gmra.mxu1 %v6835_v52  ;;  %6110 = vmatpush3.bf16.msra.mxu0 %v6256_v13  ;;  %v6263_v52 = vld [vmem:[%s7126_s13 + $0xe8] sm:$0xff]   ;;  %v6296_v13 = vld [vmem:[%s7126_s13 + $0x150] sm:$0xff]  }
 0x410   :  { %5316 = vmatprep.mubr.bf16.mxu0 %v4758_v23  ;;  %6132 = vmatpush3.bf16.msra.mxu1 %v6257_v54  ;;  %v6925_v42 = vpop.f32.mrf.mxu0  ;;  %v6311_v54 = vld [vmem:[%s7126_s13 + $0x198] sm:$0xff]   ;;  %v6298_v23 = vld [vmem:[%s7126_s13 + $0x148] sm:$0xff]  }
 0x411   :  { %5356 = vmatprep.mubr.bf16.mxu1 %v4760_v24  ;;  %v6933_v59 = vpop.f32.mrf.mxu1  ;;  %6111 = vmatprep.subr.bf16.mxu0 %v6258_v41  ;;  %v6297_v41 = vld [vmem:[%s7126_s13 + $0x110] sm:$0xff]   ;;  %v1515_v24 = vsub.s32 5, %v6845_v3 }
 0x412   :  { %v4459_v60 = vpop.f32.mrf.mxu0  ;;  %6133 = vmatprep.subr.bf16.mxu1 %v6259_v37  ;;  %v1511_v37 = vsub.s32 4, %v6845_v3 }
 0x413   :  { %v4500_v61 = vpop.f32.mrf.mxu1  ;;  %6112 = vmatpush3.bf16.msra.mxu0 %v6260_v56  ;;  %v6299_v56 = vld [vmem:[%s7126_s13 + $0x108] sm:$0xff]  }
 0x414   :  { %6134 = vmatpush3.bf16.msra.mxu1 %v6261_v51  ;;  %v4460_v63 = vpop.f32.mrf.mxu0  ;;  %6113 = vmatprep.subr.bf16.mxu0 %v6262_v58  ;;  %v6300_v51 = vld [vmem:[%s7126_s13 + $0x140] sm:$0xff]   ;;  %v6318_v58 = vld [vmem:[#allocation20] sm:$0xff] }
 0x415   :  { %v4501_v2 = vpop.f32.mrf.mxu1  ;;  %6135 = vmatprep.subr.bf16.mxu1 %v6263_v52  ;;  %v1512_v52 = vrot.slane %v6318_v58, %v1511_v37  ;;  %v1516_v60 = vrot.slane %v6318_v58, %v1515_v24  ;;  %v6301_v61 = vld [vmem:[%s7126_s13 + $0x100] sm:$0xff]  }
 0x416   :  { %v6312_v2 = vld [vmem:[%s7126_s13 + $0x1d0] sm:$0xff]  }
 0x417   :  { %6114 = vmatpush3.bf16.msra.mxu0 %v6264_v62  ;;  %v4456_v62 = vadd.f32 %v6913_v55, %v1512_v52  ;;  %v4458_v63 = vadd.f32 %v6925_v42, %v1516_v60 }
 0x418   :  { %6136 = vmatpush3.bf16.msra.mxu1 %v6265_v0  ;;  %6115 = vmatprep.subr.bf16.mxu0 %v6266_v1 }
 0x419   :  { %6137 = vmatprep.subr.bf16.mxu1 %v6267_v19  ;;  %v4497_v0 = vadd.f32 %v6919_v36, %v4456_v62  ;;  %v4499_v19 = vadd.f32 %v6933_v59, %v4458_v63  ;;  %v6315_v59 = vld [vmem:[%s7126_s13 + $0x188] sm:$0xff]  }
 0x41b   :  { %6116 = vmatpush3.bf16.msra.mxu0 %v6268_v4 }
 0x41c   :  { %6138 = vmatpush3.bf16.msra.mxu1 %v6269_v6  ;;  %6117 = vmatprep.subr.bf16.mxu0 %v6270_v7  ;;  %v6313_v7 = vld [vmem:[%s7126_s13 + $0x190] sm:$0xff]  }
 0x41d   :  { %6139 = vmatprep.subr.bf16.mxu1 %v6271_v8 }
 0x41f   :  { %6118 = vmatpush3.bf16.msra.mxu0 %v6272_v9 }
 0x420   :  { %6140 = vmatpush3.bf16.msra.mxu1 %v6273_v10  ;;  %6119 = vmatprep.subr.bf16.mxu0 %v6274_v15  ;;  %v6314_v10 = vld [vmem:[%s7126_s13 + $0x1c8] sm:$0xff]  }
 0x421   :  { %6141 = vmatprep.subr.bf16.mxu1 %v6275_v16 }
 0x423   :  { %6120 = vmatpush3.bf16.msra.mxu0 %v6276_v17 }
 0x424   :  { %6142 = vmatpush3.bf16.msra.mxu1 %v6277_v11  ;;  %6121 = vmatprep.subr.bf16.mxu0 %v6278_v20 }
 0x425   :  { %6143 = vmatprep.subr.bf16.mxu1 %v6279_v21 }
 0x427   :  { %6122 = vmatpush3.bf16.msra.mxu0 %v6280_v22  ;;  %v6316_v22 = vld [vmem:[%s7126_s13 + $0x1c0] sm:$0xff]  }
 0x428   :  { %6144 = vmatpush3.bf16.msra.mxu1 %v6281_v12  ;;  %6123 = vmatprep.subr.bf16.mxu0 %v6282_v25  ;;  %v6317_v25 = vld [vmem:[%s7126_s13 + $0x180] sm:$0xff]   ;;  %s6635_s13 = smov [#allocation23]  }
 0x429   :  { %6145 = vmatprep.subr.bf16.mxu1 %v6283_v26  ;;  %s5452_s7 = sshll.u32 %s6635_s13, 4  ;;  %s5453_s7 = int_to_ptr.vmem [resolvable:$true] %s5452_s7 }
 0x42a   :  { %s6579_s26 = scalar_lea.vmem %s5453_s7, 32  ;;  %p6584_p10 = scmp.lt.s32.totalorder %s5453_s7, %s5453_s7 }
 0x42b   :  { %6124 = vmatpush3.bf16.msra.mxu0 %v6284_v27  ;;  %p6580_p9 = scmp.ne.s32.totalorder %s5453_s7, %s6579_s26  ;;  %p6585_p11 = scmp.lt.s32.totalorder %s6579_s26, %s6579_s26 }
 0x42c   :  { %6146 = vmatpush3.bf16.msra.mxu1 %v6285_v30  ;;  %6153 = vmatprep.subr.bf16.mxu0 %v6286_v49 }
 0x42d   :  { %6175 = vmatprep.subr.bf16.mxu1 %v6302_v32  ;;  %p6586_p12 = por %p6585_p11, %p6584_p10 }
 0x42e   :  { %5317 = vmatmul.mubr.bf16.vlgmr.msra.gmra.mxu0 %v4757_v33 }
 0x42f   :  { %5357 = vmatmul.mubr.bf16.vlgmr.msra.gmra.mxu1 %v4759_v35  ;;  %6154 = vmatpush3.bf16.msra.mxu0 %v6287_v28  ;;  %p6587_p13 = pnand %p6586_p12, %p6580_p9 }
 0x430   :  { %6155 = vmatprep.subr.bf16.mxu0 %v6288_v34  ;;  %6176 = vmatpush3.bf16.msra.mxu1 %v6303_v47  ;;  %v1519_v34 = vsub.s32 6, %v6845_v3  ;;  %v1523_v47 = vsub.s32 7, %v6845_v3 }
 0x431   :  { %6177 = vmatprep.subr.bf16.mxu1 %v6304_v38 }
 0x432   :  { %v1520_v35 = vrot.slane %v6318_v58, %v1519_v34  ;;  %v1524_v38 = vrot.slane %v6318_v58, %v1523_v47  ;;  %v6033_v58 = vld [vmem:[#allocation22] ss:$0 sm:$0xff] }
 0x433   :  { %6156 = vmatpush3.bf16.msra.mxu0 %v6289_v39 }
 0x434   :  { %6157 = vmatprep.subr.bf16.mxu0 %v6290_v40  ;;  %6178 = vmatpush3.bf16.msra.mxu1 %v6305_v43 }
 0x435   :  { %6179 = vmatprep.subr.bf16.mxu1 %v6306_v44 }
 0x437   :  { %6158 = vmatpush3.bf16.msra.mxu0 %v6291_v45 }
 0x438   :  { %6159 = vmatprep.subr.bf16.mxu0 %v6292_v46  ;;  %6180 = vmatpush3.bf16.msra.mxu1 %v6307_v5 }
 0x439   :  { %6181 = vmatprep.subr.bf16.mxu1 %v6308_v48 }
 0x43b   :  { %6160 = vmatpush3.bf16.msra.mxu0 %v6293_v50 }
 0x43c   :  { %6161 = vmatprep.subr.bf16.mxu0 %v6294_v14  ;;  %6182 = vmatpush3.bf16.msra.mxu1 %v6309_v18 }
 0x43d   :  { %6183 = vmatprep.subr.bf16.mxu1 %v6310_v57 }
 0x43f   :  { %6162 = vmatpush3.bf16.msra.mxu0 %v6295_v53 }
 0x440   :  { %6163 = vmatprep.subr.bf16.mxu0 %v6296_v13  ;;  %6184 = vmatpush3.bf16.msra.mxu1 %v6311_v54 }
 0x441   :  { %6185 = vmatprep.subr.bf16.mxu1 %v6312_v2 }
 0x443   :  { %6164 = vmatpush3.bf16.msra.mxu0 %v6297_v41 }
 0x444   :  { %6165 = vmatprep.subr.bf16.mxu0 %v6298_v23  ;;  %6186 = vmatpush3.bf16.msra.mxu1 %v6313_v7 }
 0x445   :  { %6187 = vmatprep.subr.bf16.mxu1 %v6314_v10 }
 0x447   :  { %6166 = vmatpush3.bf16.msra.mxu0 %v6299_v56 }
 0x448   :  { %6167 = vmatprep.subr.bf16.mxu0 %v6300_v51  ;;  %6188 = vmatpush3.bf16.msra.mxu1 %v6315_v59 }
 0x449   :  { %6189 = vmatprep.subr.bf16.mxu1 %v6316_v22 }
 0x44b   :  { %6168 = vmatpush3.bf16.msra.mxu0 %v6301_v61 }
 0x44c   :  { %6190 = vmatpush3.bf16.msra.mxu1 %v6317_v25 }
 0x44e   :  { %v4537_v1 = vpop.f32.mrf.mxu0 }
 0x44f   :  { %v4538_v4 = vadd.f32 %v4537_v1, %v4497_v0  ;;  %v4578_v6 = vpop.f32.mrf.mxu1 }
 0x450   :  { %v4539_v8 = vpop.f32.mrf.mxu0 }
 0x451   :  { %v4579_v55 = vadd.f32 %v4578_v6, %v4538_v4  ;;  %v4540_v42 = vadd.f32 %v4539_v8, %v4499_v19  ;;  %v4580_v9 = vpop.f32.mrf.mxu1 }
 0x452   :  { %v4541_v36 = vpop.f32.mrf.mxu0 }
 0x453   :  { %v4581_v15 = vadd.f32 %v4580_v9, %v4540_v42  ;;  %v4582_v16 = vpop.f32.mrf.mxu1  ;;  %v4753_v17 = vmax.f32 %v4579_v55, 0.0 }
 0x454   :  { %v4542_v11 = vpop.f32.mrf.mxu0 }
 0x455   :  { %v4754_v20 = vmax.f32 %v4581_v15, 0.0  ;;  %v4583_v21 = vpop.f32.mrf.mxu1  ;;  %v4761_v26 = vpack.c.bf16 %v4753_v17, %v4753_v17 }
 0x457   :  { %v4762_v12 = vpack.c.bf16 %v4754_v20, %v4754_v20 }
 0x459   :  { %5396 = vmatprep.mubr.bf16.mxu0 %v4762_v12 }
 0x45a   :  { %5397 = vmatmul.mubr.bf16.vlgmr.msra.gmra.mxu0 %v4761_v26 }
 0x48e   :  { %v4619_v27 = vpop.f32.mrf.mxu0 }
 0x48f   :  { %v4660_v29 = vpop.f32.mrf.mxu1  ;;  %v4620_v39 = vadd.f32 %v4619_v27, %v1520_v35 }
 0x490   :  { %v4621_v30 = vpop.f32.mrf.mxu0 }
 0x491   :  { %v4662_v49 = vpop.f32.mrf.mxu1  ;;  %v4622_v40 = vadd.f32 %v4621_v30, %v1524_v38  ;;  %v4661_v43 = vadd.f32 %v4660_v29, %v4620_v39 }
 0x492   :  { %v4623_v31 = vpop.f32.mrf.mxu0 }
 0x493   :  { %v4664_v32 = vpop.f32.mrf.mxu1  ;;  %v4663_v45 = vadd.f32 %v4662_v49, %v4622_v40 }
 0x494   :  { %v4624_v28 = vpop.f32.mrf.mxu0 }
 0x495   :  { %v4665_v33 = vpop.f32.mrf.mxu1 }
 0x4ce   :  { %v4701_v44 = vpop.f32.mrf.mxu0 }
 0x4cf   :  { %v4702_v46 = vadd.f32 %v4701_v44, %v4661_v43  ;;  %v4742_v5 = vpop.f32.mrf.mxu1 }
 0x4d0   :  { %v4703_v48 = vpop.f32.mrf.mxu0 }
 0x4d1   :  { %v4743_v50 = vadd.f32 %v4742_v5, %v4702_v46  ;;  %v4704_v14 = vadd.f32 %v4703_v48, %v4663_v45  ;;  %v4744_v18 = vpop.f32.mrf.mxu1 }
 0x4d2   :  { %v4705_v57 = vpop.f32.mrf.mxu0 }
 0x4d3   :  { %v4745_v53 = vadd.f32 %v4744_v18, %v4704_v14  ;;  %v4746_v13 = vpop.f32.mrf.mxu1  ;;  %v4755_v54 = vmax.f32 %v4743_v50, 0.0 }
 0x4d4   :  { %v4706_v41 = vpop.f32.mrf.mxu0 }
 0x4d5   :  { %v4756_v23 = vmax.f32 %v4745_v53, 0.0  ;;  %v4747_v3 = vpop.f32.mrf.mxu1  ;;  %v4763_v24 = vpack.c.bf16 %v4755_v54, %v4755_v54 }
 0x4d7   :  { %v4764_v37 = vpack.c.bf16 %v4756_v23, %v4756_v23 }
 0x4d9   :  { %5436 = vmatprep.mubr.bf16.mxu1 %v4764_v37 }
 0x4da   :  { %5437 = vmatmul.mubr.bf16.vlgmr.msra.gmra.mxu1 %v4763_v24 }
 0x4ee   :  { %v6125_v56 = vpop.f32.mrf.mxu0 }
 0x4ef   :  { %v6147_v51 = vpop.f32.mrf.mxu1 }
 0x4f0   :  { %v6126_v52 = vpop.f32.mrf.mxu0 }
 0x4f1   :  { %v6127_v60 = vadd.f32 %v6126_v52, %v6125_v56  ;;  %v6148_v61 = vpop.f32.mrf.mxu1 }
 0x4f2   :  { %v6149_v62 = vadd.f32 %v6148_v61, %v6147_v51  ;;  %v6128_v63 = vpop.f32.mrf.mxu0 }
 0x4f3   :  { %v5319_v0 = vadd.f32 %v6127_v60, %v6033_v58  ;;  %v6150_v1 = vpop.f32.mrf.mxu1 }
 0x4f4   :  { %v6129_v2 = vpop.f32.mrf.mxu0 }
 0x4f5   :  { %v5359_v19 = vadd.f32 %v6149_v62, %v5319_v0  ;;  %v6151_v4 = vpop.f32.mrf.mxu1 }
 0x51a   :  { %v6169_v6 = vpop.f32.mrf.mxu0 }
 0x51c   :  { %v6170_v7 = vpop.f32.mrf.mxu0 }
 0x51d   :  { %v6171_v8 = vadd.f32 %v6170_v7, %v6169_v6 }
 0x51e   :  { %v6172_v55 = vpop.f32.mrf.mxu0 }
 0x51f   :  { %v5399_v42 = vadd.f32 %v6171_v8, %v5359_v19 }
 0x520   :  { %v6173_v9 = vpop.f32.mrf.mxu0 }
 0x59a   :  { %v6191_v36 = vpop.f32.mrf.mxu1 }
 0x59c   :  { %v6192_v10 = vpop.f32.mrf.mxu1 }
 0x59d   :  { %v6193_v15 = vadd.f32 %v6192_v10, %v6191_v36 }
 0x59e   :  { %v6194_v16 = vpop.f32.mrf.mxu1 }
 0x59f   :  { %v5439_v59 = vadd.f32 %v6193_v15, %v5399_v42 }
 0x5a0   :  { %v6195_v17 = vpop.f32.mrf.mxu1 }
 0x5a1   :  { %5445 = vst.msk [vmem:[#allocation23] sm:$0x3] %vm5444_vm3, %v5439_v59 }
 0x5a2   :  { %6590 = shalt.err (!%p6587_p13)
}
 0x5a3   :  { %5455 = dma.vmem_to_hbm [thread:$0]  %s5453_s7, 32, %s7128_s15, [#allocation4]  }
 0x5a4   :  { %6613 = dma.done.wait [#allocation4], 32  }
 0x5a5   :  { %6614 = vsyncadd [#allocation4], 4294967264 }
 0x5a6   :  { %5459 = vsyncpa [#allocation3], 1 }
 0x5a7   :  { %5460 = vsyncpa [#allocation6], 1 }
 0x5a8   :  { %5461 = vsyncpa [#allocation9], 1 }
 0x5a9   :  { %5462 = vsyncpa [#allocation12], 1 }
 0x5aa   :  { %5463 = vsyncpa [#allocation15], 1 }
 0x5ab   :  { %5464 = vsyncpa [#allocation18], 1 }
 0x5ac   :  { %5465 = vsyncpa [#allocation21], 1 }
 0x5ad   :  { %5466 = vsyncpa [#allocation4], 1 }

</bundles_post_ra>
